<compile_context>
chip_gen: v6e
topology: v6e:2x2x1
jax: 0.10.0
libtpu: 0.0.40
codegen_flags: <defaults>
</compile_context>

<pallas_src>
import functools

import jax
import jax.numpy as jnp
from jax.experimental import pallas as pl
from jax.experimental.pallas import tpu as pltpu


def _round_up(x, m):
    return (x + m - 1) // m * m


def _tiles(dim, pref, align):
    """Return (tile, padded_dim) with tile % align == 0 and tile | padded_dim."""
    if dim <= pref:
        t = _round_up(dim, align)
        return t, t
    return pref, _round_up(dim, pref)


# ----------------------------------------------------------------------------
# Fused matmul kernel: activation prologue on A, K-reduction with f32 VMEM
# accumulator, bias (+ tanh) epilogue, optional per-channel sum/sumsq stats.
# ----------------------------------------------------------------------------
def _mm_kernel(a_ref, b_ref, bias_ref, *refs, act_in, act_out, with_stats):
    o_ref = refs[0]
    acc_ref = refs[-1]

    @pl.when(pl.program_id(2) == 0)
    def _():
        acc_ref[...] = jnp.zeros_like(acc_ref)

    a = a_ref[...]
    if act_in == "leaky":
        a = jnp.where(a >= 0, a, a * 0.2)
    elif act_in == "relu":
        a = jnp.maximum(a, 0)

    acc_ref[...] += jnp.dot(a, b_ref[...], preferred_element_type=jnp.float32)

    @pl.when(pl.program_id(2) == pl.num_programs(2) - 1)
    def _():
        y = acc_ref[...] + bias_ref[...]
        if with_stats:
            # Per-M-tile partial BN statistics (exact, from the f32 accumulator).
            refs[1][...] = jnp.sum(y, axis=0, keepdims=True)[None]
            refs[2][...] = jnp.sum(y * y, axis=0, keepdims=True)[None]
        if act_out == "tanh":
            y = jnp.tanh(y)
        o_ref[...] = y.astype(o_ref.dtype)


def fused_matmul(a, b, bias=None, act_in=None, act_out=None,
                 want_stats=False, out_dtype=jnp.float32):
    """a: (M, K), b: (K, N) -> (M, N) out_dtype.

    Returns out, or (out, (col_sum, col_sumsq)) with f32 per-column stats of the
    pre-activation (post-bias) result when want_stats=True.
    """
    M, K = a.shape
    _, N = b.shape
    tm, Mp = _tiles(M, 512, 8)
    tn, Np = _tiles(N, 512, 128)
    tk, Kp = _tiles(K, 512, 128)

    a_p = jnp.pad(a.astype(jnp.bfloat16), ((0, Mp - M), (0, Kp - K)))
    b_p = jnp.pad(b.astype(jnp.bfloat16), ((0, Kp - K), (0, Np - N)))
    if bias is None:
        bias = jnp.zeros((N,), jnp.float32)
    bias_p = jnp.pad(bias.astype(jnp.float32), (0, Np - N)).reshape(1, Np)

    gm, gn, gk = Mp // tm, Np // tn, Kp // tk

    o_shape = jax.ShapeDtypeStruct((Mp, Np), out_dtype)
    o_spec = pl.BlockSpec((tm, tn), lambda i, j, k: (i, j))
    if want_stats:
        # (G, 1, Np) with block (1, 1, tn) keeps the last-two-dims tiling legal.
        s_shape = jax.ShapeDtypeStruct((gm, 1, Np), jnp.float32)
        s_spec = pl.BlockSpec((1, 1, tn), lambda i, j, k: (i, 0, j))
        out_shape = (o_shape, s_shape, s_shape)
        out_specs = (o_spec, s_spec, s_spec)
    else:
        out_shape = o_shape
        out_specs = o_spec

    res = pl.pallas_call(
        functools.partial(_mm_kernel, act_in=act_in, act_out=act_out,
                          with_stats=want_stats),
        out_shape=out_shape,
        grid_spec=pltpu.PrefetchScalarGridSpec(
            num_scalar_prefetch=0,
            grid=(gm, gn, gk),
            in_specs=[pl.BlockSpec((tm, tk), lambda i, j, k: (i, k)),
                      pl.BlockSpec((tk, tn), lambda i, j, k: (k, j)),
                      pl.BlockSpec((1, tn), lambda i, j, k: (0, j))],
            out_specs=out_specs,
            scratch_shapes=[pltpu.VMEM((tm, tn), jnp.float32)]),
        compiler_params=pltpu.CompilerParams(
            dimension_semantics=("parallel", "parallel", "arbitrary")),
    )(a_p, b_p, bias_p)

    if want_stats:
        out, psum, psq = res
        # Padded rows / cols contribute exactly zero (zero A rows, zero weights).
        col_sum = jnp.sum(psum[:, 0, :N], axis=0)
        col_sq = jnp.sum(psq[:, 0, :N], axis=0)
        return out[:M, :N], (col_sum, col_sq)
    return res[:M, :N]


# ----------------------------------------------------------------------------
# BatchNorm2d helper math (training-mode batch statistics); the heavy work
# (stats reduction) happens inside the matmul epilogue, the per-channel affine
# is folded into the consumer's im2col prep by the caller.
# ----------------------------------------------------------------------------
def _bn_affine(col_sum, col_sq, count, gamma, beta, eps=1e-5):
    mean = col_sum / float(count)
    var = col_sq / float(count) - mean * mean
    scale = gamma.astype(jnp.float32) * jax.lax.rsqrt(var + eps)
    shift = beta.astype(jnp.float32) - mean * scale
    return scale, shift


def _apply_affine(h, scale, shift):
    # Fused by XLA into the consumer's im2col / concat fusion.
    return h * scale.astype(h.dtype) + shift.astype(h.dtype)


# ----------------------------------------------------------------------------
# Conv2d (k=4, s=2, p=1) and ConvTranspose2d (k=4, s=2, p=1) via bf16 im2col
# + fused Pallas matmul.  Activations / bias / tanh / BN stats fused in.
# ----------------------------------------------------------------------------
def conv2d_s2(x, w, act_in=None, act_out=None, bias=None,
              want_stats=False, out_dtype=jnp.bfloat16):
    """x: NHWC; w: (4,4,Cin,Cout).  Computes conv(act_in(x)) with fused act_in."""
    N, H, W, Cin = x.shape
    KH, KW, _, Cout = w.shape
    Ho, Wo = H // 2, W // 2
    xb = x.astype(jnp.bfloat16)
    xp = jnp.pad(xb, ((0, 0), (1, 1), (1, 1), (0, 0)))
    taps = [xp[:, kh:kh + 2 * Ho - 1:2, kw:kw + 2 * Wo - 1:2, :]
            for kh in range(KH) for kw in range(KW)]
    A = jnp.stack(taps, axis=3).reshape(N * Ho * Wo, KH * KW * Cin)
    B = w.reshape(KH * KW * Cin, Cout)
    res = fused_matmul(A, B, bias=bias, act_in=act_in, act_out=act_out,
                       want_stats=want_stats, out_dtype=out_dtype)
    if want_stats:
        out, stats = res
        return out.reshape(N, Ho, Wo, Cout), stats
    return res.reshape(N, Ho, Wo, Cout), None


# Phase decomposition of a k=4, s=2, p=1 transposed conv (r/s = output parity):
#   (r, dh_in_padded_input) -> kernel row used; taps not present contribute 0.
_PHASE_KR = {(0, 0): 3, (0, 1): 1, (1, 1): 2, (1, 2): 0}


def conv_transpose2d_s2(x, w_pt, act_in=None, act_out=None, bias=None,
                        want_stats=False, out_dtype=jnp.bfloat16):
    """x: NHWC; w_pt: (Cin,Cout,4,4) PyTorch ConvTranspose2d layout.

    Single matmul over a 9-tap im2col producing all 4 output phases at once.
    """
    N, H, W, Cin = x.shape
    _, Cout, KH, KW = w_pt.shape
    xb = x.astype(jnp.bfloat16)
    xp = jnp.pad(xb, ((0, 0), (1, 1), (1, 1), (0, 0)))
    taps = [xp[:, dh:dh + H, dw:dw + W, :] for dh in range(3) for dw in range(3)]
    A = jnp.stack(taps, axis=3).reshape(N * H * W, 9 * Cin)

    wz = jnp.zeros((Cin, Cout), w_pt.dtype)
    k_blocks = []
    for dh in range(3):
        for dw in range(3):
            phase_cols = []
            for r in range(2):
                for s in range(2):
                    kr = _PHASE_KR.get((r, dh))
                    kc = _PHASE_KR.get((s, dw))
                    if kr is None or kc is None:
                        phase_cols.append(wz)
                    else:
                        phase_cols.append(w_pt[:, :, kr, kc])      # (Cin, Cout)
            k_blocks.append(jnp.concatenate(phase_cols, axis=1))   # (Cin, 4*Cout)
    B = jnp.concatenate(k_blocks, axis=0)                          # (9*Cin, 4*Cout)
    bias4 = None if bias is None else jnp.tile(bias, 4)

    res = fused_matmul(A, B, bias=bias4, act_in=act_in, act_out=act_out,
                       want_stats=want_stats, out_dtype=out_dtype)
    if want_stats:
        out2d, (col_sum, col_sq) = res
    else:
        out2d, col_sum, col_sq = res, None, None

    out = out2d.reshape(N, H, W, 2, 2, Cout)
    out = jnp.transpose(out, (0, 1, 3, 2, 4, 5)).reshape(N, 2 * H, 2 * W, Cout)
    if want_stats:
        col_sum = col_sum.reshape(4, Cout).sum(axis=0)
        col_sq = col_sq.reshape(4, Cout).sum(axis=0)
        return out, (col_sum, col_sq)
    return out, None


# ----------------------------------------------------------------------------
# UnetSkipConnectionBlock / UnetGeneratorMM structure
# ----------------------------------------------------------------------------
def block_forward(x, p):
    kind = p["kind"]
    if kind == "outermost":
        h, _ = conv2d_s2(x, p["wd"])                                 # downconv
        h = block_forward(h, p["sub"])
        y, _ = conv_transpose2d_s2(h, p["wu"], act_in="relu",        # uprelu fused
                                   bias=p["bu"], act_out="tanh",     # bias+tanh fused
                                   out_dtype=jnp.float32)
        return y
    if kind == "innermost":
        h, _ = conv2d_s2(x, p["wd"], act_in="leaky")                 # downrelu fused
        u, (us, uq) = conv_transpose2d_s2(h, p["wu"], act_in="relu", # uprelu fused
                                          want_stats=True)           # stats fused
        cnt = u.shape[0] * u.shape[1] * u.shape[2]
        sc, sh = _bn_affine(us, uq, cnt, p["gu"], p["bu_bn"])         # upnorm
        u = _apply_affine(u, sc, sh)
        return jnp.concatenate([x, u], axis=-1)                      # skip
    # middle block
    h, (ds_, dq) = conv2d_s2(x, p["wd"], act_in="leaky",             # downrelu+conv
                             want_stats=True)
    cnt = h.shape[0] * h.shape[1] * h.shape[2]
    sc, sh = _bn_affine(ds_, dq, cnt, p["gd"], p["bd_bn"])           # downnorm
    h = _apply_affine(h, sc, sh)
    h = block_forward(h, p["sub"])
    u, (us, uq) = conv_transpose2d_s2(h, p["wu"], act_in="relu",     # uprelu+deconv
                                      want_stats=True)
    cnt = u.shape[0] * u.shape[1] * u.shape[2]
    sc, sh = _bn_affine(us, uq, cnt, p["gu"], p["bu_bn"])            # upnorm
    u = _apply_affine(u, sc, sh)
    return jnp.concatenate([x, u], axis=-1)                          # skip
    # TODO(synk): nn.Dropout(0.5) branch omitted (use_dropout=False default)


def init_params(key, input_nc, output_nc, num_downs, ngf):
    keys = iter(jax.random.split(key, 4 * num_downs + 8))

    def conv_w(k, cin, cout):       # stored as (KH, KW, Cin, Cout)
        return 0.05 * jax.random.normal(k, (4, 4, cin, cout), jnp.float32)

    def convt_w(k, cin, cout):      # PyTorch ConvTranspose2d layout (Cin, Cout, KH, KW)
        return 0.05 * jax.random.normal(k, (cin, cout, 4, 4), jnp.float32)

    # innermost: (ngf*8, ngf*8)
    block = {"kind": "innermost",
             "wd": conv_w(next(keys), ngf * 8, ngf * 8),
             "wu": convt_w(next(keys), ngf * 8, ngf * 8),
             "gu": jnp.ones((ngf * 8,), jnp.float32),
             "bu_bn": jnp.zeros((ngf * 8,), jnp.float32)}
    # num_downs - 5 middle (ngf*8, ngf*8) blocks
    for _ in range(num_downs - 5):
        block = {"kind": "mid",
                 "wd": conv_w(next(keys), ngf * 8, ngf * 8),
                 "gd": jnp.ones((ngf * 8,), jnp.float32),
                 "bd_bn": jnp.zeros((ngf * 8,), jnp.float32),
                 "wu": convt_w(next(keys), ngf * 8 * 2, ngf * 8),
                 "gu": jnp.ones((ngf * 8,), jnp.float32),
                 "bu_bn": jnp.zeros((ngf * 8,), jnp.float32),
                 "sub": block}
    # (ngf*4, ngf*8), (ngf*2, ngf*4), (ngf, ngf*2)
    for mo, mi in ((4, 8), (2, 4), (1, 2)):
        block = {"kind": "mid",
                 "wd": conv_w(next(keys), ngf * mo, ngf * mi),
                 "gd": jnp.ones((ngf * mi,), jnp.float32),
                 "bd_bn": jnp.zeros((ngf * mi,), jnp.float32),
                 "wu": convt_w(next(keys), ngf * mi * 2, ngf * mo),
                 "gu": jnp.ones((ngf * mo,), jnp.float32),
                 "bu_bn": jnp.zeros((ngf * mo,), jnp.float32),
                 "sub": block}
    # outermost: (output_nc, ngf), input_nc channels in; upconv has bias=True
    block = {"kind": "outermost",
             "wd": conv_w(next(keys), input_nc, ngf),
             "wu": convt_w(next(keys), ngf * 2, output_nc),
             "bu": 0.05 * jax.random.normal(next(keys), (output_nc,), jnp.float32),
             "sub": block}
    return block


class UnetGeneratorMM:
    def __init__(self, input_nc, output_nc, num_downs, ngf=64, key=None):
        if key is None:
            key = jax.random.PRNGKey(0)
        params = init_params(key, input_nc, output_nc, num_downs, ngf)
        self.params = params

        @jax.jit
        def fwd(x_nchw):
            x = jnp.transpose(x_nchw, (0, 2, 3, 1)).astype(jnp.float32)  # NCHW->NHWC
            y = block_forward(x, params)
            return jnp.transpose(y, (0, 3, 1, 2))                        # NHWC->NCHW

        self._fwd = fwd

    def __call__(self, x_nchw, input2=None):
        # `input2` is ignored, exactly like the PyTorch forward.
        return self._fwd(x_nchw)


if __name__ == "__main__":
    key = jax.random.PRNGKey(0)
    k_in, k_in2, k_param = jax.random.split(key, 3)

    # small shapes: num_downs=5 requires spatial divisible by 2**5
    N, C, H, W = 2, 4, 32, 32
    x = jax.random.normal(k_in, (N, C, H, W), jnp.float32)
    x2 = jax.random.normal(k_in2, (N, C, H, W), jnp.float32)   # unused second input

    model = UnetGeneratorMM(input_nc=4, output_nc=3, num_downs=5, ngf=8, key=k_param)
    out = model(x, x2)
    out = jax.block_until_ready(out)
    assert out.shape == (N, 3, H, W), out.shape
    assert bool(jnp.all(jnp.isfinite(out)))
    print("KERNEL_OK")
</pallas_src>

<mosaic_0001>
module attributes {stable_mosaic.version = 11 : i64} {
  func.func @_mm_kernel(%arg0: i32, %arg1: i32, %arg2: i32, %arg3: memref<512x128xbf16, #tpu.memory_space<vmem>>, %arg4: memref<128x128xbf16, #tpu.memory_space<vmem>>, %arg5: memref<1x128xf32, #tpu.memory_space<vmem>>, %arg6: memref<512x128xbf16, #tpu.memory_space<vmem>>, %arg7: memref<512x128xf32, #tpu.memory_space<vmem>>) attributes {dimension_semantics = [#tpu.dimension_semantics<parallel>, #tpu.dimension_semantics<parallel>, #tpu.dimension_semantics<arbitrary>], iteration_bounds = array<i64: 1, 1, 1>, scalar_prefetch = 0 : i64, scratch_operands = 1 : i64, tpu.core_type = #tpu.core_type<tc>, window_params = [{transform_indices = @transform_0, window_bounds = array<i64: 512, 128>}, {transform_indices = @transform_1, window_bounds = array<i64: 128, 128>}, {transform_indices = @transform_2, window_bounds = array<i64: 1, 128>}, {transform_indices = @transform_3, window_bounds = array<i64: 512, 128>}]} {
    %c0_i32 = arith.constant 0 : i32
    %0 = arith.cmpi eq, %arg2, %c0_i32 : i32
    %1 = arith.extui %0 : i1 to i32
    %c0_i32_0 = arith.constant 0 : i32
    %2 = arith.cmpi ne, %1, %c0_i32_0 : i32
    scf.if %2 {
      %cst_10 = arith.constant 0.000000e+00 : f32
      %12 = vector.broadcast %cst_10 : f32 to vector<512x128xf32>
      %c0_11 = arith.constant 0 : index
      %c0_12 = arith.constant 0 : index
      %13 = vector.load %arg7[%c0_11, %c0_12] : memref<512x128xf32, #tpu.memory_space<vmem>>, vector<512x128xf32>
      tpu.vector_store %arg7[%c0_11, %c0_12], %12 {strides = array<i32>} : memref<512x128xf32, #tpu.memory_space<vmem>>, vector<512x128xf32>,
    } else {
    }
    %c0 = arith.constant 0 : index
    %c0_1 = arith.constant 0 : index
    %3 = vector.load %arg3[%c0, %c0_1] : memref<512x128xbf16, #tpu.memory_space<vmem>>, vector<512x128xbf16>
    %c0_2 = arith.constant 0 : index
    %c0_3 = arith.constant 0 : index
    %4 = vector.load %arg7[%c0_2, %c0_3] : memref<512x128xf32, #tpu.memory_space<vmem>>, vector<512x128xf32>
    %c0_4 = arith.constant 0 : index
    %c0_5 = arith.constant 0 : index
    %5 = vector.load %arg4[%c0_4, %c0_5] : memref<128x128xbf16, #tpu.memory_space<vmem>>, vector<128x128xbf16>
    %cst = arith.constant dense<0.000000e+00> : vector<512x128xf32>
    %6 = tpu.matmul %3, %5, %cst {dimension_numbers = #tpu.dot_dimension_numbers<[1], [0], [0], [1], [0, 0, 1, 1], [], []>} : vector<512x128xbf16>, vector<128x128xbf16>, vector<512x128xf32> -> vector<512x128xf32>
    %7 = arith.addf %4, %6 : vector<512x128xf32>
    %c0_6 = arith.constant 0 : index
    %c0_7 = arith.constant 0 : index
    %8 = vector.load %arg7[%c0_6, %c0_7] : memref<512x128xf32, #tpu.memory_space<vmem>>, vector<512x128xf32>
    tpu.vector_store %arg7[%c0_6, %c0_7], %7 {strides = array<i32>} : memref<512x128xf32, #tpu.memory_space<vmem>>, vector<512x128xf32>,
    %c0_i32_8 = arith.constant 0 : i32
    %9 = arith.cmpi eq, %arg2, %c0_i32_8 : i32
    %10 = arith.extui %9 : i1 to i32
    %c0_i32_9 = arith.constant 0 : i32
    %11 = arith.cmpi ne, %10, %c0_i32_9 : i32
    scf.if %11 {
      %c0_10 = arith.constant 0 : index
      %c0_11 = arith.constant 0 : index
      %12 = vector.load %arg7[%c0_10, %c0_11] : memref<512x128xf32, #tpu.memory_space<vmem>>, vector<512x128xf32>
      %c0_12 = arith.constant 0 : index
      %c0_13 = arith.constant 0 : index
      %13 = vector.load %arg5[%c0_12, %c0_13] : memref<1x128xf32, #tpu.memory_space<vmem>>, vector<1x128xf32>
      %14 = vector.broadcast %13 : vector<1x128xf32> to vector<512x128xf32>
      %15 = arith.addf %12, %14 : vector<512x128xf32>
      %16 = arith.truncf %15 : vector<512x128xf32> to vector<512x128xbf16>
      %c0_14 = arith.constant 0 : index
      %c0_15 = arith.constant 0 : index
      %17 = vector.load %arg6[%c0_14, %c0_15] : memref<512x128xbf16, #tpu.memory_space<vmem>>, vector<512x128xbf16>
      tpu.vector_store %arg6[%c0_14, %c0_15], %16 {strides = array<i32>} : memref<512x128xbf16, #tpu.memory_space<vmem>>, vector<512x128xbf16>,
    } else {
    }
    return
  }
  func.func @transform_0(%arg0: i32, %arg1: i32, %arg2: i32) -> (i32, i32) {
    %c0_i32 = arith.constant 0 : i32
    return %arg0, %arg2 : i32, i32
  }
  func.func @transform_1(%arg0: i32, %arg1: i32, %arg2: i32) -> (i32, i32) {
    %c0_i32 = arith.constant 0 : i32
    return %arg2, %arg1 : i32, i32
  }
  func.func @transform_2(%arg0: i32, %arg1: i32, %arg2: i32) -> (i32, i32) {
    %c0_i32 = arith.constant 0 : i32
    %c0_i32_0 = arith.constant 0 : i32
    return %c0_i32, %arg1 : i32, i32
  }
  func.func @transform_3(%arg0: i32, %arg1: i32, %arg2: i32) -> (i32, i32) {
    %c0_i32 = arith.constant 0 : i32
    return %arg0, %arg1 : i32, i32
  }
}

module attributes {stable_mosaic.version = 11 : i64} {
  func.func @_mm_kernel(%arg0: i32, %arg1: i32, %arg2: i32, %arg3: memref<128x128xbf16, #tpu.memory_space<vmem>>, %arg4: memref<128x128xbf16, #tpu.memory_space<vmem>>, %arg5: memref<1x128xf32, #tpu.memory_space<vmem>>, %arg6: memref<128x128xbf16, #tpu.memory_space<vmem>>, %arg7: memref<1x1x128xf32, #tpu.memory_space<vmem>>, %arg8: memref<1x1x128xf32, #tpu.memory_space<vmem>>, %arg9: memref<128x128xf32, #tpu.memory_space<vmem>>) attributes {dimension_semantics = [#tpu.dimension_semantics<parallel>, #tpu.dimension_semantics<parallel>, #tpu.dimension_semantics<arbitrary>], iteration_bounds = array<i64: 1, 1, 1>, scalar_prefetch = 0 : i64, scratch_operands = 1 : i64, tpu.core_type = #tpu.core_type<tc>, window_params = [{transform_indices = @transform_0, window_bounds = array<i64: 128, 128>}, {transform_indices = @transform_1, window_bounds = array<i64: 128, 128>}, {transform_indices = @transform_2, window_bounds = array<i64: 1, 128>}, {transform_indices = @transform_3, window_bounds = array<i64: 128, 128>}, {transform_indices = @transform_4, window_bounds = array<i64: 1, 1, 128>}, {transform_indices = @transform_5, window_bounds = array<i64: 1, 1, 128>}]} {
    %c0_i32 = arith.constant 0 : i32
    %0 = arith.cmpi eq, %arg2, %c0_i32 : i32
    %1 = arith.extui %0 : i1 to i32
    %c0_i32_0 = arith.constant 0 : i32
    %2 = arith.cmpi ne, %1, %c0_i32_0 : i32
    scf.if %2 {
      %cst_12 = arith.constant 0.000000e+00 : f32
      %17 = vector.broadcast %cst_12 : f32 to vector<128x128xf32>
      %c0_13 = arith.constant 0 : index
      %c0_14 = arith.constant 0 : index
      %18 = vector.load %arg9[%c0_13, %c0_14] : memref<128x128xf32, #tpu.memory_space<vmem>>, vector<128x128xf32>
      tpu.vector_store %arg9[%c0_13, %c0_14], %17 {strides = array<i32>} : memref<128x128xf32, #tpu.memory_space<vmem>>, vector<128x128xf32>,
    } else {
    }
    %c0 = arith.constant 0 : index
    %c0_1 = arith.constant 0 : index
    %3 = vector.load %arg3[%c0, %c0_1] : memref<128x128xbf16, #tpu.memory_space<vmem>>, vector<128x128xbf16>
    %cst = arith.constant 0.000000e+00 : bf16
    %4 = vector.broadcast %cst : bf16 to vector<128x128xbf16>
    %5 = arith.cmpf oge, %3, %4 : vector<128x128xbf16>
    %cst_2 = arith.constant 2.001950e-01 : bf16
    %6 = vector.broadcast %cst_2 : bf16 to vector<128x128xbf16>
    %7 = arith.mulf %3, %6 : vector<128x128xbf16>
    %8 = arith.select %5, %3, %7 : vector<128x128xi1>, vector<128x128xbf16>
    %c0_3 = arith.constant 0 : index
    %c0_4 = arith.constant 0 : index
    %9 = vector.load %arg9[%c0_3, %c0_4] : memref<128x128xf32, #tpu.memory_space<vmem>>, vector<128x128xf32>
    %c0_5 = arith.constant 0 : index
    %c0_6 = arith.constant 0 : index
    %10 = vector.load %arg4[%c0_5, %c0_6] : memref<128x128xbf16, #tpu.memory_space<vmem>>, vector<128x128xbf16>
    %cst_7 = arith.constant dense<0.000000e+00> : vector<128x128xf32>
    %11 = tpu.matmul %8, %10, %cst_7 {dimension_numbers = #tpu.dot_dimension_numbers<[1], [0], [0], [1], [0, 0, 1, 1], [], []>} : vector<128x128xbf16>, vector<128x128xbf16>, vector<128x128xf32> -> vector<128x128xf32>
    %12 = arith.addf %9, %11 : vector<128x128xf32>
    %c0_8 = arith.constant 0 : index
    %c0_9 = arith.constant 0 : index
    %13 = vector.load %arg9[%c0_8, %c0_9] : memref<128x128xf32, #tpu.memory_space<vmem>>, vector<128x128xf32>
    tpu.vector_store %arg9[%c0_8, %c0_9], %12 {strides = array<i32>} : memref<128x128xf32, #tpu.memory_space<vmem>>, vector<128x128xf32>,
    %c0_i32_10 = arith.constant 0 : i32
    %14 = arith.cmpi eq, %arg2, %c0_i32_10 : i32
    %15 = arith.extui %14 : i1 to i32
    %c0_i32_11 = arith.constant 0 : i32
    %16 = arith.cmpi ne, %15, %c0_i32_11 : i32
    scf.if %16 {
      %c0_12 = arith.constant 0 : index
      %c0_13 = arith.constant 0 : index
      %17 = vector.load %arg9[%c0_12, %c0_13] : memref<128x128xf32, #tpu.memory_space<vmem>>, vector<128x128xf32>
      %c0_14 = arith.constant 0 : index
      %c0_15 = arith.constant 0 : index
      %18 = vector.load %arg5[%c0_14, %c0_15] : memref<1x128xf32, #tpu.memory_space<vmem>>, vector<1x128xf32>
      %19 = vector.broadcast %18 : vector<1x128xf32> to vector<128x128xf32>
      %20 = arith.addf %17, %19 : vector<128x128xf32>
      %cst_16 = arith.constant dense<0.000000e+00> : vector<128xf32>
      %21 = vector.multi_reduction <add>, %20, %cst_16 [0] : vector<128x128xf32> to vector<128xf32>
      %22 = vector.shape_cast %21 : vector<128xf32> to vector<1x128xf32>
      %23 = vector.shape_cast %22 : vector<1x128xf32> to vector<1x1x128xf32>
      %c0_17 = arith.constant 0 : index
      %c0_18 = arith.constant 0 : index
      %c0_19 = arith.constant 0 : index
      %24 = vector.load %arg7[%c0_17, %c0_18, %c0_19] : memref<1x1x128xf32, #tpu.memory_space<vmem>>, vector<1x1x128xf32>
      tpu.vector_store %arg7[%c0_17, %c0_18, %c0_19], %23 {strides = array<i32>} : memref<1x1x128xf32, #tpu.memory_space<vmem>>, vector<1x1x128xf32>,
      %25 = arith.mulf %20, %20 : vector<128x128xf32>
      %cst_20 = arith.constant dense<0.000000e+00> : vector<128xf32>
      %26 = vector.multi_reduction <add>, %25, %cst_20 [0] : vector<128x128xf32> to vector<128xf32>
      %27 = vector.shape_cast %26 : vector<128xf32> to vector<1x128xf32>
      %28 = vector.shape_cast %27 : vector<1x128xf32> to vector<1x1x128xf32>
      %c0_21 = arith.constant 0 : index
      %c0_22 = arith.constant 0 : index
      %c0_23 = arith.constant 0 : index
      %29 = vector.load %arg8[%c0_21, %c0_22, %c0_23] : memref<1x1x128xf32, #tpu.memory_space<vmem>>, vector<1x1x128xf32>
      tpu.vector_store %arg8[%c0_21, %c0_22, %c0_23], %28 {strides = array<i32>} : memref<1x1x128xf32, #tpu.memory_space<vmem>>, vector<1x1x128xf32>,
      %30 = arith.truncf %20 : vector<128x128xf32> to vector<128x128xbf16>
      %c0_24 = arith.constant 0 : index
      %c0_25 = arith.constant 0 : index
      %31 = vector.load %arg6[%c0_24, %c0_25] : memref<128x128xbf16, #tpu.memory_space<vmem>>, vector<128x128xbf16>
      tpu.vector_store %arg6[%c0_24, %c0_25], %30 {strides = array<i32>} : memref<128x128xbf16, #tpu.memory_space<vmem>>, vector<128x128xbf16>,
    } else {
    }
    return
  }
  func.func @transform_0(%arg0: i32, %arg1: i32, %arg2: i32) -> (i32, i32) {
    %c0_i32 = arith.constant 0 : i32
    return %arg0, %arg2 : i32, i32
  }
  func.func @transform_1(%arg0: i32, %arg1: i32, %arg2: i32) -> (i32, i32) {
    %c0_i32 = arith.constant 0 : i32
    return %arg2, %arg1 : i32, i32
  }
  func.func @transform_2(%arg0: i32, %arg1: i32, %arg2: i32) -> (i32, i32) {
    %c0_i32 = arith.constant 0 : i32
    %c0_i32_0 = arith.constant 0 : i32
    return %c0_i32, %arg1 : i32, i32
  }
  func.func @transform_3(%arg0: i32, %arg1: i32, %arg2: i32) -> (i32, i32) {
    %c0_i32 = arith.constant 0 : i32
    return %arg0, %arg1 : i32, i32
  }
  func.func @transform_4(%arg0: i32, %arg1: i32, %arg2: i32) -> (i32, i32, i32) {
    %c0_i32 = arith.constant 0 : i32
    %c0_i32_0 = arith.constant 0 : i32
    return %arg0, %c0_i32, %arg1 : i32, i32, i32
  }
  func.func @transform_5(%arg0: i32, %arg1: i32, %arg2: i32) -> (i32, i32, i32) {
    %c0_i32 = arith.constant 0 : i32
    %c0_i32_0 = arith.constant 0 : i32
    return %arg0, %c0_i32, %arg1 : i32, i32, i32
  }
}

module attributes {stable_mosaic.version = 11 : i64} {
  func.func @_mm_kernel(%arg0: i32, %arg1: i32, %arg2: i32, %arg3: memref<32x256xbf16, #tpu.memory_space<vmem>>, %arg4: memref<256x128xbf16, #tpu.memory_space<vmem>>, %arg5: memref<1x128xf32, #tpu.memory_space<vmem>>, %arg6: memref<32x128xbf16, #tpu.memory_space<vmem>>, %arg7: memref<1x1x128xf32, #tpu.memory_space<vmem>>, %arg8: memref<1x1x128xf32, #tpu.memory_space<vmem>>, %arg9: memref<32x128xf32, #tpu.memory_space<vmem>>) attributes {dimension_semantics = [#tpu.dimension_semantics<parallel>, #tpu.dimension_semantics<parallel>, #tpu.dimension_semantics<arbitrary>], iteration_bounds = array<i64: 1, 1, 1>, scalar_prefetch = 0 : i64, scratch_operands = 1 : i64, tpu.core_type = #tpu.core_type<tc>, window_params = [{transform_indices = @transform_0, window_bounds = array<i64: 32, 256>}, {transform_indices = @transform_1, window_bounds = array<i64: 256, 128>}, {transform_indices = @transform_2, window_bounds = array<i64: 1, 128>}, {transform_indices = @transform_3, window_bounds = array<i64: 32, 128>}, {transform_indices = @transform_4, window_bounds = array<i64: 1, 1, 128>}, {transform_indices = @transform_5, window_bounds = array<i64: 1, 1, 128>}]} {
    %c0_i32 = arith.constant 0 : i32
    %0 = arith.cmpi eq, %arg2, %c0_i32 : i32
    %1 = arith.extui %0 : i1 to i32
    %c0_i32_0 = arith.constant 0 : i32
    %2 = arith.cmpi ne, %1, %c0_i32_0 : i32
    scf.if %2 {
      %cst_12 = arith.constant 0.000000e+00 : f32
      %17 = vector.broadcast %cst_12 : f32 to vector<32x128xf32>
      %c0_13 = arith.constant 0 : index
      %c0_14 = arith.constant 0 : index
      %18 = vector.load %arg9[%c0_13, %c0_14] : memref<32x128xf32, #tpu.memory_space<vmem>>, vector<32x128xf32>
      tpu.vector_store %arg9[%c0_13, %c0_14], %17 {strides = array<i32>} : memref<32x128xf32, #tpu.memory_space<vmem>>, vector<32x128xf32>,
    } else {
    }
    %c0 = arith.constant 0 : index
    %c0_1 = arith.constant 0 : index
    %3 = vector.load %arg3[%c0, %c0_1] : memref<32x256xbf16, #tpu.memory_space<vmem>>, vector<32x256xbf16>
    %cst = arith.constant 0.000000e+00 : bf16
    %4 = vector.broadcast %cst : bf16 to vector<32x256xbf16>
    %5 = arith.cmpf oge, %3, %4 : vector<32x256xbf16>
    %cst_2 = arith.constant 2.001950e-01 : bf16
    %6 = vector.broadcast %cst_2 : bf16 to vector<32x256xbf16>
    %7 = arith.mulf %3, %6 : vector<32x256xbf16>
    %8 = arith.select %5, %3, %7 : vector<32x256xi1>, vector<32x256xbf16>
    %c0_3 = arith.constant 0 : index
    %c0_4 = arith.constant 0 : index
    %9 = vector.load %arg9[%c0_3, %c0_4] : memref<32x128xf32, #tpu.memory_space<vmem>>, vector<32x128xf32>
    %c0_5 = arith.constant 0 : index
    %c0_6 = arith.constant 0 : index
    %10 = vector.load %arg4[%c0_5, %c0_6] : memref<256x128xbf16, #tpu.memory_space<vmem>>, vector<256x128xbf16>
    %cst_7 = arith.constant dense<0.000000e+00> : vector<32x128xf32>
    %11 = tpu.matmul %8, %10, %cst_7 {dimension_numbers = #tpu.dot_dimension_numbers<[1], [0], [0], [1], [0, 0, 1, 1], [], []>} : vector<32x256xbf16>, vector<256x128xbf16>, vector<32x128xf32> -> vector<32x128xf32>
    %12 = arith.addf %9, %11 : vector<32x128xf32>
    %c0_8 = arith.constant 0 : index
    %c0_9 = arith.constant 0 : index
    %13 = vector.load %arg9[%c0_8, %c0_9] : memref<32x128xf32, #tpu.memory_space<vmem>>, vector<32x128xf32>
    tpu.vector_store %arg9[%c0_8, %c0_9], %12 {strides = array<i32>} : memref<32x128xf32, #tpu.memory_space<vmem>>, vector<32x128xf32>,
    %c0_i32_10 = arith.constant 0 : i32
    %14 = arith.cmpi eq, %arg2, %c0_i32_10 : i32
    %15 = arith.extui %14 : i1 to i32
    %c0_i32_11 = arith.constant 0 : i32
    %16 = arith.cmpi ne, %15, %c0_i32_11 : i32
    scf.if %16 {
      %c0_12 = arith.constant 0 : index
      %c0_13 = arith.constant 0 : index
      %17 = vector.load %arg9[%c0_12, %c0_13] : memref<32x128xf32, #tpu.memory_space<vmem>>, vector<32x128xf32>
      %c0_14 = arith.constant 0 : index
      %c0_15 = arith.constant 0 : index
      %18 = vector.load %arg5[%c0_14, %c0_15] : memref<1x128xf32, #tpu.memory_space<vmem>>, vector<1x128xf32>
      %19 = vector.broadcast %18 : vector<1x128xf32> to vector<32x128xf32>
      %20 = arith.addf %17, %19 : vector<32x128xf32>
      %cst_16 = arith.constant dense<0.000000e+00> : vector<128xf32>
      %21 = vector.multi_reduction <add>, %20, %cst_16 [0] : vector<32x128xf32> to vector<128xf32>
      %22 = vector.shape_cast %21 : vector<128xf32> to vector<1x128xf32>
      %23 = vector.shape_cast %22 : vector<1x128xf32> to vector<1x1x128xf32>
      %c0_17 = arith.constant 0 : index
      %c0_18 = arith.constant 0 : index
      %c0_19 = arith.constant 0 : index
      %24 = vector.load %arg7[%c0_17, %c0_18, %c0_19] : memref<1x1x128xf32, #tpu.memory_space<vmem>>, vector<1x1x128xf32>
      tpu.vector_store %arg7[%c0_17, %c0_18, %c0_19], %23 {strides = array<i32>} : memref<1x1x128xf32, #tpu.memory_space<vmem>>, vector<1x1x128xf32>,
      %25 = arith.mulf %20, %20 : vector<32x128xf32>
      %cst_20 = arith.constant dense<0.000000e+00> : vector<128xf32>
      %26 = vector.multi_reduction <add>, %25, %cst_20 [0] : vector<32x128xf32> to vector<128xf32>
      %27 = vector.shape_cast %26 : vector<128xf32> to vector<1x128xf32>
      %28 = vector.shape_cast %27 : vector<1x128xf32> to vector<1x1x128xf32>
      %c0_21 = arith.constant 0 : index
      %c0_22 = arith.constant 0 : index
      %c0_23 = arith.constant 0 : index
      %29 = vector.load %arg8[%c0_21, %c0_22, %c0_23] : memref<1x1x128xf32, #tpu.memory_space<vmem>>, vector<1x1x128xf32>
      tpu.vector_store %arg8[%c0_21, %c0_22, %c0_23], %28 {strides = array<i32>} : memref<1x1x128xf32, #tpu.memory_space<vmem>>, vector<1x1x128xf32>,
      %30 = arith.truncf %20 : vector<32x128xf32> to vector<32x128xbf16>
      %c0_24 = arith.constant 0 : index
      %c0_25 = arith.constant 0 : index
      %31 = vector.load %arg6[%c0_24, %c0_25] : memref<32x128xbf16, #tpu.memory_space<vmem>>, vector<32x128xbf16>
      tpu.vector_store %arg6[%c0_24, %c0_25], %30 {strides = array<i32>} : memref<32x128xbf16, #tpu.memory_space<vmem>>, vector<32x128xbf16>,
    } else {
    }
    return
  }
  func.func @transform_0(%arg0: i32, %arg1: i32, %arg2: i32) -> (i32, i32) {
    %c0_i32 = arith.constant 0 : i32
    return %arg0, %arg2 : i32, i32
  }
  func.func @transform_1(%arg0: i32, %arg1: i32, %arg2: i32) -> (i32, i32) {
    %c0_i32 = arith.constant 0 : i32
    return %arg2, %arg1 : i32, i32
  }
  func.func @transform_2(%arg0: i32, %arg1: i32, %arg2: i32) -> (i32, i32) {
    %c0_i32 = arith.constant 0 : i32
    %c0_i32_0 = arith.constant 0 : i32
    return %c0_i32, %arg1 : i32, i32
  }
  func.func @transform_3(%arg0: i32, %arg1: i32, %arg2: i32) -> (i32, i32) {
    %c0_i32 = arith.constant 0 : i32
    return %arg0, %arg1 : i32, i32
  }
  func.func @transform_4(%arg0: i32, %arg1: i32, %arg2: i32) -> (i32, i32, i32) {
    %c0_i32 = arith.constant 0 : i32
    %c0_i32_0 = arith.constant 0 : i32
    return %arg0, %c0_i32, %arg1 : i32, i32, i32
  }
  func.func @transform_5(%arg0: i32, %arg1: i32, %arg2: i32) -> (i32, i32, i32) {
    %c0_i32 = arith.constant 0 : i32
    %c0_i32_0 = arith.constant 0 : i32
    return %arg0, %c0_i32, %arg1 : i32, i32, i32
  }
}

module attributes {stable_mosaic.version = 11 : i64} {
  func.func @_mm_kernel(%arg0: i32, %arg1: i32, %arg2: i32, %arg3: memref<8x512xbf16, #tpu.memory_space<vmem>>, %arg4: memref<512x128xbf16, #tpu.memory_space<vmem>>, %arg5: memref<1x128xf32, #tpu.memory_space<vmem>>, %arg6: memref<8x128xbf16, #tpu.memory_space<vmem>>, %arg7: memref<1x1x128xf32, #tpu.memory_space<vmem>>, %arg8: memref<1x1x128xf32, #tpu.memory_space<vmem>>, %arg9: memref<8x128xf32, #tpu.memory_space<vmem>>) attributes {dimension_semantics = [#tpu.dimension_semantics<parallel>, #tpu.dimension_semantics<parallel>, #tpu.dimension_semantics<arbitrary>], iteration_bounds = array<i64: 1, 1, 1>, scalar_prefetch = 0 : i64, scratch_operands = 1 : i64, tpu.core_type = #tpu.core_type<tc>, window_params = [{transform_indices = @transform_0, window_bounds = array<i64: 8, 512>}, {transform_indices = @transform_1, window_bounds = array<i64: 512, 128>}, {transform_indices = @transform_2, window_bounds = array<i64: 1, 128>}, {transform_indices = @transform_3, window_bounds = array<i64: 8, 128>}, {transform_indices = @transform_4, window_bounds = array<i64: 1, 1, 128>}, {transform_indices = @transform_5, window_bounds = array<i64: 1, 1, 128>}]} {
    %c0_i32 = arith.constant 0 : i32
    %0 = arith.cmpi eq, %arg2, %c0_i32 : i32
    %1 = arith.extui %0 : i1 to i32
    %c0_i32_0 = arith.constant 0 : i32
    %2 = arith.cmpi ne, %1, %c0_i32_0 : i32
    scf.if %2 {
      %cst_12 = arith.constant 0.000000e+00 : f32
      %17 = vector.broadcast %cst_12 : f32 to vector<8x128xf32>
      %c0_13 = arith.constant 0 : index
      %c0_14 = arith.constant 0 : index
      %18 = vector.load %arg9[%c0_13, %c0_14] : memref<8x128xf32, #tpu.memory_space<vmem>>, vector<8x128xf32>
      tpu.vector_store %arg9[%c0_13, %c0_14], %17 {strides = array<i32>} : memref<8x128xf32, #tpu.memory_space<vmem>>, vector<8x128xf32>,
    } else {
    }
    %c0 = arith.constant 0 : index
    %c0_1 = arith.constant 0 : index
    %3 = vector.load %arg3[%c0, %c0_1] : memref<8x512xbf16, #tpu.memory_space<vmem>>, vector<8x512xbf16>
    %cst = arith.constant 0.000000e+00 : bf16
    %4 = vector.broadcast %cst : bf16 to vector<8x512xbf16>
    %5 = arith.cmpf oge, %3, %4 : vector<8x512xbf16>
    %cst_2 = arith.constant 2.001950e-01 : bf16
    %6 = vector.broadcast %cst_2 : bf16 to vector<8x512xbf16>
    %7 = arith.mulf %3, %6 : vector<8x512xbf16>
    %8 = arith.select %5, %3, %7 : vector<8x512xi1>, vector<8x512xbf16>
    %c0_3 = arith.constant 0 : index
    %c0_4 = arith.constant 0 : index
    %9 = vector.load %arg9[%c0_3, %c0_4] : memref<8x128xf32, #tpu.memory_space<vmem>>, vector<8x128xf32>
    %c0_5 = arith.constant 0 : index
    %c0_6 = arith.constant 0 : index
    %10 = vector.load %arg4[%c0_5, %c0_6] : memref<512x128xbf16, #tpu.memory_space<vmem>>, vector<512x128xbf16>
    %cst_7 = arith.constant dense<0.000000e+00> : vector<8x128xf32>
    %11 = tpu.matmul %8, %10, %cst_7 {dimension_numbers = #tpu.dot_dimension_numbers<[1], [0], [0], [1], [0, 0, 1, 1], [], []>} : vector<8x512xbf16>, vector<512x128xbf16>, vector<8x128xf32> -> vector<8x128xf32>
    %12 = arith.addf %9, %11 : vector<8x128xf32>
    %c0_8 = arith.constant 0 : index
    %c0_9 = arith.constant 0 : index
    %13 = vector.load %arg9[%c0_8, %c0_9] : memref<8x128xf32, #tpu.memory_space<vmem>>, vector<8x128xf32>
    tpu.vector_store %arg9[%c0_8, %c0_9], %12 {strides = array<i32>} : memref<8x128xf32, #tpu.memory_space<vmem>>, vector<8x128xf32>,
    %c0_i32_10 = arith.constant 0 : i32
    %14 = arith.cmpi eq, %arg2, %c0_i32_10 : i32
    %15 = arith.extui %14 : i1 to i32
    %c0_i32_11 = arith.constant 0 : i32
    %16 = arith.cmpi ne, %15, %c0_i32_11 : i32
    scf.if %16 {
      %c0_12 = arith.constant 0 : index
      %c0_13 = arith.constant 0 : index
      %17 = vector.load %arg9[%c0_12, %c0_13] : memref<8x128xf32, #tpu.memory_space<vmem>>, vector<8x128xf32>
      %c0_14 = arith.constant 0 : index
      %c0_15 = arith.constant 0 : index
      %18 = vector.load %arg5[%c0_14, %c0_15] : memref<1x128xf32, #tpu.memory_space<vmem>>, vector<1x128xf32>
      %19 = vector.broadcast %18 : vector<1x128xf32> to vector<8x128xf32>
      %20 = arith.addf %17, %19 : vector<8x128xf32>
      %cst_16 = arith.constant dense<0.000000e+00> : vector<128xf32>
      %21 = vector.multi_reduction <add>, %20, %cst_16 [0] : vector<8x128xf32> to vector<128xf32>
      %22 = vector.shape_cast %21 : vector<128xf32> to vector<1x128xf32>
      %23 = vector.shape_cast %22 : vector<1x128xf32> to vector<1x1x128xf32>
      %c0_17 = arith.constant 0 : index
      %c0_18 = arith.constant 0 : index
      %c0_19 = arith.constant 0 : index
      %24 = vector.load %arg7[%c0_17, %c0_18, %c0_19] : memref<1x1x128xf32, #tpu.memory_space<vmem>>, vector<1x1x128xf32>
      tpu.vector_store %arg7[%c0_17, %c0_18, %c0_19], %23 {strides = array<i32>} : memref<1x1x128xf32, #tpu.memory_space<vmem>>, vector<1x1x128xf32>,
      %25 = arith.mulf %20, %20 : vector<8x128xf32>
      %cst_20 = arith.constant dense<0.000000e+00> : vector<128xf32>
      %26 = vector.multi_reduction <add>, %25, %cst_20 [0] : vector<8x128xf32> to vector<128xf32>
      %27 = vector.shape_cast %26 : vector<128xf32> to vector<1x128xf32>
      %28 = vector.shape_cast %27 : vector<1x128xf32> to vector<1x1x128xf32>
      %c0_21 = arith.constant 0 : index
      %c0_22 = arith.constant 0 : index
      %c0_23 = arith.constant 0 : index
      %29 = vector.load %arg8[%c0_21, %c0_22, %c0_23] : memref<1x1x128xf32, #tpu.memory_space<vmem>>, vector<1x1x128xf32>
      tpu.vector_store %arg8[%c0_21, %c0_22, %c0_23], %28 {strides = array<i32>} : memref<1x1x128xf32, #tpu.memory_space<vmem>>, vector<1x1x128xf32>,
      %30 = arith.truncf %20 : vector<8x128xf32> to vector<8x128xbf16>
      %c0_24 = arith.constant 0 : index
      %c0_25 = arith.constant 0 : index
      %31 = vector.load %arg6[%c0_24, %c0_25] : memref<8x128xbf16, #tpu.memory_space<vmem>>, vector<8x128xbf16>
      tpu.vector_store %arg6[%c0_24, %c0_25], %30 {strides = array<i32>} : memref<8x128xbf16, #tpu.memory_space<vmem>>, vector<8x128xbf16>,
    } else {
    }
    return
  }
  func.func @transform_0(%arg0: i32, %arg1: i32, %arg2: i32) -> (i32, i32) {
    %c0_i32 = arith.constant 0 : i32
    return %arg0, %arg2 : i32, i32
  }
  func.func @transform_1(%arg0: i32, %arg1: i32, %arg2: i32) -> (i32, i32) {
    %c0_i32 = arith.constant 0 : i32
    return %arg2, %arg1 : i32, i32
  }
  func.func @transform_2(%arg0: i32, %arg1: i32, %arg2: i32) -> (i32, i32) {
    %c0_i32 = arith.constant 0 : i32
    %c0_i32_0 = arith.constant 0 : i32
    return %c0_i32, %arg1 : i32, i32
  }
  func.func @transform_3(%arg0: i32, %arg1: i32, %arg2: i32) -> (i32, i32) {
    %c0_i32 = arith.constant 0 : i32
    return %arg0, %arg1 : i32, i32
  }
  func.func @transform_4(%arg0: i32, %arg1: i32, %arg2: i32) -> (i32, i32, i32) {
    %c0_i32 = arith.constant 0 : i32
    %c0_i32_0 = arith.constant 0 : i32
    return %arg0, %c0_i32, %arg1 : i32, i32, i32
  }
  func.func @transform_5(%arg0: i32, %arg1: i32, %arg2: i32) -> (i32, i32, i32) {
    %c0_i32 = arith.constant 0 : i32
    %c0_i32_0 = arith.constant 0 : i32
    return %arg0, %c0_i32, %arg1 : i32, i32, i32
  }
}

module attributes {stable_mosaic.version = 11 : i64} {
  func.func @_mm_kernel(%arg0: i32, %arg1: i32, %arg2: i32, %arg3: memref<8x512xbf16, #tpu.memory_space<vmem>>, %arg4: memref<512x128xbf16, #tpu.memory_space<vmem>>, %arg5: memref<1x128xf32, #tpu.memory_space<vmem>>, %arg6: memref<8x128xbf16, #tpu.memory_space<vmem>>, %arg7: memref<8x128xf32, #tpu.memory_space<vmem>>) attributes {dimension_semantics = [#tpu.dimension_semantics<parallel>, #tpu.dimension_semantics<parallel>, #tpu.dimension_semantics<arbitrary>], iteration_bounds = array<i64: 1, 1, 2>, scalar_prefetch = 0 : i64, scratch_operands = 1 : i64, tpu.core_type = #tpu.core_type<tc>, window_params = [{transform_indices = @transform_0, window_bounds = array<i64: 8, 512>}, {transform_indices = @transform_1, window_bounds = array<i64: 512, 128>}, {transform_indices = @transform_2, window_bounds = array<i64: 1, 128>}, {transform_indices = @transform_3, window_bounds = array<i64: 8, 128>}]} {
    %c0_i32 = arith.constant 0 : i32
    %0 = arith.cmpi eq, %arg2, %c0_i32 : i32
    %1 = arith.extui %0 : i1 to i32
    %c0_i32_0 = arith.constant 0 : i32
    %2 = arith.cmpi ne, %1, %c0_i32_0 : i32
    scf.if %2 {
      %cst_11 = arith.constant 0.000000e+00 : f32
      %17 = vector.broadcast %cst_11 : f32 to vector<8x128xf32>
      %c0_12 = arith.constant 0 : index
      %c0_13 = arith.constant 0 : index
      %18 = vector.load %arg7[%c0_12, %c0_13] : memref<8x128xf32, #tpu.memory_space<vmem>>, vector<8x128xf32>
      tpu.vector_store %arg7[%c0_12, %c0_13], %17 {strides = array<i32>} : memref<8x128xf32, #tpu.memory_space<vmem>>, vector<8x128xf32>,
    } else {
    }
    %c0 = arith.constant 0 : index
    %c0_1 = arith.constant 0 : index
    %3 = vector.load %arg3[%c0, %c0_1] : memref<8x512xbf16, #tpu.memory_space<vmem>>, vector<8x512xbf16>
    %cst = arith.constant 0.000000e+00 : bf16
    %4 = vector.broadcast %cst : bf16 to vector<8x512xbf16>
    %5 = arith.cmpf oge, %3, %4 : vector<8x512xbf16>
    %cst_2 = arith.constant 2.001950e-01 : bf16
    %6 = vector.broadcast %cst_2 : bf16 to vector<8x512xbf16>
    %7 = arith.mulf %3, %6 : vector<8x512xbf16>
    %8 = arith.select %5, %3, %7 : vector<8x512xi1>, vector<8x512xbf16>
    %c0_3 = arith.constant 0 : index
    %c0_4 = arith.constant 0 : index
    %9 = vector.load %arg7[%c0_3, %c0_4] : memref<8x128xf32, #tpu.memory_space<vmem>>, vector<8x128xf32>
    %c0_5 = arith.constant 0 : index
    %c0_6 = arith.constant 0 : index
    %10 = vector.load %arg4[%c0_5, %c0_6] : memref<512x128xbf16, #tpu.memory_space<vmem>>, vector<512x128xbf16>
    %cst_7 = arith.constant dense<0.000000e+00> : vector<8x128xf32>
    %11 = tpu.matmul %8, %10, %cst_7 {dimension_numbers = #tpu.dot_dimension_numbers<[1], [0], [0], [1], [0, 0, 1, 1], [], []>} : vector<8x512xbf16>, vector<512x128xbf16>, vector<8x128xf32> -> vector<8x128xf32>
    %12 = arith.addf %9, %11 : vector<8x128xf32>
    %c0_8 = arith.constant 0 : index
    %c0_9 = arith.constant 0 : index
    %13 = vector.load %arg7[%c0_8, %c0_9] : memref<8x128xf32, #tpu.memory_space<vmem>>, vector<8x128xf32>
    tpu.vector_store %arg7[%c0_8, %c0_9], %12 {strides = array<i32>} : memref<8x128xf32, #tpu.memory_space<vmem>>, vector<8x128xf32>,
    %c1_i32 = arith.constant 1 : i32
    %14 = arith.cmpi eq, %arg2, %c1_i32 : i32
    %15 = arith.extui %14 : i1 to i32
    %c0_i32_10 = arith.constant 0 : i32
    %16 = arith.cmpi ne, %15, %c0_i32_10 : i32
    scf.if %16 {
      %c0_11 = arith.constant 0 : index
      %c0_12 = arith.constant 0 : index
      %17 = vector.load %arg7[%c0_11, %c0_12] : memref<8x128xf32, #tpu.memory_space<vmem>>, vector<8x128xf32>
      %c0_13 = arith.constant 0 : index
      %c0_14 = arith.constant 0 : index
      %18 = vector.load %arg5[%c0_13, %c0_14] : memref<1x128xf32, #tpu.memory_space<vmem>>, vector<1x128xf32>
      %19 = vector.broadcast %18 : vector<1x128xf32> to vector<8x128xf32>
      %20 = arith.addf %17, %19 : vector<8x128xf32>
      %21 = arith.truncf %20 : vector<8x128xf32> to vector<8x128xbf16>
      %c0_15 = arith.constant 0 : index
      %c0_16 = arith.constant 0 : index
      %22 = vector.load %arg6[%c0_15, %c0_16] : memref<8x128xbf16, #tpu.memory_space<vmem>>, vector<8x128xbf16>
      tpu.vector_store %arg6[%c0_15, %c0_16], %21 {strides = array<i32>} : memref<8x128xbf16, #tpu.memory_space<vmem>>, vector<8x128xbf16>,
    } else {
    }
    return
  }
  func.func @transform_0(%arg0: i32, %arg1: i32, %arg2: i32) -> (i32, i32) {
    %c0_i32 = arith.constant 0 : i32
    return %arg0, %arg2 : i32, i32
  }
  func.func @transform_1(%arg0: i32, %arg1: i32, %arg2: i32) -> (i32, i32) {
    %c0_i32 = arith.constant 0 : i32
    return %arg2, %arg1 : i32, i32
  }
  func.func @transform_2(%arg0: i32, %arg1: i32, %arg2: i32) -> (i32, i32) {
    %c0_i32 = arith.constant 0 : i32
    %c0_i32_0 = arith.constant 0 : i32
    return %c0_i32, %arg1 : i32, i32
  }
  func.func @transform_3(%arg0: i32, %arg1: i32, %arg2: i32) -> (i32, i32) {
    %c0_i32 = arith.constant 0 : i32
    return %arg0, %arg1 : i32, i32
  }
}

module attributes {stable_mosaic.version = 11 : i64} {
  func.func @_mm_kernel(%arg0: i32, %arg1: i32, %arg2: i32, %arg3: memref<8x512xbf16, #tpu.memory_space<vmem>>, %arg4: memref<512x256xbf16, #tpu.memory_space<vmem>>, %arg5: memref<1x256xf32, #tpu.memory_space<vmem>>, %arg6: memref<8x256xbf16, #tpu.memory_space<vmem>>, %arg7: memref<1x1x256xf32, #tpu.memory_space<vmem>>, %arg8: memref<1x1x256xf32, #tpu.memory_space<vmem>>, %arg9: memref<8x256xf32, #tpu.memory_space<vmem>>) attributes {dimension_semantics = [#tpu.dimension_semantics<parallel>, #tpu.dimension_semantics<parallel>, #tpu.dimension_semantics<arbitrary>], iteration_bounds = array<i64: 1, 1, 2>, scalar_prefetch = 0 : i64, scratch_operands = 1 : i64, tpu.core_type = #tpu.core_type<tc>, window_params = [{transform_indices = @transform_0, window_bounds = array<i64: 8, 512>}, {transform_indices = @transform_1, window_bounds = array<i64: 512, 256>}, {transform_indices = @transform_2, window_bounds = array<i64: 1, 256>}, {transform_indices = @transform_3, window_bounds = array<i64: 8, 256>}, {transform_indices = @transform_4, window_bounds = array<i64: 1, 1, 256>}, {transform_indices = @transform_5, window_bounds = array<i64: 1, 1, 256>}]} {
    %c0_i32 = arith.constant 0 : i32
    %0 = arith.cmpi eq, %arg2, %c0_i32 : i32
    %1 = arith.extui %0 : i1 to i32
    %c0_i32_0 = arith.constant 0 : i32
    %2 = arith.cmpi ne, %1, %c0_i32_0 : i32
    scf.if %2 {
      %cst_10 = arith.constant 0.000000e+00 : f32
      %14 = vector.broadcast %cst_10 : f32 to vector<8x256xf32>
      %c0_11 = arith.constant 0 : index
      %c0_12 = arith.constant 0 : index
      %15 = vector.load %arg9[%c0_11, %c0_12] : memref<8x256xf32, #tpu.memory_space<vmem>>, vector<8x256xf32>
      tpu.vector_store %arg9[%c0_11, %c0_12], %14 {strides = array<i32>} : memref<8x256xf32, #tpu.memory_space<vmem>>, vector<8x256xf32>,
    } else {
    }
    %c0 = arith.constant 0 : index
    %c0_1 = arith.constant 0 : index
    %3 = vector.load %arg3[%c0, %c0_1] : memref<8x512xbf16, #tpu.memory_space<vmem>>, vector<8x512xbf16>
    %cst = arith.constant 0.000000e+00 : bf16
    %4 = vector.broadcast %cst : bf16 to vector<8x512xbf16>
    %5 = arith.maximumf %3, %4 : vector<8x512xbf16>
    %c0_2 = arith.constant 0 : index
    %c0_3 = arith.constant 0 : index
    %6 = vector.load %arg9[%c0_2, %c0_3] : memref<8x256xf32, #tpu.memory_space<vmem>>, vector<8x256xf32>
    %c0_4 = arith.constant 0 : index
    %c0_5 = arith.constant 0 : index
    %7 = vector.load %arg4[%c0_4, %c0_5] : memref<512x256xbf16, #tpu.memory_space<vmem>>, vector<512x256xbf16>
    %cst_6 = arith.constant dense<0.000000e+00> : vector<8x256xf32>
    %8 = tpu.matmul %5, %7, %cst_6 {dimension_numbers = #tpu.dot_dimension_numbers<[1], [0], [0], [1], [0, 0, 1, 1], [], []>} : vector<8x512xbf16>, vector<512x256xbf16>, vector<8x256xf32> -> vector<8x256xf32>
    %9 = arith.addf %6, %8 : vector<8x256xf32>
    %c0_7 = arith.constant 0 : index
    %c0_8 = arith.constant 0 : index
    %10 = vector.load %arg9[%c0_7, %c0_8] : memref<8x256xf32, #tpu.memory_space<vmem>>, vector<8x256xf32>
    tpu.vector_store %arg9[%c0_7, %c0_8], %9 {strides = array<i32>} : memref<8x256xf32, #tpu.memory_space<vmem>>, vector<8x256xf32>,
    %c1_i32 = arith.constant 1 : i32
    %11 = arith.cmpi eq, %arg2, %c1_i32 : i32
    %12 = arith.extui %11 : i1 to i32
    %c0_i32_9 = arith.constant 0 : i32
    %13 = arith.cmpi ne, %12, %c0_i32_9 : i32
    scf.if %13 {
      %c0_10 = arith.constant 0 : index
      %c0_11 = arith.constant 0 : index
      %14 = vector.load %arg9[%c0_10, %c0_11] : memref<8x256xf32, #tpu.memory_space<vmem>>, vector<8x256xf32>
      %c0_12 = arith.constant 0 : index
      %c0_13 = arith.constant 0 : index
      %15 = vector.load %arg5[%c0_12, %c0_13] : memref<1x256xf32, #tpu.memory_space<vmem>>, vector<1x256xf32>
      %16 = vector.broadcast %15 : vector<1x256xf32> to vector<8x256xf32>
      %17 = arith.addf %14, %16 : vector<8x256xf32>
      %cst_14 = arith.constant dense<0.000000e+00> : vector<256xf32>
      %18 = vector.multi_reduction <add>, %17, %cst_14 [0] : vector<8x256xf32> to vector<256xf32>
      %19 = vector.shape_cast %18 : vector<256xf32> to vector<1x256xf32>
      %20 = vector.shape_cast %19 : vector<1x256xf32> to vector<1x1x256xf32>
      %c0_15 = arith.constant 0 : index
      %c0_16 = arith.constant 0 : index
      %c0_17 = arith.constant 0 : index
      %21 = vector.load %arg7[%c0_15, %c0_16, %c0_17] : memref<1x1x256xf32, #tpu.memory_space<vmem>>, vector<1x1x256xf32>
      tpu.vector_store %arg7[%c0_15, %c0_16, %c0_17], %20 {strides = array<i32>} : memref<1x1x256xf32, #tpu.memory_space<vmem>>, vector<1x1x256xf32>,
      %22 = arith.mulf %17, %17 : vector<8x256xf32>
      %cst_18 = arith.constant dense<0.000000e+00> : vector<256xf32>
      %23 = vector.multi_reduction <add>, %22, %cst_18 [0] : vector<8x256xf32> to vector<256xf32>
      %24 = vector.shape_cast %23 : vector<256xf32> to vector<1x256xf32>
      %25 = vector.shape_cast %24 : vector<1x256xf32> to vector<1x1x256xf32>
      %c0_19 = arith.constant 0 : index
      %c0_20 = arith.constant 0 : index
      %c0_21 = arith.constant 0 : index
      %26 = vector.load %arg8[%c0_19, %c0_20, %c0_21] : memref<1x1x256xf32, #tpu.memory_space<vmem>>, vector<1x1x256xf32>
      tpu.vector_store %arg8[%c0_19, %c0_20, %c0_21], %25 {strides = array<i32>} : memref<1x1x256xf32, #tpu.memory_space<vmem>>, vector<1x1x256xf32>,
      %27 = arith.truncf %17 : vector<8x256xf32> to vector<8x256xbf16>
      %c0_22 = arith.constant 0 : index
      %c0_23 = arith.constant 0 : index
      %28 = vector.load %arg6[%c0_22, %c0_23] : memref<8x256xbf16, #tpu.memory_space<vmem>>, vector<8x256xbf16>
      tpu.vector_store %arg6[%c0_22, %c0_23], %27 {strides = array<i32>} : memref<8x256xbf16, #tpu.memory_space<vmem>>, vector<8x256xbf16>,
    } else {
    }
    return
  }
  func.func @transform_0(%arg0: i32, %arg1: i32, %arg2: i32) -> (i32, i32) {
    %c0_i32 = arith.constant 0 : i32
    return %arg0, %arg2 : i32, i32
  }
  func.func @transform_1(%arg0: i32, %arg1: i32, %arg2: i32) -> (i32, i32) {
    %c0_i32 = arith.constant 0 : i32
    return %arg2, %arg1 : i32, i32
  }
  func.func @transform_2(%arg0: i32, %arg1: i32, %arg2: i32) -> (i32, i32) {
    %c0_i32 = arith.constant 0 : i32
    %c0_i32_0 = arith.constant 0 : i32
    return %c0_i32, %arg1 : i32, i32
  }
  func.func @transform_3(%arg0: i32, %arg1: i32, %arg2: i32) -> (i32, i32) {
    %c0_i32 = arith.constant 0 : i32
    return %arg0, %arg1 : i32, i32
  }
  func.func @transform_4(%arg0: i32, %arg1: i32, %arg2: i32) -> (i32, i32, i32) {
    %c0_i32 = arith.constant 0 : i32
    %c0_i32_0 = arith.constant 0 : i32
    return %arg0, %c0_i32, %arg1 : i32, i32, i32
  }
  func.func @transform_5(%arg0: i32, %arg1: i32, %arg2: i32) -> (i32, i32, i32) {
    %c0_i32 = arith.constant 0 : i32
    %c0_i32_0 = arith.constant 0 : i32
    return %arg0, %c0_i32, %arg1 : i32, i32, i32
  }
}

module attributes {stable_mosaic.version = 11 : i64} {
  func.func @_mm_kernel(%arg0: i32, %arg1: i32, %arg2: i32, %arg3: memref<8x512xbf16, #tpu.memory_space<vmem>>, %arg4: memref<512x128xbf16, #tpu.memory_space<vmem>>, %arg5: memref<1x128xf32, #tpu.memory_space<vmem>>, %arg6: memref<8x128xbf16, #tpu.memory_space<vmem>>, %arg7: memref<1x1x128xf32, #tpu.memory_space<vmem>>, %arg8: memref<1x1x128xf32, #tpu.memory_space<vmem>>, %arg9: memref<8x128xf32, #tpu.memory_space<vmem>>) attributes {dimension_semantics = [#tpu.dimension_semantics<parallel>, #tpu.dimension_semantics<parallel>, #tpu.dimension_semantics<arbitrary>], iteration_bounds = array<i64: 1, 1, 3>, scalar_prefetch = 0 : i64, scratch_operands = 1 : i64, tpu.core_type = #tpu.core_type<tc>, window_params = [{transform_indices = @transform_0, window_bounds = array<i64: 8, 512>}, {transform_indices = @transform_1, window_bounds = array<i64: 512, 128>}, {transform_indices = @transform_2, window_bounds = array<i64: 1, 128>}, {transform_indices = @transform_3, window_bounds = array<i64: 8, 128>}, {transform_indices = @transform_4, window_bounds = array<i64: 1, 1, 128>}, {transform_indices = @transform_5, window_bounds = array<i64: 1, 1, 128>}]} {
    %c0_i32 = arith.constant 0 : i32
    %0 = arith.cmpi eq, %arg2, %c0_i32 : i32
    %1 = arith.extui %0 : i1 to i32
    %c0_i32_0 = arith.constant 0 : i32
    %2 = arith.cmpi ne, %1, %c0_i32_0 : i32
    scf.if %2 {
      %cst_10 = arith.constant 0.000000e+00 : f32
      %14 = vector.broadcast %cst_10 : f32 to vector<8x128xf32>
      %c0_11 = arith.constant 0 : index
      %c0_12 = arith.constant 0 : index
      %15 = vector.load %arg9[%c0_11, %c0_12] : memref<8x128xf32, #tpu.memory_space<vmem>>, vector<8x128xf32>
      tpu.vector_store %arg9[%c0_11, %c0_12], %14 {strides = array<i32>} : memref<8x128xf32, #tpu.memory_space<vmem>>, vector<8x128xf32>,
    } else {
    }
    %c0 = arith.constant 0 : index
    %c0_1 = arith.constant 0 : index
    %3 = vector.load %arg3[%c0, %c0_1] : memref<8x512xbf16, #tpu.memory_space<vmem>>, vector<8x512xbf16>
    %cst = arith.constant 0.000000e+00 : bf16
    %4 = vector.broadcast %cst : bf16 to vector<8x512xbf16>
    %5 = arith.maximumf %3, %4 : vector<8x512xbf16>
    %c0_2 = arith.constant 0 : index
    %c0_3 = arith.constant 0 : index
    %6 = vector.load %arg9[%c0_2, %c0_3] : memref<8x128xf32, #tpu.memory_space<vmem>>, vector<8x128xf32>
    %c0_4 = arith.constant 0 : index
    %c0_5 = arith.constant 0 : index
    %7 = vector.load %arg4[%c0_4, %c0_5] : memref<512x128xbf16, #tpu.memory_space<vmem>>, vector<512x128xbf16>
    %cst_6 = arith.constant dense<0.000000e+00> : vector<8x128xf32>
    %8 = tpu.matmul %5, %7, %cst_6 {dimension_numbers = #tpu.dot_dimension_numbers<[1], [0], [0], [1], [0, 0, 1, 1], [], []>} : vector<8x512xbf16>, vector<512x128xbf16>, vector<8x128xf32> -> vector<8x128xf32>
    %9 = arith.addf %6, %8 : vector<8x128xf32>
    %c0_7 = arith.constant 0 : index
    %c0_8 = arith.constant 0 : index
    %10 = vector.load %arg9[%c0_7, %c0_8] : memref<8x128xf32, #tpu.memory_space<vmem>>, vector<8x128xf32>
    tpu.vector_store %arg9[%c0_7, %c0_8], %9 {strides = array<i32>} : memref<8x128xf32, #tpu.memory_space<vmem>>, vector<8x128xf32>,
    %c2_i32 = arith.constant 2 : i32
    %11 = arith.cmpi eq, %arg2, %c2_i32 : i32
    %12 = arith.extui %11 : i1 to i32
    %c0_i32_9 = arith.constant 0 : i32
    %13 = arith.cmpi ne, %12, %c0_i32_9 : i32
    scf.if %13 {
      %c0_10 = arith.constant 0 : index
      %c0_11 = arith.constant 0 : index
      %14 = vector.load %arg9[%c0_10, %c0_11] : memref<8x128xf32, #tpu.memory_space<vmem>>, vector<8x128xf32>
      %c0_12 = arith.constant 0 : index
      %c0_13 = arith.constant 0 : index
      %15 = vector.load %arg5[%c0_12, %c0_13] : memref<1x128xf32, #tpu.memory_space<vmem>>, vector<1x128xf32>
      %16 = vector.broadcast %15 : vector<1x128xf32> to vector<8x128xf32>
      %17 = arith.addf %14, %16 : vector<8x128xf32>
      %cst_14 = arith.constant dense<0.000000e+00> : vector<128xf32>
      %18 = vector.multi_reduction <add>, %17, %cst_14 [0] : vector<8x128xf32> to vector<128xf32>
      %19 = vector.shape_cast %18 : vector<128xf32> to vector<1x128xf32>
      %20 = vector.shape_cast %19 : vector<1x128xf32> to vector<1x1x128xf32>
      %c0_15 = arith.constant 0 : index
      %c0_16 = arith.constant 0 : index
      %c0_17 = arith.constant 0 : index
      %21 = vector.load %arg7[%c0_15, %c0_16, %c0_17] : memref<1x1x128xf32, #tpu.memory_space<vmem>>, vector<1x1x128xf32>
      tpu.vector_store %arg7[%c0_15, %c0_16, %c0_17], %20 {strides = array<i32>} : memref<1x1x128xf32, #tpu.memory_space<vmem>>, vector<1x1x128xf32>,
      %22 = arith.mulf %17, %17 : vector<8x128xf32>
      %cst_18 = arith.constant dense<0.000000e+00> : vector<128xf32>
      %23 = vector.multi_reduction <add>, %22, %cst_18 [0] : vector<8x128xf32> to vector<128xf32>
      %24 = vector.shape_cast %23 : vector<128xf32> to vector<1x128xf32>
      %25 = vector.shape_cast %24 : vector<1x128xf32> to vector<1x1x128xf32>
      %c0_19 = arith.constant 0 : index
      %c0_20 = arith.constant 0 : index
      %c0_21 = arith.constant 0 : index
      %26 = vector.load %arg8[%c0_19, %c0_20, %c0_21] : memref<1x1x128xf32, #tpu.memory_space<vmem>>, vector<1x1x128xf32>
      tpu.vector_store %arg8[%c0_19, %c0_20, %c0_21], %25 {strides = array<i32>} : memref<1x1x128xf32, #tpu.memory_space<vmem>>, vector<1x1x128xf32>,
      %27 = arith.truncf %17 : vector<8x128xf32> to vector<8x128xbf16>
      %c0_22 = arith.constant 0 : index
      %c0_23 = arith.constant 0 : index
      %28 = vector.load %arg6[%c0_22, %c0_23] : memref<8x128xbf16, #tpu.memory_space<vmem>>, vector<8x128xbf16>
      tpu.vector_store %arg6[%c0_22, %c0_23], %27 {strides = array<i32>} : memref<8x128xbf16, #tpu.memory_space<vmem>>, vector<8x128xbf16>,
    } else {
    }
    return
  }
  func.func @transform_0(%arg0: i32, %arg1: i32, %arg2: i32) -> (i32, i32) {
    %c0_i32 = arith.constant 0 : i32
    return %arg0, %arg2 : i32, i32
  }
  func.func @transform_1(%arg0: i32, %arg1: i32, %arg2: i32) -> (i32, i32) {
    %c0_i32 = arith.constant 0 : i32
    return %arg2, %arg1 : i32, i32
  }
  func.func @transform_2(%arg0: i32, %arg1: i32, %arg2: i32) -> (i32, i32) {
    %c0_i32 = arith.constant 0 : i32
    %c0_i32_0 = arith.constant 0 : i32
    return %c0_i32, %arg1 : i32, i32
  }
  func.func @transform_3(%arg0: i32, %arg1: i32, %arg2: i32) -> (i32, i32) {
    %c0_i32 = arith.constant 0 : i32
    return %arg0, %arg1 : i32, i32
  }
  func.func @transform_4(%arg0: i32, %arg1: i32, %arg2: i32) -> (i32, i32, i32) {
    %c0_i32 = arith.constant 0 : i32
    %c0_i32_0 = arith.constant 0 : i32
    return %arg0, %c0_i32, %arg1 : i32, i32, i32
  }
  func.func @transform_5(%arg0: i32, %arg1: i32, %arg2: i32) -> (i32, i32, i32) {
    %c0_i32 = arith.constant 0 : i32
    %c0_i32_0 = arith.constant 0 : i32
    return %arg0, %c0_i32, %arg1 : i32, i32, i32
  }
}

module attributes {stable_mosaic.version = 11 : i64} {
  func.func @_mm_kernel(%arg0: i32, %arg1: i32, %arg2: i32, %arg3: memref<32x512xbf16, #tpu.memory_space<vmem>>, %arg4: memref<512x128xbf16, #tpu.memory_space<vmem>>, %arg5: memref<1x128xf32, #tpu.memory_space<vmem>>, %arg6: memref<32x128xbf16, #tpu.memory_space<vmem>>, %arg7: memref<1x1x128xf32, #tpu.memory_space<vmem>>, %arg8: memref<1x1x128xf32, #tpu.memory_space<vmem>>, %arg9: memref<32x128xf32, #tpu.memory_space<vmem>>) attributes {dimension_semantics = [#tpu.dimension_semantics<parallel>, #tpu.dimension_semantics<parallel>, #tpu.dimension_semantics<arbitrary>], iteration_bounds = array<i64: 1, 1, 2>, scalar_prefetch = 0 : i64, scratch_operands = 1 : i64, tpu.core_type = #tpu.core_type<tc>, window_params = [{transform_indices = @transform_0, window_bounds = array<i64: 32, 512>}, {transform_indices = @transform_1, window_bounds = array<i64: 512, 128>}, {transform_indices = @transform_2, window_bounds = array<i64: 1, 128>}, {transform_indices = @transform_3, window_bounds = array<i64: 32, 128>}, {transform_indices = @transform_4, window_bounds = array<i64: 1, 1, 128>}, {transform_indices = @transform_5, window_bounds = array<i64: 1, 1, 128>}]} {
    %c0_i32 = arith.constant 0 : i32
    %0 = arith.cmpi eq, %arg2, %c0_i32 : i32
    %1 = arith.extui %0 : i1 to i32
    %c0_i32_0 = arith.constant 0 : i32
    %2 = arith.cmpi ne, %1, %c0_i32_0 : i32
    scf.if %2 {
      %cst_10 = arith.constant 0.000000e+00 : f32
      %14 = vector.broadcast %cst_10 : f32 to vector<32x128xf32>
      %c0_11 = arith.constant 0 : index
      %c0_12 = arith.constant 0 : index
      %15 = vector.load %arg9[%c0_11, %c0_12] : memref<32x128xf32, #tpu.memory_space<vmem>>, vector<32x128xf32>
      tpu.vector_store %arg9[%c0_11, %c0_12], %14 {strides = array<i32>} : memref<32x128xf32, #tpu.memory_space<vmem>>, vector<32x128xf32>,
    } else {
    }
    %c0 = arith.constant 0 : index
    %c0_1 = arith.constant 0 : index
    %3 = vector.load %arg3[%c0, %c0_1] : memref<32x512xbf16, #tpu.memory_space<vmem>>, vector<32x512xbf16>
    %cst = arith.constant 0.000000e+00 : bf16
    %4 = vector.broadcast %cst : bf16 to vector<32x512xbf16>
    %5 = arith.maximumf %3, %4 : vector<32x512xbf16>
    %c0_2 = arith.constant 0 : index
    %c0_3 = arith.constant 0 : index
    %6 = vector.load %arg9[%c0_2, %c0_3] : memref<32x128xf32, #tpu.memory_space<vmem>>, vector<32x128xf32>
    %c0_4 = arith.constant 0 : index
    %c0_5 = arith.constant 0 : index
    %7 = vector.load %arg4[%c0_4, %c0_5] : memref<512x128xbf16, #tpu.memory_space<vmem>>, vector<512x128xbf16>
    %cst_6 = arith.constant dense<0.000000e+00> : vector<32x128xf32>
    %8 = tpu.matmul %5, %7, %cst_6 {dimension_numbers = #tpu.dot_dimension_numbers<[1], [0], [0], [1], [0, 0, 1, 1], [], []>} : vector<32x512xbf16>, vector<512x128xbf16>, vector<32x128xf32> -> vector<32x128xf32>
    %9 = arith.addf %6, %8 : vector<32x128xf32>
    %c0_7 = arith.constant 0 : index
    %c0_8 = arith.constant 0 : index
    %10 = vector.load %arg9[%c0_7, %c0_8] : memref<32x128xf32, #tpu.memory_space<vmem>>, vector<32x128xf32>
    tpu.vector_store %arg9[%c0_7, %c0_8], %9 {strides = array<i32>} : memref<32x128xf32, #tpu.memory_space<vmem>>, vector<32x128xf32>,
    %c1_i32 = arith.constant 1 : i32
    %11 = arith.cmpi eq, %arg2, %c1_i32 : i32
    %12 = arith.extui %11 : i1 to i32
    %c0_i32_9 = arith.constant 0 : i32
    %13 = arith.cmpi ne, %12, %c0_i32_9 : i32
    scf.if %13 {
      %c0_10 = arith.constant 0 : index
      %c0_11 = arith.constant 0 : index
      %14 = vector.load %arg9[%c0_10, %c0_11] : memref<32x128xf32, #tpu.memory_space<vmem>>, vector<32x128xf32>
      %c0_12 = arith.constant 0 : index
      %c0_13 = arith.constant 0 : index
      %15 = vector.load %arg5[%c0_12, %c0_13] : memref<1x128xf32, #tpu.memory_space<vmem>>, vector<1x128xf32>
      %16 = vector.broadcast %15 : vector<1x128xf32> to vector<32x128xf32>
      %17 = arith.addf %14, %16 : vector<32x128xf32>
      %cst_14 = arith.constant dense<0.000000e+00> : vector<128xf32>
      %18 = vector.multi_reduction <add>, %17, %cst_14 [0] : vector<32x128xf32> to vector<128xf32>
      %19 = vector.shape_cast %18 : vector<128xf32> to vector<1x128xf32>
      %20 = vector.shape_cast %19 : vector<1x128xf32> to vector<1x1x128xf32>
      %c0_15 = arith.constant 0 : index
      %c0_16 = arith.constant 0 : index
      %c0_17 = arith.constant 0 : index
      %21 = vector.load %arg7[%c0_15, %c0_16, %c0_17] : memref<1x1x128xf32, #tpu.memory_space<vmem>>, vector<1x1x128xf32>
      tpu.vector_store %arg7[%c0_15, %c0_16, %c0_17], %20 {strides = array<i32>} : memref<1x1x128xf32, #tpu.memory_space<vmem>>, vector<1x1x128xf32>,
      %22 = arith.mulf %17, %17 : vector<32x128xf32>
      %cst_18 = arith.constant dense<0.000000e+00> : vector<128xf32>
      %23 = vector.multi_reduction <add>, %22, %cst_18 [0] : vector<32x128xf32> to vector<128xf32>
      %24 = vector.shape_cast %23 : vector<128xf32> to vector<1x128xf32>
      %25 = vector.shape_cast %24 : vector<1x128xf32> to vector<1x1x128xf32>
      %c0_19 = arith.constant 0 : index
      %c0_20 = arith.constant 0 : index
      %c0_21 = arith.constant 0 : index
      %26 = vector.load %arg8[%c0_19, %c0_20, %c0_21] : memref<1x1x128xf32, #tpu.memory_space<vmem>>, vector<1x1x128xf32>
      tpu.vector_store %arg8[%c0_19, %c0_20, %c0_21], %25 {strides = array<i32>} : memref<1x1x128xf32, #tpu.memory_space<vmem>>, vector<1x1x128xf32>,
      %27 = arith.truncf %17 : vector<32x128xf32> to vector<32x128xbf16>
      %c0_22 = arith.constant 0 : index
      %c0_23 = arith.constant 0 : index
      %28 = vector.load %arg6[%c0_22, %c0_23] : memref<32x128xbf16, #tpu.memory_space<vmem>>, vector<32x128xbf16>
      tpu.vector_store %arg6[%c0_22, %c0_23], %27 {strides = array<i32>} : memref<32x128xbf16, #tpu.memory_space<vmem>>, vector<32x128xbf16>,
    } else {
    }
    return
  }
  func.func @transform_0(%arg0: i32, %arg1: i32, %arg2: i32) -> (i32, i32) {
    %c0_i32 = arith.constant 0 : i32
    return %arg0, %arg2 : i32, i32
  }
  func.func @transform_1(%arg0: i32, %arg1: i32, %arg2: i32) -> (i32, i32) {
    %c0_i32 = arith.constant 0 : i32
    return %arg2, %arg1 : i32, i32
  }
  func.func @transform_2(%arg0: i32, %arg1: i32, %arg2: i32) -> (i32, i32) {
    %c0_i32 = arith.constant 0 : i32
    %c0_i32_0 = arith.constant 0 : i32
    return %c0_i32, %arg1 : i32, i32
  }
  func.func @transform_3(%arg0: i32, %arg1: i32, %arg2: i32) -> (i32, i32) {
    %c0_i32 = arith.constant 0 : i32
    return %arg0, %arg1 : i32, i32
  }
  func.func @transform_4(%arg0: i32, %arg1: i32, %arg2: i32) -> (i32, i32, i32) {
    %c0_i32 = arith.constant 0 : i32
    %c0_i32_0 = arith.constant 0 : i32
    return %arg0, %c0_i32, %arg1 : i32, i32, i32
  }
  func.func @transform_5(%arg0: i32, %arg1: i32, %arg2: i32) -> (i32, i32, i32) {
    %c0_i32 = arith.constant 0 : i32
    %c0_i32_0 = arith.constant 0 : i32
    return %arg0, %c0_i32, %arg1 : i32, i32, i32
  }
}

module attributes {stable_mosaic.version = 11 : i64} {
  func.func @_mm_kernel(%arg0: i32, %arg1: i32, %arg2: i32, %arg3: memref<128x384xbf16, #tpu.memory_space<vmem>>, %arg4: memref<384x128xbf16, #tpu.memory_space<vmem>>, %arg5: memref<1x128xf32, #tpu.memory_space<vmem>>, %arg6: memref<128x128xbf16, #tpu.memory_space<vmem>>, %arg7: memref<1x1x128xf32, #tpu.memory_space<vmem>>, %arg8: memref<1x1x128xf32, #tpu.memory_space<vmem>>, %arg9: memref<128x128xf32, #tpu.memory_space<vmem>>) attributes {dimension_semantics = [#tpu.dimension_semantics<parallel>, #tpu.dimension_semantics<parallel>, #tpu.dimension_semantics<arbitrary>], iteration_bounds = array<i64: 1, 1, 1>, scalar_prefetch = 0 : i64, scratch_operands = 1 : i64, tpu.core_type = #tpu.core_type<tc>, window_params = [{transform_indices = @transform_0, window_bounds = array<i64: 128, 384>}, {transform_indices = @transform_1, window_bounds = array<i64: 384, 128>}, {transform_indices = @transform_2, window_bounds = array<i64: 1, 128>}, {transform_indices = @transform_3, window_bounds = array<i64: 128, 128>}, {transform_indices = @transform_4, window_bounds = array<i64: 1, 1, 128>}, {transform_indices = @transform_5, window_bounds = array<i64: 1, 1, 128>}]} {
    %c0_i32 = arith.constant 0 : i32
    %0 = arith.cmpi eq, %arg2, %c0_i32 : i32
    %1 = arith.extui %0 : i1 to i32
    %c0_i32_0 = arith.constant 0 : i32
    %2 = arith.cmpi ne, %1, %c0_i32_0 : i32
    scf.if %2 {
      %cst_11 = arith.constant 0.000000e+00 : f32
      %14 = vector.broadcast %cst_11 : f32 to vector<128x128xf32>
      %c0_12 = arith.constant 0 : index
      %c0_13 = arith.constant 0 : index
      %15 = vector.load %arg9[%c0_12, %c0_13] : memref<128x128xf32, #tpu.memory_space<vmem>>, vector<128x128xf32>
      tpu.vector_store %arg9[%c0_12, %c0_13], %14 {strides = array<i32>} : memref<128x128xf32, #tpu.memory_space<vmem>>, vector<128x128xf32>,
    } else {
    }
    %c0 = arith.constant 0 : index
    %c0_1 = arith.constant 0 : index
    %3 = vector.load %arg3[%c0, %c0_1] : memref<128x384xbf16, #tpu.memory_space<vmem>>, vector<128x384xbf16>
    %cst = arith.constant 0.000000e+00 : bf16
    %4 = vector.broadcast %cst : bf16 to vector<128x384xbf16>
    %5 = arith.maximumf %3, %4 : vector<128x384xbf16>
    %c0_2 = arith.constant 0 : index
    %c0_3 = arith.constant 0 : index
    %6 = vector.load %arg9[%c0_2, %c0_3] : memref<128x128xf32, #tpu.memory_space<vmem>>, vector<128x128xf32>
    %c0_4 = arith.constant 0 : index
    %c0_5 = arith.constant 0 : index
    %7 = vector.load %arg4[%c0_4, %c0_5] : memref<384x128xbf16, #tpu.memory_space<vmem>>, vector<384x128xbf16>
    %cst_6 = arith.constant dense<0.000000e+00> : vector<128x128xf32>
    %8 = tpu.matmul %5, %7, %cst_6 {dimension_numbers = #tpu.dot_dimension_numbers<[1], [0], [0], [1], [0, 0, 1, 1], [], []>} : vector<128x384xbf16>, vector<384x128xbf16>, vector<128x128xf32> -> vector<128x128xf32>
    %9 = arith.addf %6, %8 : vector<128x128xf32>
    %c0_7 = arith.constant 0 : index
    %c0_8 = arith.constant 0 : index
    %10 = vector.load %arg9[%c0_7, %c0_8] : memref<128x128xf32, #tpu.memory_space<vmem>>, vector<128x128xf32>
    tpu.vector_store %arg9[%c0_7, %c0_8], %9 {strides = array<i32>} : memref<128x128xf32, #tpu.memory_space<vmem>>, vector<128x128xf32>,
    %c0_i32_9 = arith.constant 0 : i32
    %11 = arith.cmpi eq, %arg2, %c0_i32_9 : i32
    %12 = arith.extui %11 : i1 to i32
    %c0_i32_10 = arith.constant 0 : i32
    %13 = arith.cmpi ne, %12, %c0_i32_10 : i32
    scf.if %13 {
      %c0_11 = arith.constant 0 : index
      %c0_12 = arith.constant 0 : index
      %14 = vector.load %arg9[%c0_11, %c0_12] : memref<128x128xf32, #tpu.memory_space<vmem>>, vector<128x128xf32>
      %c0_13 = arith.constant 0 : index
      %c0_14 = arith.constant 0 : index
      %15 = vector.load %arg5[%c0_13, %c0_14] : memref<1x128xf32, #tpu.memory_space<vmem>>, vector<1x128xf32>
      %16 = vector.broadcast %15 : vector<1x128xf32> to vector<128x128xf32>
      %17 = arith.addf %14, %16 : vector<128x128xf32>
      %cst_15 = arith.constant dense<0.000000e+00> : vector<128xf32>
      %18 = vector.multi_reduction <add>, %17, %cst_15 [0] : vector<128x128xf32> to vector<128xf32>
      %19 = vector.shape_cast %18 : vector<128xf32> to vector<1x128xf32>
      %20 = vector.shape_cast %19 : vector<1x128xf32> to vector<1x1x128xf32>
      %c0_16 = arith.constant 0 : index
      %c0_17 = arith.constant 0 : index
      %c0_18 = arith.constant 0 : index
      %21 = vector.load %arg7[%c0_16, %c0_17, %c0_18] : memref<1x1x128xf32, #tpu.memory_space<vmem>>, vector<1x1x128xf32>
      tpu.vector_store %arg7[%c0_16, %c0_17, %c0_18], %20 {strides = array<i32>} : memref<1x1x128xf32, #tpu.memory_space<vmem>>, vector<1x1x128xf32>,
      %22 = arith.mulf %17, %17 : vector<128x128xf32>
      %cst_19 = arith.constant dense<0.000000e+00> : vector<128xf32>
      %23 = vector.multi_reduction <add>, %22, %cst_19 [0] : vector<128x128xf32> to vector<128xf32>
      %24 = vector.shape_cast %23 : vector<128xf32> to vector<1x128xf32>
      %25 = vector.shape_cast %24 : vector<1x128xf32> to vector<1x1x128xf32>
      %c0_20 = arith.constant 0 : index
      %c0_21 = arith.constant 0 : index
      %c0_22 = arith.constant 0 : index
      %26 = vector.load %arg8[%c0_20, %c0_21, %c0_22] : memref<1x1x128xf32, #tpu.memory_space<vmem>>, vector<1x1x128xf32>
      tpu.vector_store %arg8[%c0_20, %c0_21, %c0_22], %25 {strides = array<i32>} : memref<1x1x128xf32, #tpu.memory_space<vmem>>, vector<1x1x128xf32>,
      %27 = arith.truncf %17 : vector<128x128xf32> to vector<128x128xbf16>
      %c0_23 = arith.constant 0 : index
      %c0_24 = arith.constant 0 : index
      %28 = vector.load %arg6[%c0_23, %c0_24] : memref<128x128xbf16, #tpu.memory_space<vmem>>, vector<128x128xbf16>
      tpu.vector_store %arg6[%c0_23, %c0_24], %27 {strides = array<i32>} : memref<128x128xbf16, #tpu.memory_space<vmem>>, vector<128x128xbf16>,
    } else {
    }
    return
  }
  func.func @transform_0(%arg0: i32, %arg1: i32, %arg2: i32) -> (i32, i32) {
    %c0_i32 = arith.constant 0 : i32
    return %arg0, %arg2 : i32, i32
  }
  func.func @transform_1(%arg0: i32, %arg1: i32, %arg2: i32) -> (i32, i32) {
    %c0_i32 = arith.constant 0 : i32
    return %arg2, %arg1 : i32, i32
  }
  func.func @transform_2(%arg0: i32, %arg1: i32, %arg2: i32) -> (i32, i32) {
    %c0_i32 = arith.constant 0 : i32
    %c0_i32_0 = arith.constant 0 : i32
    return %c0_i32, %arg1 : i32, i32
  }
  func.func @transform_3(%arg0: i32, %arg1: i32, %arg2: i32) -> (i32, i32) {
    %c0_i32 = arith.constant 0 : i32
    return %arg0, %arg1 : i32, i32
  }
  func.func @transform_4(%arg0: i32, %arg1: i32, %arg2: i32) -> (i32, i32, i32) {
    %c0_i32 = arith.constant 0 : i32
    %c0_i32_0 = arith.constant 0 : i32
    return %arg0, %c0_i32, %arg1 : i32, i32, i32
  }
  func.func @transform_5(%arg0: i32, %arg1: i32, %arg2: i32) -> (i32, i32, i32) {
    %c0_i32 = arith.constant 0 : i32
    %c0_i32_0 = arith.constant 0 : i32
    return %arg0, %c0_i32, %arg1 : i32, i32, i32
  }
}

module attributes {stable_mosaic.version = 11 : i64} {
  func.func @_mm_kernel(%arg0: i32, %arg1: i32, %arg2: i32, %arg3: memref<512x256xbf16, #tpu.memory_space<vmem>>, %arg4: memref<256x128xbf16, #tpu.memory_space<vmem>>, %arg5: memref<1x128xf32, #tpu.memory_space<vmem>>, %arg6: memref<512x128xf32, #tpu.memory_space<vmem>>, %arg7: memref<512x128xf32, #tpu.memory_space<vmem>>) attributes {dimension_semantics = [#tpu.dimension_semantics<parallel>, #tpu.dimension_semantics<parallel>, #tpu.dimension_semantics<arbitrary>], iteration_bounds = array<i64: 1, 1, 1>, scalar_prefetch = 0 : i64, scratch_operands = 1 : i64, tpu.core_type = #tpu.core_type<tc>, window_params = [{transform_indices = @transform_0, window_bounds = array<i64: 512, 256>}, {transform_indices = @transform_1, window_bounds = array<i64: 256, 128>}, {transform_indices = @transform_2, window_bounds = array<i64: 1, 128>}, {transform_indices = @transform_3, window_bounds = array<i64: 512, 128>}]} {
    %c0_i32 = arith.constant 0 : i32
    %0 = arith.cmpi eq, %arg2, %c0_i32 : i32
    %1 = arith.extui %0 : i1 to i32
    %c0_i32_0 = arith.constant 0 : i32
    %2 = arith.cmpi ne, %1, %c0_i32_0 : i32
    scf.if %2 {
      %cst_11 = arith.constant 0.000000e+00 : f32
      %14 = vector.broadcast %cst_11 : f32 to vector<512x128xf32>
      %c0_12 = arith.constant 0 : index
      %c0_13 = arith.constant 0 : index
      %15 = vector.load %arg7[%c0_12, %c0_13] : memref<512x128xf32, #tpu.memory_space<vmem>>, vector<512x128xf32>
      tpu.vector_store %arg7[%c0_12, %c0_13], %14 {strides = array<i32>} : memref<512x128xf32, #tpu.memory_space<vmem>>, vector<512x128xf32>,
    } else {
    }
    %c0 = arith.constant 0 : index
    %c0_1 = arith.constant 0 : index
    %3 = vector.load %arg3[%c0, %c0_1] : memref<512x256xbf16, #tpu.memory_space<vmem>>, vector<512x256xbf16>
    %cst = arith.constant 0.000000e+00 : bf16
    %4 = vector.broadcast %cst : bf16 to vector<512x256xbf16>
    %5 = arith.maximumf %3, %4 : vector<512x256xbf16>
    %c0_2 = arith.constant 0 : index
    %c0_3 = arith.constant 0 : index
    %6 = vector.load %arg7[%c0_2, %c0_3] : memref<512x128xf32, #tpu.memory_space<vmem>>, vector<512x128xf32>
    %c0_4 = arith.constant 0 : index
    %c0_5 = arith.constant 0 : index
    %7 = vector.load %arg4[%c0_4, %c0_5] : memref<256x128xbf16, #tpu.memory_space<vmem>>, vector<256x128xbf16>
    %cst_6 = arith.constant dense<0.000000e+00> : vector<512x128xf32>
    %8 = tpu.matmul %5, %7, %cst_6 {dimension_numbers = #tpu.dot_dimension_numbers<[1], [0], [0], [1], [0, 0, 1, 1], [], []>} : vector<512x256xbf16>, vector<256x128xbf16>, vector<512x128xf32> -> vector<512x128xf32>
    %9 = arith.addf %6, %8 : vector<512x128xf32>
    %c0_7 = arith.constant 0 : index
    %c0_8 = arith.constant 0 : index
    %10 = vector.load %arg7[%c0_7, %c0_8] : memref<512x128xf32, #tpu.memory_space<vmem>>, vector<512x128xf32>
    tpu.vector_store %arg7[%c0_7, %c0_8], %9 {strides = array<i32>} : memref<512x128xf32, #tpu.memory_space<vmem>>, vector<512x128xf32>,
    %c0_i32_9 = arith.constant 0 : i32
    %11 = arith.cmpi eq, %arg2, %c0_i32_9 : i32
    %12 = arith.extui %11 : i1 to i32
    %c0_i32_10 = arith.constant 0 : i32
    %13 = arith.cmpi ne, %12, %c0_i32_10 : i32
    scf.if %13 {
      %c0_11 = arith.constant 0 : index
      %c0_12 = arith.constant 0 : index
      %14 = vector.load %arg7[%c0_11, %c0_12] : memref<512x128xf32, #tpu.memory_space<vmem>>, vector<512x128xf32>
      %c0_13 = arith.constant 0 : index
      %c0_14 = arith.constant 0 : index
      %15 = vector.load %arg5[%c0_13, %c0_14] : memref<1x128xf32, #tpu.memory_space<vmem>>, vector<1x128xf32>
      %16 = vector.broadcast %15 : vector<1x128xf32> to vector<512x128xf32>
      %17 = arith.addf %14, %16 : vector<512x128xf32>
      %18 = math.tanh %17 : vector<512x128xf32>
      %c0_15 = arith.constant 0 : index
      %c0_16 = arith.constant 0 : index
      %19 = vector.load %arg6[%c0_15, %c0_16] : memref<512x128xf32, #tpu.memory_space<vmem>>, vector<512x128xf32>
      tpu.vector_store %arg6[%c0_15, %c0_16], %18 {strides = array<i32>} : memref<512x128xf32, #tpu.memory_space<vmem>>, vector<512x128xf32>,
    } else {
    }
    return
  }
  func.func @transform_0(%arg0: i32, %arg1: i32, %arg2: i32) -> (i32, i32) {
    %c0_i32 = arith.constant 0 : i32
    return %arg0, %arg2 : i32, i32
  }
  func.func @transform_1(%arg0: i32, %arg1: i32, %arg2: i32) -> (i32, i32) {
    %c0_i32 = arith.constant 0 : i32
    return %arg2, %arg1 : i32, i32
  }
  func.func @transform_2(%arg0: i32, %arg1: i32, %arg2: i32) -> (i32, i32) {
    %c0_i32 = arith.constant 0 : i32
    %c0_i32_0 = arith.constant 0 : i32
    return %c0_i32, %arg1 : i32, i32
  }
  func.func @transform_3(%arg0: i32, %arg1: i32, %arg2: i32) -> (i32, i32) {
    %c0_i32 = arith.constant 0 : i32
    return %arg0, %arg1 : i32, i32
  }
}

</mosaic_0001>

<bundles_post_ra>
// kernel: fwd.10
= control target key start
LH: loop header
LB: loop body
LE: loop exit
PB: predicated region body
PF: predicated region fallthrough
CT: control target
= control target key end

     0   :  { %s2187_s1 = inlined_call_operand.vmem [shape: bf16[128,128], index: 1, kind: input, shape index: {}]   ;;  %s2188_s0 = inlined_call_operand.vmem [shape: bf16[512,128], index: 0, kind: input, shape index: {}]   ;;  %s2189_s2 = inlined_call_operand.vmem [shape: f32[1,128], index: 2, kind: input, shape index: {}]   ;;  %s2190_s3 = inlined_call_operand.vmem [shape: bf16[512,128], index: 3, kind: output, shape index: {}]  }
   0x1   :  { %v1842_v0 = vld [vmem:[%s2187_s1 + $0x38] sm:$0xff]   ;;  %v1843_v1 = vld [vmem:[%s2187_s1 + $0x30] sm:$0xff]   ;;  %v1844_v2 = vld [vmem:[%s2187_s1 + $0x28] sm:$0xff]  }
   0x2   :  { %1746 = vmatprep.subr.bf16.mxu0 %v1842_v0  ;;  %1826 = vmatprep.subr.bf16.mxu1 %v1842_v0  ;;  %v1845_v3 = vld [vmem:[%s2187_s1 + $0x20] sm:$0xff]   ;;  %v1846_v6 = vld [vmem:[%s2187_s1 + $0x18] sm:$0xff]   ;;  %v1847_v7 = vld [vmem:[%s2187_s1 + $0x10] sm:$0xff]  }
   0x3   :  { %1747 = vmatpush3.bf16.msra.mxu0 %v1842_v0  ;;  %1834 = vmatpush3.bf16.msra.mxu1 %v1842_v0  ;;  %v1850_v4 = vld [vmem:[%s2188_s0] sm:$0xff]   ;;  %v1848_v8 = vld [vmem:[%s2187_s1 + $0x8] sm:$0xff]   ;;  %v1854_v12 = vld [vmem:[%s2188_s0 + $0x10] sm:$0xff]  }
   0x4   :  { %1748 = vmatprep.subr.bf16.mxu0 %v1843_v1  ;;  %1827 = vmatprep.subr.bf16.mxu1 %v1843_v1  ;;  %v1851_v5 = vld [vmem:[%s2188_s0 + $0x80] sm:$0xff]   ;;  %v1852_v10 = vld [vmem:[%s2188_s0 + $0x8] sm:$0xff]   ;;  %v1855_v13 = vld [vmem:[%s2188_s0 + $0x90] sm:$0xff]  }
   0x5   :  { %1762 = vmatprep.mubr.bf16.mxu0 %v1850_v4  ;;  %1794 = vmatprep.mubr.bf16.mxu1 %v1851_v5  ;;  %v1849_v9 = vld [vmem:[%s2187_s1] sm:$0xff]   ;;  %v1853_v11 = vld [vmem:[%s2188_s0 + $0x88] sm:$0xff]   ;;  %v1856_v14 = vld [vmem:[%s2188_s0 + $0x18] sm:$0xff]  }
   0x6   :  { %v1857_v15 = vld [vmem:[%s2188_s0 + $0x98] sm:$0xff]   ;;  %v1858_v16 = vld [vmem:[%s2188_s0 + $0x20] sm:$0xff]   ;;  %v1860_v18 = vld [vmem:[%s2188_s0 + $0x28] sm:$0xff]  }
   0x7   :  { %1749 = vmatpush3.bf16.msra.mxu0 %v1843_v1  ;;  %1835 = vmatpush3.bf16.msra.mxu1 %v1843_v1  ;;  %v1859_v17 = vld [vmem:[%s2188_s0 + $0xa0] sm:$0xff]   ;;  %v1861_v19 = vld [vmem:[%s2188_s0 + $0xa8] sm:$0xff]   ;;  %v1862_v20 = vld [vmem:[%s2188_s0 + $0x30] sm:$0xff]  }
   0x8   :  { %1750 = vmatprep.subr.bf16.mxu0 %v1844_v2  ;;  %1828 = vmatprep.subr.bf16.mxu1 %v1844_v2  ;;  %v1863_v21 = vld [vmem:[%s2188_s0 + $0xb0] sm:$0xff]   ;;  %v1864_v22 = vld [vmem:[%s2188_s0 + $0x38] sm:$0xff]   ;;  %v1866_v24 = vld [vmem:[%s2188_s0 + $0x40] sm:$0xff]  }
   0x9   :  { %v1865_v23 = vld [vmem:[%s2188_s0 + $0xb8] sm:$0xff]   ;;  %v1867_v25 = vld [vmem:[%s2188_s0 + $0xc0] sm:$0xff]   ;;  %v1868_v26 = vld [vmem:[%s2188_s0 + $0x48] sm:$0xff]  }
   0xa   :  { %v1869_v27 = vld [vmem:[%s2188_s0 + $0xc8] sm:$0xff]   ;;  %v1870_v28 = vld [vmem:[%s2188_s0 + $0x50] sm:$0xff]   ;;  %v1872_v30 = vld [vmem:[%s2188_s0 + $0x58] sm:$0xff]  }
   0xb   :  { %1751 = vmatpush3.bf16.msra.mxu0 %v1844_v2  ;;  %1836 = vmatpush3.bf16.msra.mxu1 %v1844_v2  ;;  %v1871_v29 = vld [vmem:[%s2188_s0 + $0xd0] sm:$0xff]   ;;  %v1873_v31 = vld [vmem:[%s2188_s0 + $0xd8] sm:$0xff]   ;;  %v1874_v32 = vld [vmem:[%s2188_s0 + $0x60] sm:$0xff]  }
   0xc   :  { %1752 = vmatprep.subr.bf16.mxu0 %v1845_v3  ;;  %1829 = vmatprep.subr.bf16.mxu1 %v1845_v3  ;;  %v1875_v33 = vld [vmem:[%s2188_s0 + $0xe0] sm:$0xff]   ;;  %v1876_v34 = vld [vmem:[%s2188_s0 + $0x68] sm:$0xff]   ;;  %v1878_v36 = vld [vmem:[%s2188_s0 + $0x70] sm:$0xff]  }
   0xd   :  { %v1877_v35 = vld [vmem:[%s2188_s0 + $0xe8] sm:$0xff]   ;;  %v1879_v37 = vld [vmem:[%s2188_s0 + $0xf0] sm:$0xff]   ;;  %v1880_v38 = vld [vmem:[%s2188_s0 + $0x78] sm:$0xff]  }
   0xe   :  { %v1881_v39 = vld [vmem:[%s2188_s0 + $0xf8] sm:$0xff]   ;;  %v2025_v42 = vld [vmem:[%s2189_s2] ss:$0 sm:$0xff] }
   0xf   :  { %1753 = vmatpush3.bf16.msra.mxu0 %v1845_v3  ;;  %1837 = vmatpush3.bf16.msra.mxu1 %v1845_v3 }
  0x10   :  { %1754 = vmatprep.subr.bf16.mxu0 %v1846_v6  ;;  %1830 = vmatprep.subr.bf16.mxu1 %v1846_v6 }
  0x13   :  { %1755 = vmatpush3.bf16.msra.mxu0 %v1846_v6  ;;  %1838 = vmatpush3.bf16.msra.mxu1 %v1846_v6 }
  0x14   :  { %1756 = vmatprep.subr.bf16.mxu0 %v1847_v7  ;;  %1831 = vmatprep.subr.bf16.mxu1 %v1847_v7 }
  0x17   :  { %1757 = vmatpush3.bf16.msra.mxu0 %v1847_v7  ;;  %1839 = vmatpush3.bf16.msra.mxu1 %v1847_v7 }
  0x18   :  { %1758 = vmatprep.subr.bf16.mxu0 %v1848_v8  ;;  %1832 = vmatprep.subr.bf16.mxu1 %v1848_v8 }
  0x1b   :  { %1759 = vmatpush3.bf16.msra.mxu0 %v1848_v8  ;;  %1840 = vmatpush3.bf16.msra.mxu1 %v1848_v8 }
  0x1c   :  { %1760 = vmatprep.subr.bf16.mxu0 %v1849_v9  ;;  %1833 = vmatprep.subr.bf16.mxu1 %v1849_v9 }
  0x1f   :  { %1761 = vmatpush3.bf16.msra.mxu0 %v1849_v9  ;;  %1841 = vmatpush3.bf16.msra.mxu1 %v1849_v9 }
  0x22   :  { %1763 = vmatmul.mubr.bf16.vlgmr.msra.gmra.mxu0 %v1852_v10  ;;  %1795 = vmatmul.mubr.bf16.vlgmr.msra.gmra.mxu1 %v1853_v11 }
  0x23   :  { %1766 = vmatprep.mubr.bf16.mxu0 %v1854_v12  ;;  %1798 = vmatprep.mubr.bf16.mxu1 %v1855_v13 }
  0x2a   :  { %1767 = vmatmul.mubr.bf16.gmra.mxu0 %v1856_v14  ;;  %1799 = vmatmul.mubr.bf16.gmra.mxu1 %v1857_v15 }
  0x2b   :  { %1770 = vmatprep.mubr.bf16.mxu0 %v1858_v16  ;;  %1802 = vmatprep.mubr.bf16.mxu1 %v1859_v17 }
  0x32   :  { %1771 = vmatmul.mubr.bf16.gmra.mxu0 %v1860_v18  ;;  %1803 = vmatmul.mubr.bf16.gmra.mxu1 %v1861_v19 }
  0x33   :  { %1774 = vmatprep.mubr.bf16.mxu0 %v1862_v20  ;;  %1806 = vmatprep.mubr.bf16.mxu1 %v1863_v21 }
  0x3a   :  { %1775 = vmatmul.mubr.bf16.gmra.mxu0 %v1864_v22  ;;  %1807 = vmatmul.mubr.bf16.gmra.mxu1 %v1865_v23 }
  0x3b   :  { %1778 = vmatprep.mubr.bf16.mxu0 %v1866_v24  ;;  %1810 = vmatprep.mubr.bf16.mxu1 %v1867_v25 }
  0x42   :  { %1779 = vmatmul.mubr.bf16.gmra.mxu0 %v1868_v26  ;;  %1811 = vmatmul.mubr.bf16.gmra.mxu1 %v1869_v27 }
  0x43   :  { %1782 = vmatprep.mubr.bf16.mxu0 %v1870_v28  ;;  %1814 = vmatprep.mubr.bf16.mxu1 %v1871_v29 }
  0x4a   :  { %1783 = vmatmul.mubr.bf16.gmra.mxu0 %v1872_v30  ;;  %1815 = vmatmul.mubr.bf16.gmra.mxu1 %v1873_v31 }
  0x4b   :  { %1786 = vmatprep.mubr.bf16.mxu0 %v1874_v32  ;;  %1818 = vmatprep.mubr.bf16.mxu1 %v1875_v33 }
  0x52   :  { %1787 = vmatmul.mubr.bf16.gmra.mxu0 %v1876_v34  ;;  %1819 = vmatmul.mubr.bf16.gmra.mxu1 %v1877_v35 }
  0x53   :  { %1790 = vmatprep.mubr.bf16.mxu0 %v1878_v36  ;;  %1822 = vmatprep.mubr.bf16.mxu1 %v1879_v37 }
  0x5a   :  { %1791 = vmatmul.mubr.bf16.gmra.mxu0 %v1880_v38  ;;  %1823 = vmatmul.mubr.bf16.gmra.mxu1 %v1881_v39 }
  0xe2   :  { %v1764_v40 = vpop.f32.mrf.mxu0  ;;  %v1796_v41 = vpop.f32.mrf.mxu1 }
  0xe3   :  { %v960_v47 = vadd.f32 %v1764_v40, %v2025_v42  ;;  %v992_v48 = vadd.f32 %v1796_v41, %v2025_v42 }
  0xe4   :  { %v501_v43 = vpop.f32.mrf.mxu0  ;;  %v629_v44 = vpop.f32.mrf.mxu1 }
  0xe5   :  { %v958_v51 = vadd.f32 %v2025_v42, %v501_v43  ;;  %v990_v52 = vadd.f32 %v2025_v42, %v629_v44 }
  0xe6   :  { %v1765_v45 = vpop.f32.mrf.mxu0  ;;  %v1797_v46 = vpop.f32.mrf.mxu1 }
  0xe7   :  { %v961_v49 = vadd.f32 %v1765_v45, %v2025_v42  ;;  %v993_v50 = vadd.f32 %v1797_v46, %v2025_v42 }
  0xe8   :  { %v504_v53 = vpop.f32.mrf.mxu0  ;;  %v632_v54 = vpop.f32.mrf.mxu1 }
  0xe9   :  { %v1523_v55 = vpack.c.bf16 %v961_v49, %v960_v47  ;;  %v1603_v56 = vpack.c.bf16 %v993_v50, %v992_v48  ;;  %v959_v57 = vadd.f32 %v2025_v42, %v504_v53  ;;  %v991_v58 = vadd.f32 %v2025_v42, %v632_v54 }
  0xea   :  { %v1768_v59 = vpop.f32.mrf.mxu0  ;;  %v1800_v60 = vpop.f32.mrf.mxu1 }
  0xeb   :  { %1675 = vst [vmem:[%s2190_s3 + $0x8] sm:$0xff] %v1523_v55   ;;  %1691 = vst [vmem:[%s2190_s3 + $0x88] sm:$0xff] %v1603_v56   ;;  %v1518_v61 = vpack.c.bf16 %v959_v57, %v958_v51  ;;  %v1598_v62 = vpack.c.bf16 %v991_v58, %v990_v52  ;;  %v964_v3 = vadd.f32 %v1768_v59, %v2025_v42 }
  0xec   :  { %v517_v63 = vpop.f32.mrf.mxu0  ;;  %v645_v0 = vpop.f32.mrf.mxu1  ;;  %v996_v4 = vadd.f32 %v1800_v60, %v2025_v42 }
  0xed   :  { %1519 = vst [vmem:[%s2190_s3] sm:$0xff] %v1518_v61   ;;  %1690 = vst [vmem:[%s2190_s3 + $0x80] sm:$0xff] %v1598_v62   ;;  %v962_v7 = vadd.f32 %v2025_v42, %v517_v63  ;;  %v994_v8 = vadd.f32 %v2025_v42, %v645_v0 }
  0xee   :  { %v1769_v1 = vpop.f32.mrf.mxu0  ;;  %v1801_v2 = vpop.f32.mrf.mxu1 }
  0xef   :  { %v965_v5 = vadd.f32 %v1769_v1, %v2025_v42  ;;  %v997_v6 = vadd.f32 %v1801_v2, %v2025_v42 }
  0xf0   :  { %v520_v9 = vpop.f32.mrf.mxu0  ;;  %v648_v10 = vpop.f32.mrf.mxu1 }
  0xf1   :  { %v1533_v11 = vpack.c.bf16 %v965_v5, %v964_v3  ;;  %v1613_v12 = vpack.c.bf16 %v997_v6, %v996_v4  ;;  %v963_v13 = vadd.f32 %v2025_v42, %v520_v9  ;;  %v995_v14 = vadd.f32 %v2025_v42, %v648_v10 }
  0xf2   :  { %v1772_v15 = vpop.f32.mrf.mxu0  ;;  %v1804_v16 = vpop.f32.mrf.mxu1 }
  0xf3   :  { %1677 = vst [vmem:[%s2190_s3 + $0x18] sm:$0xff] %v1533_v11   ;;  %1693 = vst [vmem:[%s2190_s3 + $0x98] sm:$0xff] %v1613_v12   ;;  %v1528_v17 = vpack.c.bf16 %v963_v13, %v962_v7  ;;  %v1608_v18 = vpack.c.bf16 %v995_v14, %v994_v8  ;;  %v968_v23 = vadd.f32 %v1772_v15, %v2025_v42 }
  0xf4   :  { %v533_v19 = vpop.f32.mrf.mxu0  ;;  %v661_v20 = vpop.f32.mrf.mxu1  ;;  %v1000_v24 = vadd.f32 %v1804_v16, %v2025_v42 }
  0xf5   :  { %1676 = vst [vmem:[%s2190_s3 + $0x10] sm:$0xff] %v1528_v17   ;;  %1692 = vst [vmem:[%s2190_s3 + $0x90] sm:$0xff] %v1608_v18   ;;  %v966_v27 = vadd.f32 %v2025_v42, %v533_v19  ;;  %v998_v28 = vadd.f32 %v2025_v42, %v661_v20 }
  0xf6   :  { %v1773_v21 = vpop.f32.mrf.mxu0  ;;  %v1805_v22 = vpop.f32.mrf.mxu1 }
  0xf7   :  { %v969_v25 = vadd.f32 %v1773_v21, %v2025_v42  ;;  %v1001_v26 = vadd.f32 %v1805_v22, %v2025_v42 }
  0xf8   :  { %v536_v29 = vpop.f32.mrf.mxu0  ;;  %v664_v30 = vpop.f32.mrf.mxu1 }
  0xf9   :  { %v1543_v31 = vpack.c.bf16 %v969_v25, %v968_v23  ;;  %v1623_v32 = vpack.c.bf16 %v1001_v26, %v1000_v24  ;;  %v967_v33 = vadd.f32 %v2025_v42, %v536_v29  ;;  %v999_v34 = vadd.f32 %v2025_v42, %v664_v30 }
  0xfa   :  { %v1776_v35 = vpop.f32.mrf.mxu0  ;;  %v1808_v36 = vpop.f32.mrf.mxu1 }
  0xfb   :  { %1679 = vst [vmem:[%s2190_s3 + $0x28] sm:$0xff] %v1543_v31   ;;  %1695 = vst [vmem:[%s2190_s3 + $0xa8] sm:$0xff] %v1623_v32   ;;  %v1538_v37 = vpack.c.bf16 %v967_v33, %v966_v27  ;;  %v1618_v38 = vpack.c.bf16 %v999_v34, %v998_v28  ;;  %v972_v44 = vadd.f32 %v1776_v35, %v2025_v42 }
  0xfc   :  { %v549_v39 = vpop.f32.mrf.mxu0  ;;  %v677_v40 = vpop.f32.mrf.mxu1  ;;  %v1004_v45 = vadd.f32 %v1808_v36, %v2025_v42 }
  0xfd   :  { %1678 = vst [vmem:[%s2190_s3 + $0x20] sm:$0xff] %v1538_v37   ;;  %1694 = vst [vmem:[%s2190_s3 + $0xa0] sm:$0xff] %v1618_v38   ;;  %v970_v48 = vadd.f32 %v2025_v42, %v549_v39  ;;  %v1002_v49 = vadd.f32 %v2025_v42, %v677_v40 }
  0xfe   :  { %v1777_v41 = vpop.f32.mrf.mxu0  ;;  %v1809_v43 = vpop.f32.mrf.mxu1 }
  0xff   :  { %v973_v46 = vadd.f32 %v1777_v41, %v2025_v42  ;;  %v1005_v47 = vadd.f32 %v1809_v43, %v2025_v42 }
 0x100   :  { %v552_v50 = vpop.f32.mrf.mxu0  ;;  %v680_v51 = vpop.f32.mrf.mxu1 }
 0x101   :  { %v1553_v52 = vpack.c.bf16 %v973_v46, %v972_v44  ;;  %v1633_v53 = vpack.c.bf16 %v1005_v47, %v1004_v45  ;;  %v971_v54 = vadd.f32 %v2025_v42, %v552_v50  ;;  %v1003_v55 = vadd.f32 %v2025_v42, %v680_v51 }
 0x102   :  { %v1780_v56 = vpop.f32.mrf.mxu0  ;;  %v1812_v57 = vpop.f32.mrf.mxu1 }
 0x103   :  { %1681 = vst [vmem:[%s2190_s3 + $0x38] sm:$0xff] %v1553_v52   ;;  %1697 = vst [vmem:[%s2190_s3 + $0xb8] sm:$0xff] %v1633_v53   ;;  %v1548_v58 = vpack.c.bf16 %v971_v54, %v970_v48  ;;  %v1628_v59 = vpack.c.bf16 %v1003_v55, %v1002_v49  ;;  %v976_v0 = vadd.f32 %v1780_v56, %v2025_v42 }
 0x104   :  { %v565_v60 = vpop.f32.mrf.mxu0  ;;  %v693_v61 = vpop.f32.mrf.mxu1  ;;  %v1008_v1 = vadd.f32 %v1812_v57, %v2025_v42 }
 0x105   :  { %1680 = vst [vmem:[%s2190_s3 + $0x30] sm:$0xff] %v1548_v58   ;;  %1696 = vst [vmem:[%s2190_s3 + $0xb0] sm:$0xff] %v1628_v59   ;;  %v974_v4 = vadd.f32 %v2025_v42, %v565_v60  ;;  %v1006_v5 = vadd.f32 %v2025_v42, %v693_v61 }
 0x106   :  { %v1781_v62 = vpop.f32.mrf.mxu0  ;;  %v1813_v63 = vpop.f32.mrf.mxu1 }
 0x107   :  { %v977_v2 = vadd.f32 %v1781_v62, %v2025_v42  ;;  %v1009_v3 = vadd.f32 %v1813_v63, %v2025_v42 }
 0x108   :  { %v568_v6 = vpop.f32.mrf.mxu0  ;;  %v696_v7 = vpop.f32.mrf.mxu1 }
 0x109   :  { %v1563_v8 = vpack.c.bf16 %v977_v2, %v976_v0  ;;  %v1643_v9 = vpack.c.bf16 %v1009_v3, %v1008_v1  ;;  %v975_v10 = vadd.f32 %v2025_v42, %v568_v6  ;;  %v1007_v11 = vadd.f32 %v2025_v42, %v696_v7 }
 0x10a   :  { %v1784_v12 = vpop.f32.mrf.mxu0  ;;  %v1816_v13 = vpop.f32.mrf.mxu1 }
 0x10b   :  { %1683 = vst [vmem:[%s2190_s3 + $0x48] sm:$0xff] %v1563_v8   ;;  %1699 = vst [vmem:[%s2190_s3 + $0xc8] sm:$0xff] %v1643_v9   ;;  %v1558_v14 = vpack.c.bf16 %v975_v10, %v974_v4  ;;  %v1638_v15 = vpack.c.bf16 %v1007_v11, %v1006_v5  ;;  %v980_v20 = vadd.f32 %v1784_v12, %v2025_v42 }
 0x10c   :  { %v581_v16 = vpop.f32.mrf.mxu0  ;;  %v709_v17 = vpop.f32.mrf.mxu1  ;;  %v1012_v21 = vadd.f32 %v1816_v13, %v2025_v42 }
 0x10d   :  { %1682 = vst [vmem:[%s2190_s3 + $0x40] sm:$0xff] %v1558_v14   ;;  %1698 = vst [vmem:[%s2190_s3 + $0xc0] sm:$0xff] %v1638_v15   ;;  %v978_v24 = vadd.f32 %v2025_v42, %v581_v16  ;;  %v1010_v25 = vadd.f32 %v2025_v42, %v709_v17 }
 0x10e   :  { %v1785_v18 = vpop.f32.mrf.mxu0  ;;  %v1817_v19 = vpop.f32.mrf.mxu1 }
 0x10f   :  { %v981_v22 = vadd.f32 %v1785_v18, %v2025_v42  ;;  %v1013_v23 = vadd.f32 %v1817_v19, %v2025_v42 }
 0x110   :  { %v584_v26 = vpop.f32.mrf.mxu0  ;;  %v712_v27 = vpop.f32.mrf.mxu1 }
 0x111   :  { %v1573_v28 = vpack.c.bf16 %v981_v22, %v980_v20  ;;  %v1653_v29 = vpack.c.bf16 %v1013_v23, %v1012_v21  ;;  %v979_v30 = vadd.f32 %v2025_v42, %v584_v26  ;;  %v1011_v31 = vadd.f32 %v2025_v42, %v712_v27 }
 0x112   :  { %v1788_v32 = vpop.f32.mrf.mxu0  ;;  %v1820_v33 = vpop.f32.mrf.mxu1 }
 0x113   :  { %1685 = vst [vmem:[%s2190_s3 + $0x58] sm:$0xff] %v1573_v28   ;;  %1701 = vst [vmem:[%s2190_s3 + $0xd8] sm:$0xff] %v1653_v29   ;;  %v1568_v34 = vpack.c.bf16 %v979_v30, %v978_v24  ;;  %v1648_v35 = vpack.c.bf16 %v1011_v31, %v1010_v25  ;;  %v984_v40 = vadd.f32 %v1788_v32, %v2025_v42 }
 0x114   :  { %v597_v36 = vpop.f32.mrf.mxu0  ;;  %v725_v37 = vpop.f32.mrf.mxu1  ;;  %v1016_v41 = vadd.f32 %v1820_v33, %v2025_v42 }
 0x115   :  { %1684 = vst [vmem:[%s2190_s3 + $0x50] sm:$0xff] %v1568_v34   ;;  %1700 = vst [vmem:[%s2190_s3 + $0xd0] sm:$0xff] %v1648_v35   ;;  %v982_v45 = vadd.f32 %v2025_v42, %v597_v36  ;;  %v1014_v46 = vadd.f32 %v2025_v42, %v725_v37 }
 0x116   :  { %v1789_v38 = vpop.f32.mrf.mxu0  ;;  %v1821_v39 = vpop.f32.mrf.mxu1 }
 0x117   :  { %v985_v43 = vadd.f32 %v1789_v38, %v2025_v42  ;;  %v1017_v44 = vadd.f32 %v1821_v39, %v2025_v42 }
 0x118   :  { %v600_v47 = vpop.f32.mrf.mxu0  ;;  %v728_v48 = vpop.f32.mrf.mxu1 }
 0x119   :  { %v1583_v49 = vpack.c.bf16 %v985_v43, %v984_v40  ;;  %v1663_v50 = vpack.c.bf16 %v1017_v44, %v1016_v41  ;;  %v983_v51 = vadd.f32 %v2025_v42, %v600_v47  ;;  %v1015_v52 = vadd.f32 %v2025_v42, %v728_v48 }
 0x11a   :  { %v1792_v53 = vpop.f32.mrf.mxu0  ;;  %v1824_v54 = vpop.f32.mrf.mxu1 }
 0x11b   :  { %1687 = vst [vmem:[%s2190_s3 + $0x68] sm:$0xff] %v1583_v49   ;;  %1703 = vst [vmem:[%s2190_s3 + $0xe8] sm:$0xff] %v1663_v50   ;;  %v1578_v55 = vpack.c.bf16 %v983_v51, %v982_v45  ;;  %v1658_v56 = vpack.c.bf16 %v1015_v52, %v1014_v46  ;;  %v988_v61 = vadd.f32 %v1792_v53, %v2025_v42 }
 0x11c   :  { %v613_v57 = vpop.f32.mrf.mxu0  ;;  %v741_v58 = vpop.f32.mrf.mxu1  ;;  %v1020_v62 = vadd.f32 %v1824_v54, %v2025_v42 }
 0x11d   :  { %1686 = vst [vmem:[%s2190_s3 + $0x60] sm:$0xff] %v1578_v55   ;;  %1702 = vst [vmem:[%s2190_s3 + $0xe0] sm:$0xff] %v1658_v56   ;;  %v986_v1 = vadd.f32 %v2025_v42, %v613_v57  ;;  %v1018_v2 = vadd.f32 %v2025_v42, %v741_v58 }
 0x11e   :  { %v1793_v59 = vpop.f32.mrf.mxu0  ;;  %v1825_v60 = vpop.f32.mrf.mxu1 }
 0x11f   :  { %v989_v63 = vadd.f32 %v1793_v59, %v2025_v42  ;;  %v1021_v0 = vadd.f32 %v1825_v60, %v2025_v42 }
 0x120   :  { %v616_v3 = vpop.f32.mrf.mxu0  ;;  %v744_v4 = vpop.f32.mrf.mxu1 }
 0x121   :  { %v1593_v5 = vpack.c.bf16 %v989_v63, %v988_v61  ;;  %v1673_v6 = vpack.c.bf16 %v1021_v0, %v1020_v62  ;;  %v987_v7 = vadd.f32 %v2025_v42, %v616_v3  ;;  %v1019_v8 = vadd.f32 %v2025_v42, %v744_v4 }
 0x123   :  { %1689 = vst [vmem:[%s2190_s3 + $0x78] sm:$0xff] %v1593_v5   ;;  %1705 = vst [vmem:[%s2190_s3 + $0xf8] sm:$0xff] %v1673_v6   ;;  %v1588_v9 = vpack.c.bf16 %v987_v7, %v986_v1  ;;  %v1668_v10 = vpack.c.bf16 %v1019_v8, %v1018_v2 }
 0x125   :  { %1688 = vst [vmem:[%s2190_s3 + $0x70] sm:$0xff] %v1588_v9   ;;  %1704 = vst [vmem:[%s2190_s3 + $0xf0] sm:$0xff] %v1668_v10  }

// kernel: fwd.11
= control target key start
LH: loop header
LB: loop body
LE: loop exit
PB: predicated region body
PF: predicated region fallthrough
CT: control target
= control target key end

     0   :  { %s872_s1 = inlined_call_operand.vmem [shape: bf16[128,128], index: 1, kind: input, shape index: {}]   ;;  %s873_s0 = inlined_call_operand.vmem [shape: bf16[128,128], index: 0, kind: input, shape index: {}]   ;;  %s874_s2 = inlined_call_operand.vmem [shape: f32[1,128], index: 2, kind: input, shape index: {}]   ;;  %s875_s3 = inlined_call_operand.vmem [shape: bf16[128,128], index: 3, kind: output, shape index: {0}]   ;;  %s876_s4 = inlined_call_operand.vmem [shape: f32[1,1,128], index: 4, kind: output, shape index: {1}]   ;;  %s877_s5 = inlined_call_operand.vmem [shape: f32[1,1,128], index: 5, kind: output, shape index: {2}]  }
   0x1   :  { %v714_v0 = vld [vmem:[%s872_s1 + $0x38] sm:$0xff]   ;;  %v715_v1 = vld [vmem:[%s872_s1 + $0x30] sm:$0xff]   ;;  %v716_v2 = vld [vmem:[%s872_s1 + $0x28] sm:$0xff]  }
   0x2   :  { %666 = vmatprep.subr.bf16.mxu0 %v714_v0  ;;  %698 = vmatprep.subr.bf16.mxu1 %v714_v0  ;;  %v717_v3 = vld [vmem:[%s872_s1 + $0x20] sm:$0xff]   ;;  %v718_v10 = vld [vmem:[%s872_s1 + $0x18] sm:$0xff]   ;;  %v41_v12 = vld [vmem:[%s873_s0 + $0x8] sm:$0xf] }
   0x3   :  { %667 = vmatpush3.bf16.msra.mxu0 %v714_v0  ;;  %706 = vmatpush3.bf16.msra.mxu1 %v714_v0  ;;  %v39_v4 = vld [vmem:[%s873_s0] sm:$0xf]  ;;  %v40_v5 = vld [vmem:[%s873_s0 + $0x4] sm:$0xf]  ;;  %v719_v14 = vld [vmem:[%s872_s1 + $0x10] sm:$0xff]   ;;  %vm57_vm4 = vcmp.ge.bf16.partialorder %v41_v12, 0 }
   0x4   :  { %668 = vmatprep.subr.bf16.mxu0 %v715_v1  ;;  %699 = vmatprep.subr.bf16.mxu1 %v715_v1  ;;  %vm55_vm0 = vcmp.ge.bf16.partialorder %v39_v4, 0  ;;  %vm56_vm1 = vcmp.ge.bf16.partialorder %v40_v5, 0  ;;  %v71_v6 = vmul.bf16 1045249613, %v39_v4  ;;  %v72_v7 = vmul.bf16 1045249613, %v40_v5 }
   0x5   :  { %v47_v13 = vld [vmem:[%s873_s0 + $0x20] sm:$0xf]  ;;  %v48_v15 = vld [vmem:[%s873_s0 + $0x24] sm:$0xf]  ;;  %v720_v19 = vld [vmem:[%s872_s1 + $0x8] sm:$0xff]  }
   0x6   :  { %v87_v8 = vsel %vm55_vm0, %v39_v4, %v71_v6  ;;  %v88_v9 = vsel %vm56_vm1, %v40_v5, %v72_v7  ;;  %vm63_vm2 = vcmp.ge.bf16.partialorder %v47_v13, 0  ;;  %v79_v16 = vmul.bf16 1045249613, %v47_v13  ;;  %v42_v20 = vld [vmem:[%s873_s0 + $0xc] sm:$0xf]  ;;  %v721_v30 = vld [vmem:[%s872_s1] sm:$0xff]  }
   0x7   :  { %669 = vmatpush3.bf16.msra.mxu0 %v715_v1  ;;  %707 = vmatpush3.bf16.msra.mxu1 %v715_v1  ;;  %v554_v11 = vcombine.low %v87_v8, %v88_v9  ;;  %vm64_vm3 = vcmp.ge.bf16.partialorder %v48_v15, 0  ;;  %v80_v17 = vmul.bf16 1045249613, %v48_v15  ;;  %v43_v21 = vld [vmem:[%s873_s0 + $0x10] sm:$0xf]  ;;  %vm58_vm5 = vcmp.ge.bf16.partialorder %v42_v20, 0 }
   0x8   :  { %670 = vmatprep.subr.bf16.mxu0 %v716_v2  ;;  %700 = vmatprep.subr.bf16.mxu1 %v716_v2  ;;  %v95_v18 = vsel %vm63_vm2, %v47_v13, %v79_v16  ;;  %v44_v23 = vld [vmem:[%s873_s0 + $0x14] sm:$0xf]  ;;  %v49_v25 = vld [vmem:[%s873_s0 + $0x28] sm:$0xf]  ;;  %v50_v26 = vld [vmem:[%s873_s0 + $0x2c] sm:$0xf] }
   0x9   :  { %682 = vmatprep.mubr.bf16.mxu0 %v554_v11  ;;  %v96_v22 = vsel %vm64_vm3, %v48_v15, %v80_v17  ;;  %v73_v27 = vmul.bf16 1045249613, %v41_v12  ;;  %v51_v28 = vld [vmem:[%s873_s0 + $0x30] sm:$0xf]  ;;  %v52_v29 = vld [vmem:[%s873_s0 + $0x34] sm:$0xf] }
   0xa   :  { %v558_v24 = vcombine.low %v95_v18, %v96_v22  ;;  %v74_v31 = vmul.bf16 1045249613, %v42_v20  ;;  %vm59_vm6 = vcmp.ge.bf16.partialorder %v43_v21, 0  ;;  %v75_v32 = vmul.bf16 1045249613, %v43_v21 }
   0xb   :  { %671 = vmatpush3.bf16.msra.mxu0 %v716_v2  ;;  %708 = vmatpush3.bf16.msra.mxu1 %v716_v2  ;;  %v76_v33 = vmul.bf16 1045249613, %v44_v23  ;;  %v81_v34 = vmul.bf16 1045249613, %v49_v25  ;;  %v82_v35 = vmul.bf16 1045249613, %v50_v26  ;;  %v89_v38 = vsel %vm57_vm4, %v41_v12, %v73_v27 }
   0xc   :  { %672 = vmatprep.subr.bf16.mxu0 %v717_v3  ;;  %701 = vmatprep.subr.bf16.mxu1 %v717_v3  ;;  %vm65_vm7 = vcmp.ge.bf16.partialorder %v49_v25, 0  ;;  %vm66_vm8 = vcmp.ge.bf16.partialorder %v50_v26, 0  ;;  %v83_v36 = vmul.bf16 1045249613, %v51_v28  ;;  %v84_v37 = vmul.bf16 1045249613, %v52_v29 }
   0xd   :  { %690 = vmatprep.mubr.bf16.mxu1 %v558_v24  ;;  %vm60_vm9 = vcmp.ge.bf16.partialorder %v44_v23, 0  ;;  %vm67_vm10 = vcmp.ge.bf16.partialorder %v51_v28, 0  ;;  %vm68_vm11 = vcmp.ge.bf16.partialorder %v52_v29, 0  ;;  %v90_v39 = vsel %vm58_vm5, %v42_v20, %v74_v31  ;;  %v45_v41 = vld [vmem:[%s873_s0 + $0x18] sm:$0xf] }
   0xe   :  { %v91_v40 = vsel %vm59_vm6, %v43_v21, %v75_v32  ;;  %v46_v42 = vld [vmem:[%s873_s0 + $0x1c] sm:$0xf]  ;;  %v97_v43 = vsel %vm65_vm7, %v49_v25, %v81_v34  ;;  %v98_v44 = vsel %vm66_vm8, %v50_v26, %v82_v35  ;;  %v92_v45 = vsel %vm60_vm9, %v44_v23, %v76_v33  ;;  %v53_v48 = vld [vmem:[%s873_s0 + $0x38] sm:$0xf]  ;;  %v570_v2 = vld [vmem:[%s874_s2] ss:$0 sm:$0xff] }
   0xf   :  { %673 = vmatpush3.bf16.msra.mxu0 %v717_v3  ;;  %709 = vmatpush3.bf16.msra.mxu1 %v717_v3  ;;  %v99_v46 = vsel %vm67_vm10, %v51_v28, %v83_v36  ;;  %v100_v47 = vsel %vm68_vm11, %v52_v29, %v84_v37  ;;  %v54_v49 = vld [vmem:[%s873_s0 + $0x3c] sm:$0xf]  ;;  %v555_v50 = vcombine.low %v89_v38, %v90_v39  ;;  %vm61_vm12 = vcmp.ge.bf16.partialorder %v45_v41, 0 }
  0x10   :  { %674 = vmatprep.subr.bf16.mxu0 %v718_v10  ;;  %702 = vmatprep.subr.bf16.mxu1 %v718_v10  ;;  %v77_v51 = vmul.bf16 1045249613, %v45_v41  ;;  %v78_v52 = vmul.bf16 1045249613, %v46_v42  ;;  %v559_v53 = vcombine.low %v97_v43, %v98_v44  ;;  %v556_v54 = vcombine.low %v91_v40, %v92_v45 }
  0x11   :  { %v560_v55 = vcombine.low %v99_v46, %v100_v47  ;;  %v85_v56 = vmul.bf16 1045249613, %v53_v48  ;;  %v86_v57 = vmul.bf16 1045249613, %v54_v49  ;;  %vm62_vm13 = vcmp.ge.bf16.partialorder %v46_v42, 0 }
  0x12   :  { %vm69_vm14 = vcmp.ge.bf16.partialorder %v53_v48, 0  ;;  %vm70_vm15 = vcmp.ge.bf16.partialorder %v54_v49, 0  ;;  %v93_v58 = vsel %vm61_vm12, %v45_v41, %v77_v51  ;;  %v94_v59 = vsel %vm62_vm13, %v46_v42, %v78_v52 }
  0x13   :  { %675 = vmatpush3.bf16.msra.mxu0 %v718_v10  ;;  %710 = vmatpush3.bf16.msra.mxu1 %v718_v10  ;;  %v101_v60 = vsel %vm69_vm14, %v53_v48, %v85_v56  ;;  %v102_v61 = vsel %vm70_vm15, %v54_v49, %v86_v57  ;;  %v557_v62 = vcombine.low %v93_v58, %v94_v59 }
  0x14   :  { %676 = vmatprep.subr.bf16.mxu0 %v719_v14  ;;  %703 = vmatprep.subr.bf16.mxu1 %v719_v14  ;;  %v561_v63 = vcombine.low %v101_v60, %v102_v61 }
  0x17   :  { %677 = vmatpush3.bf16.msra.mxu0 %v719_v14  ;;  %711 = vmatpush3.bf16.msra.mxu1 %v719_v14 }
  0x18   :  { %678 = vmatprep.subr.bf16.mxu0 %v720_v19  ;;  %704 = vmatprep.subr.bf16.mxu1 %v720_v19 }
  0x1b   :  { %679 = vmatpush3.bf16.msra.mxu0 %v720_v19  ;;  %712 = vmatpush3.bf16.msra.mxu1 %v720_v19 }
  0x1c   :  { %680 = vmatprep.subr.bf16.mxu0 %v721_v30  ;;  %705 = vmatprep.subr.bf16.mxu1 %v721_v30 }
  0x1f   :  { %681 = vmatpush3.bf16.msra.mxu0 %v721_v30  ;;  %713 = vmatpush3.bf16.msra.mxu1 %v721_v30 }
  0x22   :  { %683 = vmatmul.mubr.bf16.vlgmr.msra.gmra.mxu0 %v555_v50  ;;  %691 = vmatmul.mubr.bf16.vlgmr.msra.gmra.mxu1 %v559_v53 }
  0x23   :  { %686 = vmatprep.mubr.bf16.mxu0 %v556_v54  ;;  %694 = vmatprep.mubr.bf16.mxu1 %v560_v55 }
  0x2a   :  { %687 = vmatmul.mubr.bf16.gmra.mxu0 %v557_v62  ;;  %695 = vmatmul.mubr.bf16.gmra.mxu1 %v561_v63 }
  0xe2   :  { %v684_v0 = vpop.f32.mrf.mxu0  ;;  %v692_v1 = vpop.f32.mrf.mxu1 }
  0xe3   :  { %v830_v6 = vadd.f32 %v692_v1, %v570_v2  ;;  %v388_v8 = vadd.f32 %v684_v0, %v570_v2 }
  0xe4   :  { %v265_v3 = vpop.f32.mrf.mxu0  ;;  %v297_v4 = vpop.f32.mrf.mxu1 }
  0xe5   :  { %v386_v9 = vadd.f32 %v570_v2, %v265_v3  ;;  %v394_v13 = vadd.f32 %v570_v2, %v297_v4  ;;  %v426_v28 = vmul.f32 %v388_v8, %v388_v8  ;;  %v434_v4 = vmul.f32 %v830_v6, %v830_v6 }
  0xe6   :  { %v685_v5 = vpop.f32.mrf.mxu0  ;;  %v693_v7 = vpop.f32.mrf.mxu1 }
  0xe7   :  { %v389_v10 = vadd.f32 %v685_v5, %v570_v2  ;;  %v832_v11 = vadd.f32 %v693_v7, %v570_v2  ;;  %v424_v21 = vmul.f32 %v386_v9, %v386_v9  ;;  %v432_v62 = vmul.f32 %v394_v13, %v394_v13 }
  0xe8   :  { %v268_v12 = vpop.f32.mrf.mxu0  ;;  %v300_v14 = vpop.f32.mrf.mxu1 }
  0xe9   :  { %v611_v15 = vpack.c.bf16 %v389_v10, %v388_v8  ;;  %v387_v16 = vadd.f32 %v570_v2, %v268_v12  ;;  %v631_v18 = vpack.c.bf16 %v832_v11, %v830_v6  ;;  %v395_v19 = vadd.f32 %v570_v2, %v300_v14 }
  0xea   :  { %v688_v17 = vpop.f32.mrf.mxu0  ;;  %v696_v20 = vpop.f32.mrf.mxu1  ;;  %v427_v32 = vmul.f32 %v389_v10, %v389_v10 }
  0xeb   :  { %643 = vst [vmem:[%s875_s3 + $0x8] sm:$0xff] %v611_v15   ;;  %v402_v22 = vadd.f32 %v387_v16, %v386_v9  ;;  %v425_v23 = vmul.f32 %v387_v16, %v387_v16  ;;  %v606_v24 = vpack.c.bf16 %v387_v16, %v386_v9  ;;  %647 = vst [vmem:[%s875_s3 + $0x28] sm:$0xff] %v631_v18  }
  0xec   :  { %v281_v25 = vpop.f32.mrf.mxu0  ;;  %v626_v26 = vpack.c.bf16 %v395_v19, %v394_v13  ;;  %v313_v27 = vpop.f32.mrf.mxu1  ;;  %v400_v34 = vadd.f32 %v696_v20, %v570_v2  ;;  %v392_v37 = vadd.f32 %v688_v17, %v570_v2 }
  0xed   :  { %v403_v29 = vadd.f32 %v402_v22, %v388_v8  ;;  %v440_v30 = vadd.f32 %v425_v23, %v424_v21  ;;  %607 = vst [vmem:[%s875_s3] sm:$0xff] %v606_v24   ;;  %v390_v31 = vadd.f32 %v570_v2, %v281_v25  ;;  %v398_v41 = vadd.f32 %v570_v2, %v313_v27 }
  0xee   :  { %v689_v33 = vpop.f32.mrf.mxu0  ;;  %646 = vst [vmem:[%s875_s3 + $0x20] sm:$0xff] %v626_v26   ;;  %v697_v35 = vpop.f32.mrf.mxu1  ;;  %v430_v56 = vmul.f32 %v392_v37, %v392_v37  ;;  %v435_v8 = vmul.f32 %v832_v11, %v832_v11  ;;  %v438_v18 = vmul.f32 %v400_v34, %v400_v34 }
  0xef   :  { %v441_v36 = vadd.f32 %v440_v30, %v426_v28  ;;  %v404_v38 = vadd.f32 %v403_v29, %v389_v10  ;;  %v393_v39 = vadd.f32 %v689_v33, %v570_v2  ;;  %v401_v42 = vadd.f32 %v697_v35, %v570_v2 }
  0xf0   :  { %v284_v40 = vpop.f32.mrf.mxu0  ;;  %v316_v43 = vpop.f32.mrf.mxu1  ;;  %v428_v45 = vmul.f32 %v390_v31, %v390_v31  ;;  %v436_v14 = vmul.f32 %v398_v41, %v398_v41 }
  0xf1   :  { %v405_v44 = vadd.f32 %v404_v38, %v390_v31  ;;  %v442_v46 = vadd.f32 %v441_v36, %v427_v32  ;;  %v621_v47 = vpack.c.bf16 %v393_v39, %v392_v37  ;;  %v391_v48 = vadd.f32 %v570_v2, %v284_v40 }
  0xf2   :  { %v641_v49 = vpack.c.bf16 %v401_v42, %v400_v34  ;;  %v399_v50 = vadd.f32 %v570_v2, %v316_v43  ;;  %v431_v59 = vmul.f32 %v393_v39, %v393_v39  ;;  %v433_v2 = vmul.f32 %v395_v19, %v395_v19 }
  0xf3   :  { %v443_v51 = vadd.f32 %v442_v46, %v428_v45  ;;  %645 = vst [vmem:[%s875_s3 + $0x18] sm:$0xff] %v621_v47   ;;  %v406_v52 = vadd.f32 %v405_v44, %v391_v48  ;;  %v429_v53 = vmul.f32 %v391_v48, %v391_v48  ;;  %v616_v54 = vpack.c.bf16 %v391_v48, %v390_v31 }
  0xf4   :  { %649 = vst [vmem:[%s875_s3 + $0x38] sm:$0xff] %v641_v49   ;;  %v636_v55 = vpack.c.bf16 %v399_v50, %v398_v41  ;;  %v437_v17 = vmul.f32 %v399_v50, %v399_v50  ;;  %v439_v21 = vmul.f32 %v401_v42, %v401_v42 }
  0xf5   :  { %v407_v57 = vadd.f32 %v406_v52, %v392_v37  ;;  %v444_v58 = vadd.f32 %v443_v51, %v429_v53  ;;  %644 = vst [vmem:[%s875_s3 + $0x10] sm:$0xff] %v616_v54  }
  0xf6   :  { %648 = vst [vmem:[%s875_s3 + $0x30] sm:$0xff] %v636_v55  }
  0xf7   :  { %v445_v60 = vadd.f32 %v444_v58, %v430_v56  ;;  %v408_v61 = vadd.f32 %v407_v57, %v393_v39 }
  0xf9   :  { %v409_v63 = vadd.f32 %v408_v61, %v394_v13  ;;  %v446_v0 = vadd.f32 %v445_v60, %v431_v59 }
  0xfb   :  { %v410_v1 = vadd.f32 %v409_v63, %v395_v19  ;;  %v447_v3 = vadd.f32 %v446_v0, %v432_v62 }
  0xfd   :  { %v411_v5 = vadd.f32 %v410_v1, %v830_v6  ;;  %v448_v7 = vadd.f32 %v447_v3, %v433_v2 }
  0xff   :  { %v449_v9 = vadd.f32 %v448_v7, %v434_v4  ;;  %v412_v10 = vadd.f32 %v411_v5, %v832_v11 }
 0x101   :  { %v413_v12 = vadd.f32 %v412_v10, %v398_v41  ;;  %v450_v15 = vadd.f32 %v449_v9, %v435_v8 }
 0x103   :  { %v451_v13 = vadd.f32 %v450_v15, %v436_v14  ;;  %v414_v16 = vadd.f32 %v413_v12, %v399_v50 }
 0x105   :  { %v415_v19 = vadd.f32 %v414_v16, %v400_v34  ;;  %v452_v20 = vadd.f32 %v451_v13, %v437_v17 }
 0x107   :  { %v416_v22 = vadd.f32 %v415_v19, %v401_v42  ;;  %v453_v23 = vadd.f32 %v452_v20, %v438_v18 }
 0x109   :  { %v417_v6 = vrot.slane %v416_v22, 4  ;;  %v454_v24 = vadd.f32 %v453_v23, %v439_v21 }
 0x10b   :  { %v418_v25 = vadd.f32 %v417_v6, %v416_v22  ;;  %v455_v26 = vrot.slane %v454_v24, 4 }
 0x10d   :  { %v419_v27 = vrot.slane %v418_v25, 2  ;;  %v456_v28 = vadd.f32 %v455_v26, %v454_v24 }
 0x10f   :  { %v420_v29 = vadd.f32 %v419_v27, %v418_v25  ;;  %v457_v11 = vrot.slane %v456_v28, 2 }
 0x111   :  { %v421_v30 = vrot.slane %v420_v29, 1  ;;  %v458_v31 = vadd.f32 %v457_v11, %v456_v28 }
 0x113   :  { %v422_v32 = vadd.f32 %v421_v30, %v420_v29  ;;  %v459_v33 = vrot.slane %v458_v31, 1 }
 0x115   :  { %423 = vst [vmem:[%s876_s4] sm:$0x1] %v422_v32  ;;  %v460_v34 = vadd.f32 %v459_v33, %v458_v31 }
 0x117   :  { %461 = vst [vmem:[%s877_s5] sm:$0x1] %v460_v34 }

// kernel: fwd.12
= control target key start
LH: loop header
LB: loop body
LE: loop exit
PB: predicated region body
PF: predicated region fallthrough
CT: control target
= control target key end

     0   :  { %s531_s1 = inlined_call_operand.vmem [shape: bf16[256,128], index: 1, kind: input, shape index: {}]   ;;  %s532_s0 = inlined_call_operand.vmem [shape: bf16[32,256], index: 0, kind: input, shape index: {}]   ;;  %s533_s2 = inlined_call_operand.vmem [shape: f32[1,128], index: 2, kind: input, shape index: {}]   ;;  %s534_s3 = inlined_call_operand.vmem [shape: bf16[32,128], index: 3, kind: output, shape index: {0}]   ;;  %s535_s4 = inlined_call_operand.vmem [shape: f32[1,1,128], index: 4, kind: output, shape index: {1}]   ;;  %s536_s5 = inlined_call_operand.vmem [shape: f32[1,1,128], index: 5, kind: output, shape index: {2}]  }
   0x1   :  { %v410_v0 = vld [vmem:[%s531_s1 + $0x78] sm:$0xff]   ;;  %v412_v2 = vld [vmem:[%s531_s1 + $0x70] sm:$0xff]   ;;  %v414_v4 = vld [vmem:[%s531_s1 + $0x68] sm:$0xff]  }
   0x2   :  { %v411_v1 = vld [vmem:[%s531_s1 + $0x38] sm:$0xff]   ;;  %366 = vmatprep.subr.bf16.mxu0 %v410_v0  ;;  %394 = vmatprep.subr.bf16.mxu1 %v410_v0  ;;  %v413_v3 = vld [vmem:[%s531_s1 + $0x30] sm:$0xff]   ;;  %v415_v5 = vld [vmem:[%s531_s1 + $0x28] sm:$0xff]  }
   0x3   :  { %367 = vmatpush3.bf16.msra.mxu0 %v411_v1  ;;  %402 = vmatpush3.bf16.msra.mxu1 %v411_v1  ;;  %v416_v6 = vld [vmem:[%s531_s1 + $0x60] sm:$0xff]   ;;  %v418_v8 = vld [vmem:[%s531_s1 + $0x58] sm:$0xff]   ;;  %v420_v10 = vld [vmem:[%s531_s1 + $0x50] sm:$0xff]  }
   0x4   :  { %368 = vmatprep.subr.bf16.mxu0 %v412_v2  ;;  %395 = vmatprep.subr.bf16.mxu1 %v412_v2  ;;  %v417_v7 = vld [vmem:[%s531_s1 + $0x20] sm:$0xff]   ;;  %v419_v9 = vld [vmem:[%s531_s1 + $0x18] sm:$0xff]   ;;  %v28_v12 = vld [vmem:[%s532_s0 + $0x8] sm:$0xff] }
   0x5   :  { %v27_v11 = vld [vmem:[%s532_s0] sm:$0xff]  ;;  %v29_v13 = vld [vmem:[%s532_s0 + $0x10] sm:$0xff]  ;;  %vm32_vm1 = vcmp.ge.bf16.partialorder %v28_v12, 0  ;;  %v36_v15 = vmul.bf16 1045249613, %v28_v12  ;;  %v30_v16 = vld [vmem:[%s532_s0 + $0x18] sm:$0xff] }
   0x6   :  { %vm31_vm0 = vcmp.ge.bf16.partialorder %v27_v11, 0  ;;  %v35_v14 = vmul.bf16 1045249613, %v27_v11  ;;  %vm33_vm2 = vcmp.ge.bf16.partialorder %v29_v13, 0  ;;  %v37_v17 = vmul.bf16 1045249613, %v29_v13 }
   0x7   :  { %369 = vmatpush3.bf16.msra.mxu0 %v413_v3  ;;  %403 = vmatpush3.bf16.msra.mxu1 %v413_v3  ;;  %v421_v18 = vld [vmem:[%s531_s1 + $0x10] sm:$0xff]   ;;  %v40_v20 = vsel %vm32_vm1, %v28_v12, %v36_v15  ;;  %vm34_vm3 = vcmp.ge.bf16.partialorder %v30_v16, 0  ;;  %v38_v21 = vmul.bf16 1045249613, %v30_v16  ;;  %v422_v22 = vld [vmem:[%s531_s1 + $0x48] sm:$0xff]   ;;  %v424_v28 = vld [vmem:[%s531_s1 + $0x40] sm:$0xff]  }
   0x8   :  { %370 = vmatprep.subr.bf16.mxu0 %v414_v4  ;;  %396 = vmatprep.subr.bf16.mxu1 %v414_v4  ;;  %v39_v19 = vsel %vm31_vm0, %v27_v11, %v35_v14  ;;  %v41_v24 = vsel %vm33_vm2, %v29_v13, %v37_v17  ;;  %v423_v27 = vld [vmem:[%s531_s1 + $0x8] sm:$0xff]   ;;  %v425_v29 = vld [vmem:[%s531_s1] sm:$0xff]  }
   0x9   :  { %v327_v23 = vcombine.high %v39_v19, %v40_v20  ;;  %v42_v25 = vsel %vm34_vm3, %v30_v16, %v38_v21  ;;  %v326_v30 = vcombine.low %v39_v19, %v40_v20  ;;  %v346_v37 = vld [vmem:[%s533_s2] ss:$0 sm:$0xff] }
   0xa   :  { %v329_v26 = vcombine.high %v41_v24, %v42_v25  ;;  %v328_v31 = vcombine.low %v41_v24, %v42_v25 }
   0xb   :  { %371 = vmatpush3.bf16.msra.mxu0 %v415_v5  ;;  %404 = vmatpush3.bf16.msra.mxu1 %v415_v5 }
   0xc   :  { %372 = vmatprep.subr.bf16.mxu0 %v416_v6  ;;  %397 = vmatprep.subr.bf16.mxu1 %v416_v6 }
   0xd   :  { %227 = vmatprep.mubr.bf16.mxu0 %v327_v23  ;;  %235 = vmatprep.mubr.bf16.mxu1 %v329_v26 }
   0xf   :  { %373 = vmatpush3.bf16.msra.mxu0 %v417_v7  ;;  %405 = vmatpush3.bf16.msra.mxu1 %v417_v7 }
  0x10   :  { %374 = vmatprep.subr.bf16.mxu0 %v418_v8  ;;  %398 = vmatprep.subr.bf16.mxu1 %v418_v8 }
  0x13   :  { %375 = vmatpush3.bf16.msra.mxu0 %v419_v9  ;;  %406 = vmatpush3.bf16.msra.mxu1 %v419_v9 }
  0x14   :  { %376 = vmatprep.subr.bf16.mxu0 %v420_v10  ;;  %399 = vmatprep.subr.bf16.mxu1 %v420_v10 }
  0x17   :  { %377 = vmatpush3.bf16.msra.mxu0 %v421_v18  ;;  %407 = vmatpush3.bf16.msra.mxu1 %v421_v18 }
  0x18   :  { %378 = vmatprep.subr.bf16.mxu0 %v422_v22  ;;  %400 = vmatprep.subr.bf16.mxu1 %v422_v22 }
  0x1b   :  { %379 = vmatpush3.bf16.msra.mxu0 %v423_v27  ;;  %408 = vmatpush3.bf16.msra.mxu1 %v423_v27 }
  0x1c   :  { %380 = vmatprep.subr.bf16.mxu0 %v424_v28  ;;  %401 = vmatprep.subr.bf16.mxu1 %v424_v28 }
  0x1f   :  { %381 = vmatpush3.bf16.msra.mxu0 %v425_v29  ;;  %409 = vmatpush3.bf16.msra.mxu1 %v425_v29 }
  0x22   :  { %228 = vmatmul.mubr.bf16.vlgmr.msra.gmra.mxu0 %v326_v30  ;;  %236 = vmatmul.mubr.bf16.vlgmr.msra.gmra.mxu1 %v328_v31 }
  0xe2   :  { %v382_v32 = vpop.f32.mrf.mxu0  ;;  %v388_v33 = vpop.f32.mrf.mxu1 }
  0xe4   :  { %v383_v34 = vpop.f32.mrf.mxu0  ;;  %v389_v35 = vpop.f32.mrf.mxu1 }
  0xe5   :  { %v384_v36 = vadd.f32 %v383_v34, %v382_v32  ;;  %v390_v40 = vadd.f32 %v389_v35, %v388_v33 }
  0xe6   :  { %v385_v38 = vpop.f32.mrf.mxu0  ;;  %v391_v39 = vpop.f32.mrf.mxu1 }
  0xe7   :  { %v266_v43 = vadd.f32 %v384_v36, %v346_v37  ;;  %v268_v46 = vadd.f32 %v390_v40, %v346_v37 }
  0xe8   :  { %v386_v41 = vpop.f32.mrf.mxu0  ;;  %v392_v42 = vpop.f32.mrf.mxu1 }
  0xe9   :  { %v387_v44 = vadd.f32 %v386_v41, %v385_v38  ;;  %v393_v45 = vadd.f32 %v392_v42, %v391_v39  ;;  %v280_v49 = vmul.f32 %v266_v43, %v266_v43  ;;  %v282_v54 = vmul.f32 %v268_v46, %v268_v46 }
  0xeb   :  { %v267_v47 = vadd.f32 %v387_v44, %v346_v37  ;;  %v269_v48 = vadd.f32 %v393_v45, %v346_v37 }
  0xed   :  { %v270_v50 = vadd.f32 %v267_v47, %v266_v43  ;;  %v281_v51 = vmul.f32 %v267_v47, %v267_v47  ;;  %v358_v52 = vpack.c.bf16 %v267_v47, %v266_v43  ;;  %v363_v53 = vpack.c.bf16 %v269_v48, %v268_v46 }
  0xee   :  { %v283_v58 = vmul.f32 %v269_v48, %v269_v48 }
  0xef   :  { %v284_v55 = vadd.f32 %v281_v51, %v280_v49  ;;  %359 = vst [vmem:[%s534_s3] sm:$0xff] %v358_v52   ;;  %v271_v56 = vadd.f32 %v270_v50, %v268_v46  ;;  %365 = vst [vmem:[%s534_s3 + $0x8] sm:$0xff] %v363_v53  }
  0xf1   :  { %v272_v57 = vadd.f32 %v271_v56, %v269_v48  ;;  %v285_v59 = vadd.f32 %v284_v55, %v282_v54 }
  0xf3   :  { %v273_v60 = vrot.slane %v272_v57, 4  ;;  %v286_v61 = vadd.f32 %v285_v59, %v283_v58 }
  0xf5   :  { %v274_v62 = vadd.f32 %v273_v60, %v272_v57  ;;  %v287_v63 = vrot.slane %v286_v61, 4 }
  0xf7   :  { %v275_v0 = vrot.slane %v274_v62, 2  ;;  %v288_v1 = vadd.f32 %v287_v63, %v286_v61 }
  0xf9   :  { %v276_v2 = vadd.f32 %v275_v0, %v274_v62  ;;  %v289_v3 = vrot.slane %v288_v1, 2 }
  0xfb   :  { %v277_v4 = vrot.slane %v276_v2, 1  ;;  %v290_v5 = vadd.f32 %v289_v3, %v288_v1 }
  0xfd   :  { %v278_v6 = vadd.f32 %v277_v4, %v276_v2  ;;  %v291_v7 = vrot.slane %v290_v5, 1 }
  0xff   :  { %279 = vst [vmem:[%s535_s4] sm:$0x1] %v278_v6  ;;  %v292_v8 = vadd.f32 %v291_v7, %v290_v5 }
 0x101   :  { %293 = vst [vmem:[%s536_s5] sm:$0x1] %v292_v8 }

// kernel: fwd.13
= control target key start
LH: loop header
LB: loop body
LE: loop exit
PB: predicated region body
PF: predicated region fallthrough
CT: control target
= control target key end

     0   :  { %s683_s1 = inlined_call_operand.vmem [shape: bf16[512,128], index: 1, kind: input, shape index: {}]   ;;  %s684_s0 = inlined_call_operand.vmem [shape: bf16[8,512], index: 0, kind: input, shape index: {}]   ;;  %s685_s2 = inlined_call_operand.vmem [shape: f32[1,128], index: 2, kind: input, shape index: {}]   ;;  %s686_s3 = inlined_call_operand.vmem [shape: bf16[8,128], index: 3, kind: output, shape index: {0}]   ;;  %s687_s4 = inlined_call_operand.vmem [shape: f32[1,1,128], index: 4, kind: output, shape index: {1}]   ;;  %s688_s5 = inlined_call_operand.vmem [shape: f32[1,1,128], index: 5, kind: output, shape index: {2}]  }
   0x1   :  { %v507_v0 = vld [vmem:[%s683_s1 + $0x78] sm:$0xff]   ;;  %v511_v4 = vld [vmem:[%s683_s1 + $0x70] sm:$0xff]   ;;  %v515_v8 = vld [vmem:[%s683_s1 + $0x68] sm:$0xff]  }
   0x2   :  { %v508_v1 = vld [vmem:[%s683_s1 + $0xf8] sm:$0xff]   ;;  %463 = vmatprep.subr.bf16.mxu0 %v507_v0  ;;  %v512_v5 = vld [vmem:[%s683_s1 + $0xf0] sm:$0xff]   ;;  %v516_v9 = vld [vmem:[%s683_s1 + $0xe8] sm:$0xff]  }
   0x3   :  { %v509_v2 = vld [vmem:[%s683_s1 + $0x38] sm:$0xff]   ;;  %485 = vmatprep.subr.bf16.mxu1 %v508_v1  ;;  %v513_v6 = vld [vmem:[%s683_s1 + $0x30] sm:$0xff]   ;;  %v517_v10 = vld [vmem:[%s683_s1 + $0x28] sm:$0xff]  }
   0x4   :  { %v510_v3 = vld [vmem:[%s683_s1 + $0xb8] sm:$0xff]   ;;  %464 = vmatpush3.bf16.msra.mxu0 %v509_v2  ;;  %v514_v7 = vld [vmem:[%s683_s1 + $0xb0] sm:$0xff]   ;;  %v518_v11 = vld [vmem:[%s683_s1 + $0xa8] sm:$0xff]  }
   0x5   :  { %486 = vmatpush3.bf16.msra.mxu1 %v510_v3  ;;  %465 = vmatprep.subr.bf16.mxu0 %v511_v4  ;;  %v519_v12 = vld [vmem:[%s683_s1 + $0x60] sm:$0xff]   ;;  %v523_v16 = vld [vmem:[%s683_s1 + $0x58] sm:$0xff]   ;;  %v527_v20 = vld [vmem:[%s683_s1 + $0x50] sm:$0xff]  }
   0x6   :  { %487 = vmatprep.subr.bf16.mxu1 %v512_v5  ;;  %v520_v13 = vld [vmem:[%s683_s1 + $0xe0] sm:$0xff]   ;;  %v524_v17 = vld [vmem:[%s683_s1 + $0xd8] sm:$0xff]   ;;  %v528_v21 = vld [vmem:[%s683_s1 + $0xd0] sm:$0xff]  }
   0x7   :  { %v521_v14 = vld [vmem:[%s683_s1 + $0x20] sm:$0xff]   ;;  %v525_v18 = vld [vmem:[%s683_s1 + $0x18] sm:$0xff]   ;;  %v529_v22 = vld [vmem:[%s683_s1 + $0x10] sm:$0xff]  }
   0x8   :  { %466 = vmatpush3.bf16.msra.mxu0 %v513_v6  ;;  %v522_v15 = vld [vmem:[%s683_s1 + $0xa0] sm:$0xff]   ;;  %v526_v19 = vld [vmem:[%s683_s1 + $0x98] sm:$0xff]   ;;  %v530_v23 = vld [vmem:[%s683_s1 + $0x90] sm:$0xff]  }
   0x9   :  { %488 = vmatpush3.bf16.msra.mxu1 %v514_v7  ;;  %467 = vmatprep.subr.bf16.mxu0 %v515_v8  ;;  %v531_v24 = vld [vmem:[%s683_s1 + $0x48] sm:$0xff]   ;;  %v535_v28 = vld [vmem:[%s683_s1 + $0x40] sm:$0xff]  }
   0xa   :  { %489 = vmatprep.subr.bf16.mxu1 %v516_v9  ;;  %v532_v25 = vld [vmem:[%s683_s1 + $0xc8] sm:$0xff]   ;;  %v536_v29 = vld [vmem:[%s683_s1 + $0xc0] sm:$0xff]  }
   0xb   :  { %v533_v26 = vld [vmem:[%s683_s1 + $0x8] sm:$0xff]   ;;  %v537_v30 = vld [vmem:[%s683_s1] sm:$0xff]  }
   0xc   :  { %468 = vmatpush3.bf16.msra.mxu0 %v517_v10  ;;  %v534_v27 = vld [vmem:[%s683_s1 + $0x88] sm:$0xff]   ;;  %v538_v31 = vld [vmem:[%s683_s1 + $0x80] sm:$0xff]  }
   0xd   :  { %490 = vmatpush3.bf16.msra.mxu1 %v518_v11  ;;  %469 = vmatprep.subr.bf16.mxu0 %v519_v12  ;;  %v24_v32 = vld [vmem:[%s684_s0] sm:$0xff]  ;;  %v25_v33 = vld [vmem:[%s684_s0 + $0x8] sm:$0xff] }
   0xe   :  { %491 = vmatprep.subr.bf16.mxu1 %v520_v13  ;;  %vm26_vm0 = vcmp.ge.bf16.partialorder %v24_v32, 0  ;;  %v28_v34 = vmul.bf16 1045249613, %v24_v32  ;;  %vm27_vm1 = vcmp.ge.bf16.partialorder %v25_v33, 0  ;;  %v29_v35 = vmul.bf16 1045249613, %v25_v33 }
   0xf   :  { %v462_v48 = vld [vmem:[%s685_s2] ss:$0 sm:$0xff] }
  0x10   :  { %470 = vmatpush3.bf16.msra.mxu0 %v521_v14  ;;  %v30_v36 = vsel %vm26_vm0, %v24_v32, %v28_v34  ;;  %v31_v37 = vsel %vm27_vm1, %v25_v33, %v29_v35 }
  0x11   :  { %492 = vmatpush3.bf16.msra.mxu1 %v522_v15  ;;  %471 = vmatprep.subr.bf16.mxu0 %v523_v16  ;;  %v426_v38 = vcombine.low %v30_v36, %v30_v36  ;;  %v427_v39 = vcombine.high %v30_v36, %v30_v36  ;;  %v428_v40 = vcombine.low %v31_v37, %v31_v37 }
  0x12   :  { %493 = vmatprep.subr.bf16.mxu1 %v524_v17  ;;  %v429_v41 = vcombine.high %v31_v37, %v31_v37 }
  0x13   :  { %335 = vmatprep.mubr.bf16.mxu0 %v427_v39 }
  0x14   :  { %472 = vmatpush3.bf16.msra.mxu0 %v525_v18  ;;  %375 = vmatprep.mubr.bf16.mxu1 %v429_v41 }
  0x15   :  { %494 = vmatpush3.bf16.msra.mxu1 %v526_v19  ;;  %473 = vmatprep.subr.bf16.mxu0 %v527_v20 }
  0x16   :  { %495 = vmatprep.subr.bf16.mxu1 %v528_v21 }
  0x18   :  { %474 = vmatpush3.bf16.msra.mxu0 %v529_v22 }
  0x19   :  { %496 = vmatpush3.bf16.msra.mxu1 %v530_v23  ;;  %475 = vmatprep.subr.bf16.mxu0 %v531_v24 }
  0x1a   :  { %497 = vmatprep.subr.bf16.mxu1 %v532_v25 }
  0x1c   :  { %476 = vmatpush3.bf16.msra.mxu0 %v533_v26 }
  0x1d   :  { %498 = vmatpush3.bf16.msra.mxu1 %v534_v27  ;;  %477 = vmatprep.subr.bf16.mxu0 %v535_v28 }
  0x1e   :  { %499 = vmatprep.subr.bf16.mxu1 %v536_v29 }
  0x20   :  { %478 = vmatpush3.bf16.msra.mxu0 %v537_v30 }
  0x21   :  { %500 = vmatpush3.bf16.msra.mxu1 %v538_v31 }
  0x23   :  { %336 = vmatmul.mubr.bf16.vlgmr.msra.gmra.mxu0 %v426_v38 }
  0x24   :  { %376 = vmatmul.mubr.bf16.vlgmr.msra.gmra.mxu1 %v428_v40 }
  0xe3   :  { %v479_v42 = vpop.f32.mrf.mxu0 }
  0xe4   :  { %v501_v43 = vpop.f32.mrf.mxu1 }
  0xe5   :  { %v480_v44 = vpop.f32.mrf.mxu0 }
  0xe6   :  { %v502_v45 = vpop.f32.mrf.mxu1  ;;  %v481_v46 = vadd.f32 %v480_v44, %v479_v42 }
  0xe7   :  { %v503_v47 = vadd.f32 %v502_v45, %v501_v43  ;;  %v482_v49 = vpop.f32.mrf.mxu0 }
  0xe8   :  { %v504_v50 = vpop.f32.mrf.mxu1 }
  0xe9   :  { %v378_v51 = vadd.f32 %v503_v47, %v481_v46  ;;  %v483_v52 = vpop.f32.mrf.mxu0 }
  0xea   :  { %v505_v53 = vpop.f32.mrf.mxu1 }
  0xeb   :  { %v396_v54 = vadd.f32 %v462_v48, %v378_v51 }
  0xed   :  { %v397_v55 = vrot.slane %v396_v54, 4  ;;  %v404_v56 = vmul.f32 %v396_v54, %v396_v54  ;;  %v412_v57 = vpack.c.bf16 %v396_v54, %v396_v54 }
  0xef   :  { %v398_v58 = vadd.f32 %v397_v55, %v396_v54  ;;  %v405_v59 = vrot.slane %v404_v56, 4  ;;  %413 = vst [vmem:[%s686_s3] sm:$0xf] %v412_v57 }
  0xf1   :  { %v399_v60 = vrot.slane %v398_v58, 2  ;;  %v406_v61 = vadd.f32 %v405_v59, %v404_v56 }
  0xf3   :  { %v400_v62 = vadd.f32 %v399_v60, %v398_v58  ;;  %v407_v63 = vrot.slane %v406_v61, 2 }
  0xf5   :  { %v401_v0 = vrot.slane %v400_v62, 1  ;;  %v408_v1 = vadd.f32 %v407_v63, %v406_v61 }
  0xf7   :  { %v402_v2 = vadd.f32 %v401_v0, %v400_v62  ;;  %v409_v3 = vrot.slane %v408_v1, 1 }
  0xf9   :  { %403 = vst [vmem:[%s687_s4] sm:$0x1] %v402_v2  ;;  %v410_v4 = vadd.f32 %v409_v3, %v408_v1 }
  0xfb   :  { %411 = vst [vmem:[%s688_s5] sm:$0x1] %v410_v4 }

// kernel: fwd.14
= control target key start
LH: loop header
LB: loop body
LE: loop exit
PB: predicated region body
PF: predicated region fallthrough
CT: control target
= control target key end

     0   :  { %s944_s12 = smov 0   ;;  %s946_s13 = smov 0   ;;  %s1027_s0 = inlined_call_operand.vmem [shape: bf16[8,1024], index: 0, kind: input, shape index: {}]   ;;  %s1028_s1 = inlined_call_operand.vmem [shape: bf16[1024,128], index: 1, kind: input, shape index: {}]   ;;  %s1029_s2 = inlined_call_operand.vmem [shape: f32[1,128], index: 2, kind: input, shape index: {}]   ;;  %s1030_s3 = inlined_call_operand.vmem [shape: bf16[8,128], index: 3, kind: output, shape index: {}]  }
   0x1   :  { %s948_s14 = smov 0  }
   0x2 LB: > { %s25_s15 = sadd.s32 1, %s917_s13  ;;  %p751_p0 = scmp.ge.s32.totalorder %s921_s14, 1  ;;  %s921_s14 = sphi %s948_s14, %s13_s14   ;;  %s917_s13 = sphi %s946_s13, %s1032_s13   ;;  %s913_s12 = sphi %s944_s12, %s1031_s12  }
   0x3   : > { %p26_p1 = scmp.ge.s32.totalorder %s25_s15, 2  ;;  %p189_p2 = scmp.lt.s32.totalorder %s921_s14, 3 }
   0x5   : > { %s1034_s15 = smov (%p26_p1, %s25_s15), 0  ;;  %p190_p3 = pnand %p751_p0, %p189_p2 }
   0x6   : > { %s752_s16 = sshll.u32 (!%p190_p3), %s913_s12, 2  ;;  %s754_s17 = sshll.u32 (!%p190_p3), %s913_s12, 6 }
   0x7   : > { %193 = sbr.rel (%p190_p3) target bundleno = 271 (0x10f), region = 32  ;;  %p233_p4 = scmp.lt.s32.totalorder (!%p190_p3), %s752_s16, 7 }
   0x8   : > { %p241_p5 = scmp.lt.s32.totalorder (!%p190_p3), %s754_s17, 127  ;;  %p756_p6 = scmp.ne.s32.totalorder (!%p190_p3), %s913_s12, 0 }
   0xc   : > { %s1036_s16 = smov (!%p233_p4, %s752_s16), 7  ;;  %s1038_s17 = smov (!%p241_p5, %s754_s17), 127 }
   0xd   : > { %s753_s18 = sshll.u32 %s1036_s16, 2  ;;  %s755_s22 = sshll.u32 %s1038_s17, 2 }
   0xe   : > { %s969_s21 = scalar_lea.vmem %s1027_s0, %s753_s18  ;;  %s974_s25 = scalar_lea.vmem %s1028_s1, %s755_s22 }
   0xf   : > { %264 = sbr.rel (%p756_p6) target bundleno = 22 (0x16), region = 36 }
  0x14   : > { %v923_v0 = vmov 0.0  }
  0x15   : > { %265 = vst [vmem:[#allocation2] sm:$0xff] %v923_v0 }
  0x16 PF: > { %v867_v1 = vld [vmem:[%s974_s25 + $0x78] sm:$0xff]   ;;  %v871_v5 = vld [vmem:[%s974_s25 + $0x70] sm:$0xff]   ;;  %v875_v9 = vld [vmem:[%s974_s25 + $0x68] sm:$0xff]   ;;  %p793_p7 = scmp.ne.s32.totalorder %s913_s12, 1 }
  0x17   : > { %v868_v2 = vld [vmem:[%s974_s25 + $0xf8] sm:$0xff]   ;;  %798 = vmatprep.subr.bf16.mxu0 %v867_v1  ;;  %v872_v6 = vld [vmem:[%s974_s25 + $0xf0] sm:$0xff]   ;;  %v876_v10 = vld [vmem:[%s974_s25 + $0xe8] sm:$0xff]  }
  0x18   : > { %v869_v3 = vld [vmem:[%s974_s25 + $0x38] sm:$0xff]   ;;  %820 = vmatprep.subr.bf16.mxu1 %v868_v2  ;;  %v873_v7 = vld [vmem:[%s974_s25 + $0x30] sm:$0xff]   ;;  %v877_v11 = vld [vmem:[%s974_s25 + $0x28] sm:$0xff]  }
  0x19   : > { %v870_v4 = vld [vmem:[%s974_s25 + $0xb8] sm:$0xff]   ;;  %799 = vmatpush3.bf16.msra.mxu0 %v869_v3  ;;  %v874_v8 = vld [vmem:[%s974_s25 + $0xb0] sm:$0xff]   ;;  %v878_v12 = vld [vmem:[%s974_s25 + $0xa8] sm:$0xff]  }
  0x1a   : > { %821 = vmatpush3.bf16.msra.mxu1 %v870_v4  ;;  %800 = vmatprep.subr.bf16.mxu0 %v871_v5  ;;  %v879_v13 = vld [vmem:[%s974_s25 + $0x60] sm:$0xff]   ;;  %v883_v17 = vld [vmem:[%s974_s25 + $0x58] sm:$0xff]   ;;  %v887_v21 = vld [vmem:[%s974_s25 + $0x50] sm:$0xff]  }
  0x1b   : > { %822 = vmatprep.subr.bf16.mxu1 %v872_v6  ;;  %v880_v14 = vld [vmem:[%s974_s25 + $0xe0] sm:$0xff]   ;;  %v884_v18 = vld [vmem:[%s974_s25 + $0xd8] sm:$0xff]   ;;  %v888_v22 = vld [vmem:[%s974_s25 + $0xd0] sm:$0xff]  }
  0x1c   : > { %v881_v15 = vld [vmem:[%s974_s25 + $0x20] sm:$0xff]   ;;  %v885_v19 = vld [vmem:[%s974_s25 + $0x18] sm:$0xff]   ;;  %v889_v23 = vld [vmem:[%s974_s25 + $0x10] sm:$0xff]  }
  0x1d   : > { %801 = vmatpush3.bf16.msra.mxu0 %v873_v7  ;;  %v882_v16 = vld [vmem:[%s974_s25 + $0xa0] sm:$0xff]   ;;  %v886_v20 = vld [vmem:[%s974_s25 + $0x98] sm:$0xff]   ;;  %v890_v24 = vld [vmem:[%s974_s25 + $0x90] sm:$0xff]  }
  0x1e   : > { %823 = vmatpush3.bf16.msra.mxu1 %v874_v8  ;;  %802 = vmatprep.subr.bf16.mxu0 %v875_v9  ;;  %v891_v25 = vld [vmem:[%s974_s25 + $0x48] sm:$0xff]   ;;  %v895_v29 = vld [vmem:[%s974_s25 + $0x40] sm:$0xff]  }
  0x1f   : > { %824 = vmatprep.subr.bf16.mxu1 %v876_v10  ;;  %v892_v26 = vld [vmem:[%s974_s25 + $0xc8] sm:$0xff]   ;;  %v896_v30 = vld [vmem:[%s974_s25 + $0xc0] sm:$0xff]  }
  0x20   : > { %v893_v27 = vld [vmem:[%s974_s25 + $0x8] sm:$0xff]   ;;  %v897_v31 = vld [vmem:[%s974_s25] sm:$0xff]  }
  0x21   : > { %803 = vmatpush3.bf16.msra.mxu0 %v877_v11  ;;  %v894_v28 = vld [vmem:[%s974_s25 + $0x88] sm:$0xff]   ;;  %v898_v32 = vld [vmem:[%s974_s25 + $0x80] sm:$0xff]  }
  0x22   : > { %825 = vmatpush3.bf16.msra.mxu1 %v878_v12  ;;  %804 = vmatprep.subr.bf16.mxu0 %v879_v13  ;;  %v266_v33 = vld [vmem:[%s969_s21] sm:$0xff]  ;;  %v267_v34 = vld [vmem:[%s969_s21 + $0x8] sm:$0xff] }
  0x23   : > { %826 = vmatprep.subr.bf16.mxu1 %v880_v14  ;;  %vm268_vm0 = vcmp.ge.bf16.partialorder %v266_v33, 0  ;;  %v270_v35 = vmul.bf16 1045249613, %v266_v33  ;;  %vm269_vm1 = vcmp.ge.bf16.partialorder %v267_v34, 0  ;;  %v271_v36 = vmul.bf16 1045249613, %v267_v34 }
  0x24   : > { %v274_v49 = vld [vmem:[#allocation2] sm:$0xff] }
  0x25   : > { %805 = vmatpush3.bf16.msra.mxu0 %v881_v15  ;;  %v272_v37 = vsel %vm268_vm0, %v266_v33, %v270_v35  ;;  %v273_v38 = vsel %vm269_vm1, %v267_v34, %v271_v36 }
  0x26   : > { %827 = vmatpush3.bf16.msra.mxu1 %v882_v16  ;;  %806 = vmatprep.subr.bf16.mxu0 %v883_v17  ;;  %v757_v39 = vcombine.low %v272_v37, %v272_v37  ;;  %v758_v40 = vcombine.high %v272_v37, %v272_v37  ;;  %v759_v41 = vcombine.low %v273_v38, %v273_v38 }
  0x27   : > { %828 = vmatprep.subr.bf16.mxu1 %v884_v18  ;;  %v760_v42 = vcombine.high %v273_v38, %v273_v38 }
  0x28   : > { %577 = vmatprep.mubr.bf16.mxu0 %v758_v40 }
  0x29   : > { %807 = vmatpush3.bf16.msra.mxu0 %v885_v19  ;;  %617 = vmatprep.mubr.bf16.mxu1 %v760_v42 }
  0x2a   : > { %829 = vmatpush3.bf16.msra.mxu1 %v886_v20  ;;  %808 = vmatprep.subr.bf16.mxu0 %v887_v21 }
  0x2b   : > { %830 = vmatprep.subr.bf16.mxu1 %v888_v22 }
  0x2d   : > { %809 = vmatpush3.bf16.msra.mxu0 %v889_v23 }
  0x2e   : > { %831 = vmatpush3.bf16.msra.mxu1 %v890_v24  ;;  %810 = vmatprep.subr.bf16.mxu0 %v891_v25 }
  0x2f   : > { %832 = vmatprep.subr.bf16.mxu1 %v892_v26 }
  0x31   : > { %811 = vmatpush3.bf16.msra.mxu0 %v893_v27 }
  0x32   : > { %833 = vmatpush3.bf16.msra.mxu1 %v894_v28  ;;  %812 = vmatprep.subr.bf16.mxu0 %v895_v29 }
  0x33   : > { %834 = vmatprep.subr.bf16.mxu1 %v896_v30 }
  0x35   : > { %813 = vmatpush3.bf16.msra.mxu0 %v897_v31 }
  0x36   : > { %835 = vmatpush3.bf16.msra.mxu1 %v898_v32 }
  0x38   : > { %578 = vmatmul.mubr.bf16.vlgmr.msra.gmra.mxu0 %v757_v39 }
  0x39   : > { %618 = vmatmul.mubr.bf16.vlgmr.msra.gmra.mxu1 %v759_v41 }
  0xf8   : > { %v814_v43 = vpop.f32.mrf.mxu0 }
  0xf9   : > { %v836_v44 = vpop.f32.mrf.mxu1 }
  0xfa   : > { %v815_v45 = vpop.f32.mrf.mxu0 }
  0xfb   : > { %v837_v46 = vpop.f32.mrf.mxu1  ;;  %v816_v47 = vadd.f32 %v815_v45, %v814_v43 }
  0xfc   : > { %v838_v48 = vadd.f32 %v837_v46, %v836_v44  ;;  %v817_v50 = vpop.f32.mrf.mxu0 }
  0xfd   : > { %v839_v51 = vpop.f32.mrf.mxu1 }
  0xfe   : > { %v620_v52 = vadd.f32 %v838_v48, %v816_v47  ;;  %v818_v53 = vpop.f32.mrf.mxu0  ;;  %630 = sbr.rel (%p793_p7) target bundleno = 271 (0x10f), region = 40 }
  0xff   : > { %v840_v54 = vpop.f32.mrf.mxu1 }
 0x100   : > { %v625_v55 = vadd.f32 %v620_v52, %v274_v49 }
 0x102   : > { %626 = vst [vmem:[#allocation2] sm:$0xff] %v625_v55 }
 0x103   : > { %v794_v57 = vld [vmem:[%s1029_s2] ss:$0 sm:$0xff] }
 0x109   : > { %v631_v56 = vld [vmem:[#allocation2] sm:$0xff] }
 0x10a   : > { %v639_v58 = vadd.f32 %v794_v57, %v631_v56 }
 0x10c   : > { %v640_v59 = vpack.c.bf16 %v639_v58, %v639_v58 }
 0x10e   : > { %641 = vst [vmem:[%s1030_s3] sm:$0xf] %v640_v59 }
 0x10f PF: > { %s13_s14 = sadd.s32 1, %s921_s14   ;;  %s1031_s12 = smov %s917_s13 }
 0x110   : > { %p10_p8 = scmp.ge.s32.totalorder %s13_s14, 4   ;;  %s1032_s13 = smov %s1034_s15 }
 0x112   :  { %12 = sbr.rel (!%p10_p8) target bundleno = 2 (0x2), region = 76 }

// kernel: fwd.15
= control target key start
LH: loop header
LB: loop body
LE: loop exit
PB: predicated region body
PF: predicated region fallthrough
CT: control target
= control target key end

     0   :  { %s1438_s18 = smov 0   ;;  %s1440_s19 = smov 0   ;;  %s1559_s0 = inlined_call_operand.vmem [shape: bf16[8,1024], index: 0, kind: input, shape index: {}]   ;;  %s1560_s1 = inlined_call_operand.vmem [shape: bf16[1024,256], index: 1, kind: input, shape index: {}]   ;;  %s1561_s2 = inlined_call_operand.vmem [shape: f32[1,256], index: 2, kind: input, shape index: {}]   ;;  %s1562_s3 = inlined_call_operand.vmem [shape: bf16[8,256], index: 3, kind: output, shape index: {0}]   ;;  %s1563_s4 = inlined_call_operand.vmem [shape: f32[1,1,256], index: 4, kind: output, shape index: {1}]   ;;  %s1564_s5 = inlined_call_operand.vmem [shape: f32[1,1,256], index: 5, kind: output, shape index: {2}]  }
   0x1   :  { %s1442_s20 = smov 0  }
   0x2 LB: > { %s28_s21 = sadd.s32 1, %s1399_s19  ;;  %p1171_p0 = scmp.ge.s32.totalorder %s1403_s20, 1  ;;  %s1403_s20 = sphi %s1442_s20, %s16_s20   ;;  %s1399_s19 = sphi %s1440_s19, %s1566_s19   ;;  %s1395_s18 = sphi %s1438_s18, %s1565_s18  }
   0x3   : > { %p29_p1 = scmp.ge.s32.totalorder %s28_s21, 2  ;;  %p253_p2 = scmp.lt.s32.totalorder %s1403_s20, 3 }
   0x5   : > { %s1568_s21 = smov (%p29_p1, %s28_s21), 0  ;;  %p254_p3 = pnand %p1171_p0, %p253_p2 }
   0x6   : > { %s1172_s22 = sshll.u32 (!%p254_p3), %s1395_s18, 2  ;;  %s1174_s23 = sshll.u32 (!%p254_p3), %s1395_s18, 6 }
   0x7   : > { %257 = sbr.rel (%p254_p3) target bundleno = 319 (0x13f), region = 32  ;;  %p322_p4 = scmp.lt.s32.totalorder (!%p254_p3), %s1172_s22, 7 }
   0x8   : > { %p331_p5 = scmp.lt.s32.totalorder (!%p254_p3), %s1174_s23, 127  ;;  %p1177_p6 = scmp.ne.s32.totalorder (!%p254_p3), %s1395_s18, 0 }
   0xc   : > { %s1570_s22 = smov (!%p322_p4, %s1172_s22), 7  ;;  %s1572_s23 = smov (!%p331_p5, %s1174_s23), 127 }
   0xd   : > { %s1173_s24 = sshll.u32 %s1570_s22, 2  ;;  %s1256_s28 = sshll.u32 %s1572_s23, 3 }
   0xe   : > { %s1463_s27 = scalar_lea.vmem %s1559_s0, %s1173_s24  ;;  %s1468_s6 = scalar_lea.vmem %s1560_s1, %s1256_s28 }
   0xf   : > { %378 = sbr.rel (%p1177_p6) target bundleno = 22 (0x16), region = 36 }
  0x14   : > { %v1405_v0 = vmov 0.0  }
  0x15   : > { %379 = vst [vmem:[#allocation2] sm:$0xff] %v1405_v0  ;;  %380 = vst [vmem:[#allocation2 + $0x8] sm:$0xff] %v1405_v0 }
  0x16 PF: > { %v1285_v1 = vld [vmem:[%s1468_s6 + $0x74] ss:$8 sps:$4 sm:$0xff]   ;;  %v1289_v3 = vld [vmem:[%s1468_s6 + $0x70] ss:$8 sps:$4 sm:$0xff]   ;;  %v1291_v5 = vld [vmem:[%s1468_s6 + $0x64] ss:$8 sps:$4 sm:$0xff]  }
  0x17   : > { %v1287_v2 = vld [vmem:[%s1468_s6 + $0x174] ss:$8 sps:$4 sm:$0xff]   ;;  %785 = vmatprep.subr.bf16.mxu0 %v1285_v1  ;;  %v1290_v4 = vld [vmem:[%s1468_s6 + $0x170] ss:$8 sps:$4 sm:$0xff]   ;;  %v1293_v6 = vld [vmem:[%s1468_s6 + $0x164] ss:$8 sps:$4 sm:$0xff]  }
  0x18   : > { %826 = vmatprep.subr.bf16.mxu1 %v1287_v2  ;;  %786 = vmatpush1.bf16.msra.mxu0 %v1289_v3  ;;  %v1295_v7 = vld [vmem:[%s1468_s6 + $0x60] ss:$8 sps:$4 sm:$0xff]   ;;  %v1297_v9 = vld [vmem:[%s1468_s6 + $0x54] ss:$8 sps:$4 sm:$0xff]   ;;  %v1301_v11 = vld [vmem:[%s1468_s6 + $0x50] ss:$8 sps:$4 sm:$0xff]  }
  0x19   : > { %827 = vmatpush1.bf16.msra.mxu1 %v1290_v4  ;;  %787 = vmatprep.subr.bf16.mxu0 %v1291_v5  ;;  %v1296_v8 = vld [vmem:[%s1468_s6 + $0x160] ss:$8 sps:$4 sm:$0xff]   ;;  %v1299_v10 = vld [vmem:[%s1468_s6 + $0x154] ss:$8 sps:$4 sm:$0xff]   ;;  %v1302_v12 = vld [vmem:[%s1468_s6 + $0x150] ss:$8 sps:$4 sm:$0xff]  }
  0x1a   : > { %828 = vmatprep.subr.bf16.mxu1 %v1293_v6  ;;  %v1303_v13 = vld [vmem:[%s1468_s6 + $0x44] ss:$8 sps:$4 sm:$0xff]   ;;  %v1307_v15 = vld [vmem:[%s1468_s6 + $0x40] ss:$8 sps:$4 sm:$0xff]   ;;  %v1309_v17 = vld [vmem:[%s1468_s6 + $0x34] ss:$8 sps:$4 sm:$0xff]  }
  0x1b   : > { %v1305_v14 = vld [vmem:[%s1468_s6 + $0x144] ss:$8 sps:$4 sm:$0xff]   ;;  %v1308_v16 = vld [vmem:[%s1468_s6 + $0x140] ss:$8 sps:$4 sm:$0xff]   ;;  %v1311_v18 = vld [vmem:[%s1468_s6 + $0x134] ss:$8 sps:$4 sm:$0xff]  }
  0x1c   : > { %788 = vmatpush1.bf16.msra.mxu0 %v1295_v7  ;;  %v1313_v19 = vld [vmem:[%s1468_s6 + $0x30] ss:$8 sps:$4 sm:$0xff]   ;;  %v1315_v21 = vld [vmem:[%s1468_s6 + $0x24] ss:$8 sps:$4 sm:$0xff]   ;;  %v1319_v23 = vld [vmem:[%s1468_s6 + $0x20] ss:$8 sps:$4 sm:$0xff]  }
  0x1d   : > { %829 = vmatpush1.bf16.msra.mxu1 %v1296_v8  ;;  %789 = vmatprep.subr.bf16.mxu0 %v1297_v9  ;;  %v1314_v20 = vld [vmem:[%s1468_s6 + $0x130] ss:$8 sps:$4 sm:$0xff]   ;;  %v1317_v22 = vld [vmem:[%s1468_s6 + $0x124] ss:$8 sps:$4 sm:$0xff]   ;;  %v1320_v24 = vld [vmem:[%s1468_s6 + $0x120] ss:$8 sps:$4 sm:$0xff]  }
  0x1e   : > { %830 = vmatprep.subr.bf16.mxu1 %v1299_v10  ;;  %v1321_v25 = vld [vmem:[%s1468_s6 + $0x14] ss:$8 sps:$4 sm:$0xff]   ;;  %v1325_v27 = vld [vmem:[%s1468_s6 + $0x10] ss:$8 sps:$4 sm:$0xff]   ;;  %v1327_v29 = vld [vmem:[%s1468_s6 + $0x4] ss:$8 sps:$4 sm:$0xff]  }
  0x1f   : > { %v1323_v26 = vld [vmem:[%s1468_s6 + $0x114] ss:$8 sps:$4 sm:$0xff]   ;;  %v1326_v28 = vld [vmem:[%s1468_s6 + $0x110] ss:$8 sps:$4 sm:$0xff]   ;;  %v1329_v30 = vld [vmem:[%s1468_s6 + $0x104] ss:$8 sps:$4 sm:$0xff]  }
  0x20   : > { %790 = vmatpush1.bf16.msra.mxu0 %v1301_v11  ;;  %v1331_v31 = vld [vmem:[%s1468_s6] ss:$8 sps:$4 sm:$0xff]   ;;  %v1333_v33 = vld [vmem:[%s1468_s6 + $0xf4] ss:$8 sps:$4 sm:$0xff]   ;;  %v1337_v35 = vld [vmem:[%s1468_s6 + $0xf0] ss:$8 sps:$4 sm:$0xff]  }
  0x21   : > { %831 = vmatpush1.bf16.msra.mxu1 %v1302_v12  ;;  %791 = vmatprep.subr.bf16.mxu0 %v1303_v13  ;;  %v1332_v32 = vld [vmem:[%s1468_s6 + $0x100] ss:$8 sps:$4 sm:$0xff]   ;;  %v1335_v34 = vld [vmem:[%s1468_s6 + $0x1f4] ss:$8 sps:$4 sm:$0xff]   ;;  %v1338_v36 = vld [vmem:[%s1468_s6 + $0x1f0] ss:$8 sps:$4 sm:$0xff]  }
  0x22   : > { %832 = vmatprep.subr.bf16.mxu1 %v1305_v14  ;;  %v1339_v37 = vld [vmem:[%s1468_s6 + $0xe4] ss:$8 sps:$4 sm:$0xff]   ;;  %v1343_v39 = vld [vmem:[%s1468_s6 + $0xe0] ss:$8 sps:$4 sm:$0xff]   ;;  %v1345_v41 = vld [vmem:[%s1468_s6 + $0xd4] ss:$8 sps:$4 sm:$0xff]  }
  0x23   : > { %v1341_v38 = vld [vmem:[%s1468_s6 + $0x1e4] ss:$8 sps:$4 sm:$0xff]   ;;  %v1344_v40 = vld [vmem:[%s1468_s6 + $0x1e0] ss:$8 sps:$4 sm:$0xff]   ;;  %v1347_v42 = vld [vmem:[%s1468_s6 + $0x1d4] ss:$8 sps:$4 sm:$0xff]  }
  0x24   : > { %792 = vmatpush1.bf16.msra.mxu0 %v1307_v15  ;;  %v1349_v43 = vld [vmem:[%s1468_s6 + $0xd0] ss:$8 sps:$4 sm:$0xff]   ;;  %v1351_v45 = vld [vmem:[%s1468_s6 + $0xc4] ss:$8 sps:$4 sm:$0xff]   ;;  %v1406_v48 = vmov 0   ;;  %p1246_p7 = scmp.ne.s32.totalorder %s1395_s18, 1 }
  0x25   : > { %833 = vmatpush1.bf16.msra.mxu1 %v1308_v16  ;;  %793 = vmatprep.subr.bf16.mxu0 %v1309_v17  ;;  %v1350_v44 = vld [vmem:[%s1468_s6 + $0x1d0] ss:$8 sps:$4 sm:$0xff]   ;;  %v1353_v46 = vld [vmem:[%s1468_s6 + $0x1c4] ss:$8 sps:$4 sm:$0xff]   ;;  %v1355_v51 = vld [vmem:[%s1468_s6 + $0xc0] ss:$8 sps:$4 sm:$0xff]  }
  0x26   : > { %834 = vmatprep.subr.bf16.mxu1 %v1311_v18  ;;  %v381_v47 = vld [vmem:[%s1463_s27] sm:$0xff]  ;;  %v382_v50 = vld [vmem:[%s1463_s27 + $0x8] sm:$0xff]  ;;  %v1357_v54 = vld [vmem:[%s1468_s6 + $0xb4] ss:$8 sps:$4 sm:$0xff]  }
  0x27   : > { %v383_v49 = vmax.bf16 %v1406_v48, %v381_v47  ;;  %v1356_v52 = vld [vmem:[%s1468_s6 + $0x1c0] ss:$8 sps:$4 sm:$0xff]   ;;  %v384_v53 = vmax.bf16 %v1406_v48, %v382_v50  ;;  %v1359_v55 = vld [vmem:[%s1468_s6 + $0x1b4] ss:$8 sps:$4 sm:$0xff]   ;;  %v1361_v58 = vld [vmem:[%s1468_s6 + $0xb0] ss:$8 sps:$4 sm:$0xff]  }
  0x28   : > { %794 = vmatpush1.bf16.msra.mxu0 %v1313_v19  ;;  %v1362_v59 = vld [vmem:[%s1468_s6 + $0x1b0] ss:$8 sps:$4 sm:$0xff]   ;;  %v1363_v60 = vld [vmem:[%s1468_s6 + $0xa4] ss:$8 sps:$4 sm:$0xff]   ;;  %v1367_v62 = vld [vmem:[%s1468_s6 + $0xa0] ss:$8 sps:$4 sm:$0xff]  }
  0x29   : > { %835 = vmatpush1.bf16.msra.mxu1 %v1314_v20  ;;  %795 = vmatprep.subr.bf16.mxu0 %v1315_v21  ;;  %v1179_v56 = vcombine.high %v383_v49, %v383_v49  ;;  %v1181_v57 = vcombine.high %v384_v53, %v384_v53  ;;  %v1365_v61 = vld [vmem:[%s1468_s6 + $0x1a4] ss:$8 sps:$4 sm:$0xff]   ;;  %v1368_v63 = vld [vmem:[%s1468_s6 + $0x1a0] ss:$8 sps:$4 sm:$0xff]   ;;  %v1369_v0 = vld [vmem:[%s1468_s6 + $0x94] ss:$8 sps:$4 sm:$0xff]   ;;  %v1178_v8 = vcombine.low %v383_v49, %v383_v49 }
  0x2a   : > { %836 = vmatprep.subr.bf16.mxu1 %v1317_v22  ;;  %v1371_v1 = vld [vmem:[%s1468_s6 + $0x194] ss:$8 sps:$4 sm:$0xff]   ;;  %v1373_v2 = vld [vmem:[%s1468_s6 + $0x90] ss:$8 sps:$4 sm:$0xff]   ;;  %v1375_v4 = vld [vmem:[%s1468_s6 + $0x84] ss:$8 sps:$4 sm:$0xff]   ;;  %v1180_v9 = vcombine.low %v384_v53, %v384_v53 }
  0x2b   : > { %817 = vmatprep.mubr.bf16.mxu0 %v1179_v56  ;;  %858 = vmatprep.mubr.bf16.mxu1 %v1181_v57  ;;  %v1374_v3 = vld [vmem:[%s1468_s6 + $0x190] ss:$8 sps:$4 sm:$0xff]   ;;  %v1377_v5 = vld [vmem:[%s1468_s6 + $0x184] ss:$8 sps:$4 sm:$0xff]   ;;  %v1379_v6 = vld [vmem:[%s1468_s6 + $0x80] ss:$8 sps:$4 sm:$0xff]  }
  0x2c   : > { %796 = vmatpush1.bf16.msra.mxu0 %v1319_v23  ;;  %v1380_v7 = vld [vmem:[%s1468_s6 + $0x180] ss:$8 sps:$4 sm:$0xff]  }
  0x2d   : > { %837 = vmatpush1.bf16.msra.mxu1 %v1320_v24  ;;  %797 = vmatprep.subr.bf16.mxu0 %v1321_v25  ;;  %v385_v11 = vld [vmem:[#allocation2] sm:$0xff]  ;;  %v386_v15 = vld [vmem:[#allocation2 + $0x8] sm:$0xff] }
  0x2e   : > { %838 = vmatprep.subr.bf16.mxu1 %v1323_v26 }
  0x30   : > { %798 = vmatpush1.bf16.msra.mxu0 %v1325_v27 }
  0x31   : > { %839 = vmatpush1.bf16.msra.mxu1 %v1326_v28  ;;  %799 = vmatprep.subr.bf16.mxu0 %v1327_v29 }
  0x32   : > { %840 = vmatprep.subr.bf16.mxu1 %v1329_v30 }
  0x34   : > { %800 = vmatpush1.bf16.msra.mxu0 %v1331_v31 }
  0x35   : > { %841 = vmatpush1.bf16.msra.mxu1 %v1332_v32  ;;  %801 = vmatprep.subr.bf16.mxu0 %v1333_v33 }
  0x36   : > { %842 = vmatprep.subr.bf16.mxu1 %v1335_v34 }
  0x38   : > { %802 = vmatpush2.bf16.msra.mxu0 %v1337_v35 }
  0x39   : > { %843 = vmatpush2.bf16.msra.mxu1 %v1338_v36  ;;  %803 = vmatprep.subr.bf16.mxu0 %v1339_v37 }
  0x3a   : > { %844 = vmatprep.subr.bf16.mxu1 %v1341_v38 }
  0x3c   : > { %804 = vmatpush2.bf16.msra.mxu0 %v1343_v39 }
  0x3d   : > { %845 = vmatpush2.bf16.msra.mxu1 %v1344_v40  ;;  %805 = vmatprep.subr.bf16.mxu0 %v1345_v41 }
  0x3e   : > { %846 = vmatprep.subr.bf16.mxu1 %v1347_v42 }
  0x40   : > { %806 = vmatpush2.bf16.msra.mxu0 %v1349_v43 }
  0x41   : > { %847 = vmatpush2.bf16.msra.mxu1 %v1350_v44  ;;  %807 = vmatprep.subr.bf16.mxu0 %v1351_v45 }
  0x42   : > { %848 = vmatprep.subr.bf16.mxu1 %v1353_v46 }
  0x44   : > { %808 = vmatpush2.bf16.msra.mxu0 %v1355_v51 }
  0x45   : > { %849 = vmatpush2.bf16.msra.mxu1 %v1356_v52  ;;  %809 = vmatprep.subr.bf16.mxu0 %v1357_v54 }
  0x46   : > { %850 = vmatprep.subr.bf16.mxu1 %v1359_v55 }
  0x48   : > { %810 = vmatpush2.bf16.msra.mxu0 %v1361_v58 }
  0x49   : > { %851 = vmatpush2.bf16.msra.mxu1 %v1362_v59  ;;  %811 = vmatprep.subr.bf16.mxu0 %v1363_v60 }
  0x4a   : > { %852 = vmatprep.subr.bf16.mxu1 %v1365_v61 }
  0x4c   : > { %812 = vmatpush2.bf16.msra.mxu0 %v1367_v62 }
  0x4d   : > { %853 = vmatpush2.bf16.msra.mxu1 %v1368_v63  ;;  %813 = vmatprep.subr.bf16.mxu0 %v1369_v0 }
  0x4e   : > { %854 = vmatprep.subr.bf16.mxu1 %v1371_v1 }
  0x50   : > { %814 = vmatpush2.bf16.msra.mxu0 %v1373_v2 }
  0x51   : > { %855 = vmatpush2.bf16.msra.mxu1 %v1374_v3  ;;  %815 = vmatprep.subr.bf16.mxu0 %v1375_v4 }
  0x52   : > { %856 = vmatprep.subr.bf16.mxu1 %v1377_v5 }
  0x54   : > { %816 = vmatpush2.bf16.msra.mxu0 %v1379_v6 }
  0x55   : > { %857 = vmatpush2.bf16.msra.mxu1 %v1380_v7 }
  0x57   : > { %818 = vmatmul.mubr.bf16.vlgmr.msra.gmra.mxu0 %v1178_v8 }
  0x58   : > { %859 = vmatmul.mubr.bf16.vlgmr.msra.gmra.mxu1 %v1180_v9 }
 0x117   : > { %v819_v10 = vpop.f32.mrf.mxu0 }
 0x118   : > { %v860_v12 = vpop.f32.mrf.mxu1 }
 0x119   : > { %v861_v13 = vadd.f32 %v860_v12, %v819_v10  ;;  %v821_v14 = vpop.f32.mrf.mxu0 }
 0x11a   : > { %v862_v16 = vpop.f32.mrf.mxu1 }
 0x11b   : > { %v867_v17 = vadd.f32 %v861_v13, %v385_v11  ;;  %v863_v18 = vadd.f32 %v862_v16, %v821_v14  ;;  %v823_v19 = vpop.f32.mrf.mxu0  ;;  %874 = sbr.rel (%p1246_p7) target bundleno = 319 (0x13f), region = 40 }
 0x11c   : > { %v864_v20 = vpop.f32.mrf.mxu1 }
 0x11d   : > { %869 = vst [vmem:[#allocation2] sm:$0xff] %v867_v17  ;;  %v868_v21 = vadd.f32 %v863_v18, %v386_v15  ;;  %v824_v22 = vpop.f32.mrf.mxu0 }
 0x11e   : > { %v865_v23 = vpop.f32.mrf.mxu1 }
 0x11f   : > { %870 = vst [vmem:[#allocation2 + $0x8] sm:$0xff] %v868_v21 }
 0x120   : > { %v879_v24 = vlaneseq  ;;  %v877_v26 = vld [vmem:[%s1561_s2] sm:$0x3]  ;;  %v1407_v39 = vmov 1966171168  }
 0x121   : > { %v907_v40 = vunpack.c.l.s4 %v1407_v39 }
 0x122   : > { %v880_v25 = vshrl.u32 %v879_v24, 7  ;;  %vm923_vm0 = vcmp.lt.s32.totalorder %v879_v24, 256 }
 0x123   : > { %v908_v50 = vunpack.c.0.s8 %v907_v40 }
 0x124   : > { %v881_v27 = vsub.s32 0, %v880_v25  ;;  %v885_v28 = vsub.s32 1, %v880_v25  ;;  %v875_v29 = vld [vmem:[#allocation2] sm:$0xff] }
 0x125   : > { %v911_v59 = vsub.s32 %v908_v50, %v880_v25 }
 0x126   : > { %v876_v30 = vld [vmem:[#allocation2 + $0x8] sm:$0xff]  ;;  %v882_v31 = vrot.slane %v877_v26, %v881_v27  ;;  %v886_v32 = vrot.slane %v877_v26, %v885_v28 }
 0x128   : > { %v889_v33 = vadd.f32 %v882_v31, %v875_v29  ;;  %v890_v34 = vadd.f32 %v886_v32, %v876_v30 }
 0x12a   : > { %v891_v35 = vrot.slane %v889_v33, 4  ;;  %v897_v36 = vrot.slane %v890_v34, 4  ;;  %v926_v37 = vmul.f32 %v889_v33, %v889_v33  ;;  %v927_v38 = vmul.f32 %v890_v34, %v890_v34 }
 0x12b   : > { %v1257_v41 = vpack.c.bf16 %v890_v34, %v889_v33 }
 0x12c   : > { %v892_v42 = vadd.f32 %v891_v35, %v889_v33  ;;  %v898_v43 = vadd.f32 %v897_v36, %v890_v34  ;;  %v928_v44 = vrot.slane %v926_v37, 4  ;;  %v934_v45 = vrot.slane %v927_v38, 4 }
 0x12d   : > { %967 = vst [vmem:[%s1562_s3] sm:$0xff] %v1257_v41 }
 0x12e   : > { %v893_v46 = vrot.slane %v892_v42, 2  ;;  %v899_v47 = vrot.slane %v898_v43, 2  ;;  %v929_v48 = vadd.f32 %v928_v44, %v926_v37  ;;  %v935_v49 = vadd.f32 %v934_v45, %v927_v38 }
 0x130   : > { %v894_v51 = vadd.f32 %v893_v46, %v892_v42  ;;  %v900_v52 = vadd.f32 %v899_v47, %v898_v43  ;;  %v930_v53 = vrot.slane %v929_v48, 2  ;;  %v936_v54 = vrot.slane %v935_v49, 2 }
 0x132   : > { %v895_v55 = vrot.slane %v894_v51, 1  ;;  %v901_v56 = vrot.slane %v900_v52, 1  ;;  %v931_v57 = vadd.f32 %v930_v53, %v929_v48  ;;  %v937_v58 = vadd.f32 %v936_v54, %v935_v49 }
 0x134   : > { %v896_v60 = vadd.f32 %v895_v55, %v894_v51  ;;  %v902_v61 = vadd.f32 %v901_v56, %v900_v52  ;;  %v932_v62 = vrot.slane %v931_v57, 1  ;;  %v938_v63 = vrot.slane %v937_v58, 1 }
 0x136   : > { %v905_v0 = vcombine.low %v896_v60, %v902_v61  ;;  %v933_v1 = vadd.f32 %v932_v62, %v931_v57  ;;  %v939_v2 = vadd.f32 %v938_v63, %v937_v58 }
 0x138   : > { %v912_v3 = vrot.slane %v905_v0, %v911_v59  ;;  %v942_v4 = vcombine.low %v933_v1, %v939_v2 }
 0x13a   : > { %v919_v5 = vrot.slane %v912_v3, %v911_v59  ;;  %v949_v6 = vrot.slane %v942_v4, %v911_v59 }
 0x13c   : > { %925 = vst.msk [vmem:[%s1563_s4] sm:$0x3] %vm923_vm0, %v919_v5  ;;  %v956_v7 = vrot.slane %v949_v6, %v911_v59 }
 0x13e   : > { %958 = vst.msk [vmem:[%s1564_s5] sm:$0x3] %vm923_vm0, %v956_v7 }
 0x13f PF: > { %s16_s20 = sadd.s32 1, %s1403_s20   ;;  %s1565_s18 = smov %s1399_s19 }
 0x140   : > { %p13_p8 = scmp.ge.s32.totalorder %s16_s20, 4   ;;  %s1566_s19 = smov %s1568_s21 }
 0x142   :  { %15 = sbr.rel (!%p13_p8) target bundleno = 2 (0x2), region = 100 }

// kernel: fwd.16
= control target key start
LH: loop header
LB: loop body
LE: loop exit
PB: predicated region body
PF: predicated region fallthrough
CT: control target
= control target key end

     0   :  { %s1119_s18 = smov 0   ;;  %s1121_s19 = smov 0   ;;  %s1208_s0 = inlined_call_operand.vmem [shape: bf16[8,1536], index: 0, kind: input, shape index: {}]   ;;  %s1209_s1 = inlined_call_operand.vmem [shape: bf16[1536,128], index: 1, kind: input, shape index: {}]   ;;  %s1210_s2 = inlined_call_operand.vmem [shape: f32[1,128], index: 2, kind: input, shape index: {}]   ;;  %s1211_s3 = inlined_call_operand.vmem [shape: bf16[8,128], index: 3, kind: output, shape index: {0}]   ;;  %s1212_s4 = inlined_call_operand.vmem [shape: f32[1,1,128], index: 4, kind: output, shape index: {1}]   ;;  %s1213_s5 = inlined_call_operand.vmem [shape: f32[1,1,128], index: 5, kind: output, shape index: {2}]  }
   0x1   :  { %s1123_s20 = smov 0  }
   0x2 LB: > { %s28_s21 = sadd.s32 1, %s1081_s19  ;;  %p912_p0 = scmp.ge.s32.totalorder %s1085_s20, 1  ;;  %s1085_s20 = sphi %s1123_s20, %s16_s20   ;;  %s1081_s19 = sphi %s1121_s19, %s1215_s19   ;;  %s1077_s18 = sphi %s1119_s18, %s1214_s18  }
   0x3   : > { %p29_p1 = scmp.ge.s32.totalorder %s28_s21, 3  ;;  %p248_p2 = scmp.lt.s32.totalorder %s1085_s20, 4 }
   0x5   : > { %s1217_s21 = smov (%p29_p1, %s28_s21), 0  ;;  %p249_p3 = pnand %p912_p0, %p248_p2 }
   0x6   : > { %s913_s22 = sshll.u32 (!%p249_p3), %s1077_s18, 2  ;;  %s915_s23 = sshll.u32 (!%p249_p3), %s1077_s18, 6 }
   0x7   : > { %252 = sbr.rel (%p249_p3) target bundleno = 283 (0x11b), region = 32  ;;  %p308_p4 = scmp.lt.s32.totalorder (!%p249_p3), %s913_s22, 11 }
   0x8   : > { %p316_p5 = scmp.lt.s32.totalorder (!%p249_p3), %s915_s23, 191  ;;  %p917_p6 = scmp.ne.s32.totalorder (!%p249_p3), %s1077_s18, 0 }
   0xc   : > { %s1219_s22 = smov (!%p308_p4, %s913_s22), 11  ;;  %s1221_s23 = smov (!%p316_p5, %s915_s23), 191 }
   0xd   : > { %s914_s24 = sshll.u32 %s1219_s22, 2  ;;  %s916_s28 = sshll.u32 %s1221_s23, 2 }
   0xe   : > { %s1144_s27 = scalar_lea.vmem %s1208_s0, %s914_s24  ;;  %s1149_s6 = scalar_lea.vmem %s1209_s1, %s916_s28 }
   0xf   : > { %350 = sbr.rel (%p917_p6) target bundleno = 22 (0x16), region = 36 }
  0x14   : > { %v1087_v0 = vmov 0.0  }
  0x15   : > { %351 = vst [vmem:[#allocation2] sm:$0xff] %v1087_v0 }
  0x16 PF: > { %v1031_v1 = vld [vmem:[%s1149_s6 + $0x78] sm:$0xff]   ;;  %v1035_v5 = vld [vmem:[%s1149_s6 + $0x70] sm:$0xff]   ;;  %v1039_v9 = vld [vmem:[%s1149_s6 + $0x68] sm:$0xff]   ;;  %v1088_v35 = vmov 0   ;;  %p954_p7 = scmp.ne.s32.totalorder %s1077_s18, 2 }
  0x17   : > { %v1032_v2 = vld [vmem:[%s1149_s6 + $0xf8] sm:$0xff]   ;;  %961 = vmatprep.subr.bf16.mxu0 %v1031_v1  ;;  %v1036_v6 = vld [vmem:[%s1149_s6 + $0xf0] sm:$0xff]   ;;  %v1040_v10 = vld [vmem:[%s1149_s6 + $0xe8] sm:$0xff]  }
  0x18   : > { %v1033_v3 = vld [vmem:[%s1149_s6 + $0x38] sm:$0xff]   ;;  %983 = vmatprep.subr.bf16.mxu1 %v1032_v2  ;;  %v1037_v7 = vld [vmem:[%s1149_s6 + $0x30] sm:$0xff]   ;;  %v1041_v11 = vld [vmem:[%s1149_s6 + $0x28] sm:$0xff]  }
  0x19   : > { %v1034_v4 = vld [vmem:[%s1149_s6 + $0xb8] sm:$0xff]   ;;  %962 = vmatpush3.bf16.msra.mxu0 %v1033_v3  ;;  %v1038_v8 = vld [vmem:[%s1149_s6 + $0xb0] sm:$0xff]   ;;  %v1042_v12 = vld [vmem:[%s1149_s6 + $0xa8] sm:$0xff]  }
  0x1a   : > { %984 = vmatpush3.bf16.msra.mxu1 %v1034_v4  ;;  %963 = vmatprep.subr.bf16.mxu0 %v1035_v5  ;;  %v1043_v13 = vld [vmem:[%s1149_s6 + $0x60] sm:$0xff]   ;;  %v1047_v17 = vld [vmem:[%s1149_s6 + $0x58] sm:$0xff]   ;;  %v1051_v21 = vld [vmem:[%s1149_s6 + $0x50] sm:$0xff]  }
  0x1b   : > { %985 = vmatprep.subr.bf16.mxu1 %v1036_v6  ;;  %v1044_v14 = vld [vmem:[%s1149_s6 + $0xe0] sm:$0xff]   ;;  %v1048_v18 = vld [vmem:[%s1149_s6 + $0xd8] sm:$0xff]   ;;  %v1052_v22 = vld [vmem:[%s1149_s6 + $0xd0] sm:$0xff]  }
  0x1c   : > { %v1045_v15 = vld [vmem:[%s1149_s6 + $0x20] sm:$0xff]   ;;  %v1049_v19 = vld [vmem:[%s1149_s6 + $0x18] sm:$0xff]   ;;  %v1053_v23 = vld [vmem:[%s1149_s6 + $0x10] sm:$0xff]  }
  0x1d   : > { %964 = vmatpush3.bf16.msra.mxu0 %v1037_v7  ;;  %v1046_v16 = vld [vmem:[%s1149_s6 + $0xa0] sm:$0xff]   ;;  %v1050_v20 = vld [vmem:[%s1149_s6 + $0x98] sm:$0xff]   ;;  %v1054_v24 = vld [vmem:[%s1149_s6 + $0x90] sm:$0xff]  }
  0x1e   : > { %986 = vmatpush3.bf16.msra.mxu1 %v1038_v8  ;;  %965 = vmatprep.subr.bf16.mxu0 %v1039_v9  ;;  %v1055_v25 = vld [vmem:[%s1149_s6 + $0x48] sm:$0xff]   ;;  %v1059_v29 = vld [vmem:[%s1149_s6 + $0x40] sm:$0xff]  }
  0x1f   : > { %987 = vmatprep.subr.bf16.mxu1 %v1040_v10  ;;  %v1056_v26 = vld [vmem:[%s1149_s6 + $0xc8] sm:$0xff]   ;;  %v1060_v30 = vld [vmem:[%s1149_s6 + $0xc0] sm:$0xff]  }
  0x20   : > { %v1057_v27 = vld [vmem:[%s1149_s6 + $0x8] sm:$0xff]   ;;  %v1061_v31 = vld [vmem:[%s1149_s6] sm:$0xff]  }
  0x21   : > { %966 = vmatpush3.bf16.msra.mxu0 %v1041_v11  ;;  %v1058_v28 = vld [vmem:[%s1149_s6 + $0x88] sm:$0xff]   ;;  %v1062_v32 = vld [vmem:[%s1149_s6 + $0x80] sm:$0xff]  }
  0x22   : > { %988 = vmatpush3.bf16.msra.mxu1 %v1042_v12  ;;  %967 = vmatprep.subr.bf16.mxu0 %v1043_v13  ;;  %v352_v33 = vld [vmem:[%s1144_s27] sm:$0xff]  ;;  %v353_v34 = vld [vmem:[%s1144_s27 + $0x8] sm:$0xff] }
  0x23   : > { %989 = vmatprep.subr.bf16.mxu1 %v1044_v14  ;;  %v354_v36 = vmax.bf16 %v1088_v35, %v352_v33  ;;  %v355_v37 = vmax.bf16 %v1088_v35, %v353_v34  ;;  %v356_v48 = vld [vmem:[#allocation2] sm:$0xff] }
  0x25   : > { %968 = vmatpush3.bf16.msra.mxu0 %v1045_v15  ;;  %v919_v38 = vcombine.high %v354_v36, %v354_v36  ;;  %v921_v39 = vcombine.high %v355_v37, %v355_v37  ;;  %v918_v40 = vcombine.low %v354_v36, %v354_v36  ;;  %v920_v41 = vcombine.low %v355_v37, %v355_v37 }
  0x26   : > { %990 = vmatpush3.bf16.msra.mxu1 %v1046_v16  ;;  %969 = vmatprep.subr.bf16.mxu0 %v1047_v17 }
  0x27   : > { %991 = vmatprep.subr.bf16.mxu1 %v1048_v18  ;;  %659 = vmatprep.mubr.bf16.mxu0 %v919_v38 }
  0x28   : > { %699 = vmatprep.mubr.bf16.mxu1 %v921_v39 }
  0x29   : > { %970 = vmatpush3.bf16.msra.mxu0 %v1049_v19 }
  0x2a   : > { %992 = vmatpush3.bf16.msra.mxu1 %v1050_v20  ;;  %971 = vmatprep.subr.bf16.mxu0 %v1051_v21 }
  0x2b   : > { %993 = vmatprep.subr.bf16.mxu1 %v1052_v22 }
  0x2d   : > { %972 = vmatpush3.bf16.msra.mxu0 %v1053_v23 }
  0x2e   : > { %994 = vmatpush3.bf16.msra.mxu1 %v1054_v24  ;;  %973 = vmatprep.subr.bf16.mxu0 %v1055_v25 }
  0x2f   : > { %995 = vmatprep.subr.bf16.mxu1 %v1056_v26 }
  0x31   : > { %974 = vmatpush3.bf16.msra.mxu0 %v1057_v27 }
  0x32   : > { %996 = vmatpush3.bf16.msra.mxu1 %v1058_v28  ;;  %975 = vmatprep.subr.bf16.mxu0 %v1059_v29 }
  0x33   : > { %997 = vmatprep.subr.bf16.mxu1 %v1060_v30 }
  0x35   : > { %976 = vmatpush3.bf16.msra.mxu0 %v1061_v31 }
  0x36   : > { %998 = vmatpush3.bf16.msra.mxu1 %v1062_v32 }
  0x38   : > { %660 = vmatmul.mubr.bf16.vlgmr.msra.gmra.mxu0 %v918_v40 }
  0x39   : > { %700 = vmatmul.mubr.bf16.vlgmr.msra.gmra.mxu1 %v920_v41 }
  0xf8   : > { %v977_v42 = vpop.f32.mrf.mxu0 }
  0xf9   : > { %v999_v43 = vpop.f32.mrf.mxu1 }
  0xfa   : > { %v978_v44 = vpop.f32.mrf.mxu0 }
  0xfb   : > { %v1000_v45 = vpop.f32.mrf.mxu1  ;;  %v979_v46 = vadd.f32 %v978_v44, %v977_v42 }
  0xfc   : > { %v1001_v47 = vadd.f32 %v1000_v45, %v999_v43  ;;  %v980_v49 = vpop.f32.mrf.mxu0 }
  0xfd   : > { %v1002_v50 = vpop.f32.mrf.mxu1 }
  0xfe   : > { %v702_v51 = vadd.f32 %v1001_v47, %v979_v46  ;;  %v981_v52 = vpop.f32.mrf.mxu0  ;;  %712 = sbr.rel (%p954_p7) target bundleno = 283 (0x11b), region = 40 }
  0xff   : > { %v1003_v53 = vpop.f32.mrf.mxu1 }
 0x100   : > { %v707_v54 = vadd.f32 %v702_v51, %v356_v48 }
 0x102   : > { %708 = vst [vmem:[#allocation2] sm:$0xff] %v707_v54 }
 0x103   : > { %v955_v56 = vld [vmem:[%s1210_s2] ss:$0 sm:$0xff] }
 0x109   : > { %v713_v55 = vld [vmem:[#allocation2] sm:$0xff] }
 0x10a   : > { %v721_v57 = vadd.f32 %v955_v56, %v713_v55 }
 0x10c   : > { %v722_v58 = vrot.slane %v721_v57, 4  ;;  %v729_v59 = vmul.f32 %v721_v57, %v721_v57  ;;  %v737_v60 = vpack.c.bf16 %v721_v57, %v721_v57 }
 0x10e   : > { %v723_v61 = vadd.f32 %v722_v58, %v721_v57  ;;  %v730_v62 = vrot.slane %v729_v59, 4  ;;  %738 = vst [vmem:[%s1211_s3] sm:$0xf] %v737_v60 }
 0x110   : > { %v724_v63 = vrot.slane %v723_v61, 2  ;;  %v731_v0 = vadd.f32 %v730_v62, %v729_v59 }
 0x112   : > { %v725_v1 = vadd.f32 %v724_v63, %v723_v61  ;;  %v732_v2 = vrot.slane %v731_v0, 2 }
 0x114   : > { %v726_v3 = vrot.slane %v725_v1, 1  ;;  %v733_v4 = vadd.f32 %v732_v2, %v731_v0 }
 0x116   : > { %v727_v5 = vadd.f32 %v726_v3, %v725_v1  ;;  %v734_v6 = vrot.slane %v733_v4, 1 }
 0x118   : > { %728 = vst [vmem:[%s1212_s4] sm:$0x1] %v727_v5  ;;  %v735_v7 = vadd.f32 %v734_v6, %v733_v4 }
 0x11a   : > { %736 = vst [vmem:[%s1213_s5] sm:$0x1] %v735_v7 }
 0x11b PF: > { %s16_s20 = sadd.s32 1, %s1085_s20   ;;  %s1214_s18 = smov %s1081_s19 }
 0x11c   : > { %p13_p8 = scmp.ge.s32.totalorder %s16_s20, 5   ;;  %s1215_s19 = smov %s1217_s21 }
 0x11e   :  { %15 = sbr.rel (!%p13_p8) target bundleno = 2 (0x2), region = 100 }

// kernel: fwd.17
= control target key start
LH: loop header
LB: loop body
LE: loop exit
PB: predicated region body
PF: predicated region fallthrough
CT: control target
= control target key end

     0   :  { %s1325_s18 = smov 0   ;;  %s1327_s19 = smov 0   ;;  %s1451_s0 = inlined_call_operand.vmem [shape: bf16[32,1024], index: 0, kind: input, shape index: {}]   ;;  %s1452_s1 = inlined_call_operand.vmem [shape: bf16[1024,128], index: 1, kind: input, shape index: {}]   ;;  %s1453_s2 = inlined_call_operand.vmem [shape: f32[1,128], index: 2, kind: input, shape index: {}]   ;;  %s1454_s3 = inlined_call_operand.vmem [shape: bf16[32,128], index: 3, kind: output, shape index: {0}]   ;;  %s1455_s4 = inlined_call_operand.vmem [shape: f32[1,1,128], index: 4, kind: output, shape index: {1}]   ;;  %s1456_s5 = inlined_call_operand.vmem [shape: f32[1,1,128], index: 5, kind: output, shape index: {2}]  }
   0x1   :  { %s1329_s20 = smov 0   ;;  %s1331_s21 = smov 0  }
   0x2   :  { %s1333_s22 = smov 0  }
   0x3 LB: > { %s28_s23 = sadd.s32 1, %s1287_s21  ;;  %p51_p1 = scmp.ne.s32.totalorder %s1279_s19, %s1275_s18  ;;  %s1291_s22 = sphi %s1333_s22, %s16_s22   ;;  %s1287_s21 = sphi %s1331_s21, %s1460_s21   ;;  %s1283_s20 = sphi %s1329_s20, %s1459_s20   ;;  %s1279_s19 = sphi %s1327_s19, %s1458_s19   ;;  %s1275_s18 = sphi %s1325_s18, %s1457_s18  }
   0x4   : > { %p29_p0 = scmp.ge.s32.totalorder %s28_s23, 2  ;;  %p52_p2 = scmp.eq.s32.totalorder %s1291_s22, 0 }
   0x5   : > { %s44_s25 = sadd.s32 1, %s1279_s19  ;;  %p1046_p5 = scmp.ge.s32.totalorder %s1291_s22, 2 }
   0x6   : > { %s1462_s23 = smov (%p29_p0, %s28_s23), 0  ;;  %p53_p3 = por %p52_p2, %p51_p1 }
   0x7   : > { %s40_s24 = ssub.s32 %s1287_s21, %s1462_s23  ;;  %221 = sbr.rel (%p1046_p5) target bundleno = 20 (0x14), region = 20 }
   0x8   : > { %p42_p4 = scmp.eq.s32.totalorder %s40_s24, 0 }
   0xa   : > { %s1360_s26 = scalar_select %p42_p4, %s1279_s19, %s44_s25  }
   0xc   : > { %224 = sbr.rel (!%p53_p3) target bundleno = 20 (0x14), region = 24  ;;  %s226_s27 = sand.u32 (%p53_p3), 1, %s1279_s19  }
   0xd   : > { %s1107_s28 = sshll.u32 (%p53_p3), %s1287_s21, 4  ;;  %s1047_s29 = sshll.u32 (%p53_p3), %s226_s27, 6 }
   0xe   : > { %s234_s7 = scalar_lea.vmem (%p53_p3), %s1451_s0, %s1107_s28  ;;  %s228_s8 = scalar_lea.vmem (%p53_p3), [#allocation3], %s1047_s29 }
   0xf   : > { %v247_v0 = vld [vmem:[%s234_s7] sm:$0xff] (%p53_p3)  ;;  %v249_v1 = vld [vmem:[%s234_s7 + $0x8] sm:$0xff] (%p53_p3) }
  0x10   : > { %v251_v2 = vld [vmem:[%s234_s7 + $0x20] sm:$0xff] (%p53_p3)  ;;  %248 = vst [vmem:[%s228_s8] sm:$0xff] (%p53_p3), %v247_v0  ;;  %250 = vst [vmem:[%s228_s8 + $0x8] sm:$0xff] (%p53_p3), %v249_v1  ;;  %v253_v3 = vld [vmem:[%s234_s7 + $0x28] sm:$0xff] (%p53_p3) }
  0x11   : > { %252 = vst [vmem:[%s228_s8 + $0x10] sm:$0xff] %v251_v2  ;;  %v255_v4 = vld [vmem:[%s234_s7 + $0x40] sm:$0xff]  ;;  %v257_v5 = vld [vmem:[%s234_s7 + $0x48] sm:$0xff]  ;;  %254 = vst [vmem:[%s228_s8 + $0x18] sm:$0xff] %v253_v3 }
  0x12   : > { %256 = vst [vmem:[%s228_s8 + $0x20] sm:$0xff] %v255_v4  ;;  %258 = vst [vmem:[%s228_s8 + $0x28] sm:$0xff] %v257_v5  ;;  %v259_v6 = vld [vmem:[%s234_s7 + $0x60] sm:$0xff]  ;;  %v261_v7 = vld [vmem:[%s234_s7 + $0x68] sm:$0xff] }
  0x13   : > { %260 = vst [vmem:[%s228_s8 + $0x30] sm:$0xff] %v259_v6  ;;  %262 = vst [vmem:[%s228_s8 + $0x38] sm:$0xff] %v261_v7 }
  0x14 PF: > { %p1050_p6 = scmp.ge.s32.totalorder %s1291_s22, 1  ;;  %p279_p7 = scmp.lt.s32.totalorder %s1291_s22, 3 }
  0x16   : > { %p280_p8 = pnand %p1050_p6, %p279_p7 }
  0x17   : > { %s286_s9 = sand.u32 (!%p280_p8), 1, %s1275_s18   ;;  %s1052_s10 = sshll.u32 (!%p280_p8), %s1283_s20, 6 }
  0x18   : > { %283 = sbr.rel (%p280_p8) target bundleno = 312 (0x138), region = 51  ;;  %s1051_s11 = sshll.u32 (!%p280_p8), %s286_s9, 6 }
  0x19   : > { %p342_p9 = scmp.lt.s32.totalorder (!%p280_p8), %s1052_s10, 127  ;;  %s1377_s16 = scalar_lea.vmem (!%p280_p8), [#allocation3], %s1051_s11 }
  0x1a   : > { %p1054_p10 = scmp.ne.s32.totalorder (!%p280_p8), %s1283_s20, 0 }
  0x1d   : > { %s1464_s10 = smov (!%p342_p9, %s1052_s10), 127  ;;  %378 = sbr.rel (%p1054_p10) target bundleno = 37 (0x25), region = 59 }
  0x1e   : > { %s1053_s12 = sshll.u32 %s1464_s10, 2 }
  0x1f   : > { %s1375_s15 = scalar_lea.vmem %s1452_s1, %s1053_s12 }
  0x22   : > { %v1293_v8 = vmov 0.0  }
  0x23   : > { %379 = vst [vmem:[#allocation2 + $0x10] sm:$0xff] %v1293_v8  ;;  %380 = vst [vmem:[#allocation2] sm:$0xff] %v1293_v8 }
  0x24   : > { %381 = vst [vmem:[#allocation2 + $0x18] sm:$0xff] %v1293_v8  ;;  %382 = vst [vmem:[#allocation2 + $0x8] sm:$0xff] %v1293_v8 }
  0x25 PF: > { %v1221_v9 = vld [vmem:[%s1375_s15 + $0x78] sm:$0xff]   ;;  %v1225_v13 = vld [vmem:[%s1375_s15 + $0x70] sm:$0xff]   ;;  %v1229_v17 = vld [vmem:[%s1375_s15 + $0x68] sm:$0xff]   ;;  %v1294_v44 = vmov 0   ;;  %p1095_p11 = scmp.ne.s32.totalorder %s1283_s20, 1 }
  0x26   : > { %v1222_v10 = vld [vmem:[%s1375_s15 + $0xf8] sm:$0xff]   ;;  %1123 = vmatprep.subr.bf16.mxu0 %v1221_v9  ;;  %v1226_v14 = vld [vmem:[%s1375_s15 + $0xf0] sm:$0xff]   ;;  %v1230_v18 = vld [vmem:[%s1375_s15 + $0xe8] sm:$0xff]  }
  0x27   : > { %v1223_v11 = vld [vmem:[%s1375_s15 + $0x38] sm:$0xff]   ;;  %1151 = vmatprep.subr.bf16.mxu1 %v1222_v10  ;;  %v1227_v15 = vld [vmem:[%s1375_s15 + $0x30] sm:$0xff]   ;;  %v1231_v19 = vld [vmem:[%s1375_s15 + $0x28] sm:$0xff]  }
  0x28   : > { %v1224_v12 = vld [vmem:[%s1375_s15 + $0xb8] sm:$0xff]   ;;  %1124 = vmatpush3.bf16.msra.mxu0 %v1223_v11  ;;  %v1228_v16 = vld [vmem:[%s1375_s15 + $0xb0] sm:$0xff]   ;;  %v1232_v20 = vld [vmem:[%s1375_s15 + $0xa8] sm:$0xff]  }
  0x29   : > { %1152 = vmatpush3.bf16.msra.mxu1 %v1224_v12  ;;  %1125 = vmatprep.subr.bf16.mxu0 %v1225_v13  ;;  %v1233_v21 = vld [vmem:[%s1375_s15 + $0x60] sm:$0xff]   ;;  %v1237_v25 = vld [vmem:[%s1375_s15 + $0x58] sm:$0xff]   ;;  %v1241_v29 = vld [vmem:[%s1375_s15 + $0x50] sm:$0xff]  }
  0x2a   : > { %1153 = vmatprep.subr.bf16.mxu1 %v1226_v14  ;;  %v1234_v22 = vld [vmem:[%s1375_s15 + $0xe0] sm:$0xff]   ;;  %v1238_v26 = vld [vmem:[%s1375_s15 + $0xd8] sm:$0xff]   ;;  %v1242_v30 = vld [vmem:[%s1375_s15 + $0xd0] sm:$0xff]  }
  0x2b   : > { %v1235_v23 = vld [vmem:[%s1375_s15 + $0x20] sm:$0xff]   ;;  %v1239_v27 = vld [vmem:[%s1375_s15 + $0x18] sm:$0xff]   ;;  %v1243_v31 = vld [vmem:[%s1375_s15 + $0x10] sm:$0xff]  }
  0x2c   : > { %1126 = vmatpush3.bf16.msra.mxu0 %v1227_v15  ;;  %v1236_v24 = vld [vmem:[%s1375_s15 + $0xa0] sm:$0xff]   ;;  %v1240_v28 = vld [vmem:[%s1375_s15 + $0x98] sm:$0xff]   ;;  %v1244_v32 = vld [vmem:[%s1375_s15 + $0x90] sm:$0xff]  }
  0x2d   : > { %1154 = vmatpush3.bf16.msra.mxu1 %v1228_v16  ;;  %1127 = vmatprep.subr.bf16.mxu0 %v1229_v17  ;;  %v1245_v33 = vld [vmem:[%s1375_s15 + $0x48] sm:$0xff]   ;;  %v1249_v37 = vld [vmem:[%s1375_s15 + $0x40] sm:$0xff]   ;;  %v385_v42 = vld [vmem:[%s1377_s16 + $0x10] sm:$0xff] }
  0x2e   : > { %1155 = vmatprep.subr.bf16.mxu1 %v1230_v18  ;;  %v1246_v34 = vld [vmem:[%s1375_s15 + $0xc8] sm:$0xff]   ;;  %v1250_v38 = vld [vmem:[%s1375_s15 + $0xc0] sm:$0xff]   ;;  %v393_v46 = vmax.bf16 %v1294_v44, %v385_v42  ;;  %v386_v47 = vld [vmem:[%s1377_s16 + $0x18] sm:$0xff] }
  0x2f   : > { %v1247_v35 = vld [vmem:[%s1375_s15 + $0x8] sm:$0xff]   ;;  %v1251_v39 = vld [vmem:[%s1375_s15] sm:$0xff]   ;;  %v389_v50 = vld [vmem:[%s1377_s16 + $0x30] sm:$0xff]  ;;  %v394_v51 = vmax.bf16 %v1294_v44, %v386_v47 }
  0x30   : > { %1128 = vmatpush3.bf16.msra.mxu0 %v1231_v19  ;;  %v1248_v36 = vld [vmem:[%s1375_s15 + $0x88] sm:$0xff]   ;;  %v1252_v40 = vld [vmem:[%s1375_s15 + $0x80] sm:$0xff]   ;;  %v397_v53 = vmax.bf16 %v1294_v44, %v389_v50  ;;  %v390_v55 = vld [vmem:[%s1377_s16 + $0x38] sm:$0xff] }
  0x31   : > { %1156 = vmatpush3.bf16.msra.mxu1 %v1232_v20  ;;  %1129 = vmatprep.subr.bf16.mxu0 %v1233_v21  ;;  %v383_v41 = vld [vmem:[%s1377_s16] sm:$0xff]  ;;  %v384_v43 = vld [vmem:[%s1377_s16 + $0x8] sm:$0xff]  ;;  %v398_v59 = vmax.bf16 %v1294_v44, %v390_v55  ;;  %v399_v9 = vld [vmem:[#allocation2 + $0x10] sm:$0xff] }
  0x32   : > { %1157 = vmatprep.subr.bf16.mxu1 %v1234_v22  ;;  %v391_v45 = vmax.bf16 %v1294_v44, %v383_v41  ;;  %v392_v48 = vmax.bf16 %v1294_v44, %v384_v43  ;;  %v387_v49 = vld [vmem:[%s1377_s16 + $0x20] sm:$0xff]  ;;  %v388_v54 = vld [vmem:[%s1377_s16 + $0x28] sm:$0xff] }
  0x33   : > { %v395_v52 = vmax.bf16 %v1294_v44, %v387_v49  ;;  %v396_v58 = vmax.bf16 %v1294_v44, %v388_v54  ;;  %v400_v18 = vld [vmem:[#allocation2] sm:$0xff] }
  0x34   : > { %1130 = vmatpush3.bf16.msra.mxu0 %v1235_v23  ;;  %v1056_v56 = vcombine.high %v391_v45, %v393_v46  ;;  %v1055_v57 = vcombine.low %v391_v45, %v393_v46  ;;  %v1058_v60 = vcombine.high %v392_v48, %v394_v51  ;;  %v1057_v61 = vcombine.low %v392_v48, %v394_v51 }
  0x35   : > { %1158 = vmatpush3.bf16.msra.mxu1 %v1236_v24  ;;  %1131 = vmatprep.subr.bf16.mxu0 %v1237_v25  ;;  %v1060_v62 = vcombine.high %v395_v52, %v397_v53  ;;  %v1062_v63 = vcombine.high %v396_v58, %v398_v59  ;;  %v1059_v0 = vcombine.low %v395_v52, %v397_v53 }
  0x36   : > { %1159 = vmatprep.subr.bf16.mxu1 %v1238_v26  ;;  %731 = vmatprep.mubr.bf16.mxu0 %v1056_v56  ;;  %v1061_v1 = vcombine.low %v396_v58, %v398_v59 }
  0x37   : > { %780 = vmatprep.mubr.bf16.mxu1 %v1058_v60 }
  0x38   : > { %1132 = vmatpush3.bf16.msra.mxu0 %v1239_v27  ;;  %v401_v27 = vld [vmem:[#allocation2 + $0x18] sm:$0xff] }
  0x39   : > { %1160 = vmatpush3.bf16.msra.mxu1 %v1240_v28  ;;  %1133 = vmatprep.subr.bf16.mxu0 %v1241_v29 }
  0x3a   : > { %1161 = vmatprep.subr.bf16.mxu1 %v1242_v30 }
  0x3c   : > { %1134 = vmatpush3.bf16.msra.mxu0 %v1243_v31 }
  0x3d   : > { %1162 = vmatpush3.bf16.msra.mxu1 %v1244_v32  ;;  %1135 = vmatprep.subr.bf16.mxu0 %v1245_v33 }
  0x3e   : > { %1163 = vmatprep.subr.bf16.mxu1 %v1246_v34 }
  0x40   : > { %1136 = vmatpush3.bf16.msra.mxu0 %v1247_v35  ;;  %v402_v35 = vld [vmem:[#allocation2 + $0x8] sm:$0xff] }
  0x41   : > { %1164 = vmatpush3.bf16.msra.mxu1 %v1248_v36  ;;  %1137 = vmatprep.subr.bf16.mxu0 %v1249_v37 }
  0x42   : > { %1165 = vmatprep.subr.bf16.mxu1 %v1250_v38 }
  0x44   : > { %1138 = vmatpush3.bf16.msra.mxu0 %v1251_v39 }
  0x45   : > { %1166 = vmatpush3.bf16.msra.mxu1 %v1252_v40 }
  0x47   : > { %732 = vmatmul.mubr.bf16.vlgmr.msra.gmra.mxu0 %v1055_v57 }
  0x48   : > { %781 = vmatmul.mubr.bf16.vlgmr.msra.gmra.mxu1 %v1057_v61  ;;  %739 = vmatprep.mubr.bf16.mxu0 %v1060_v62 }
  0x49   : > { %788 = vmatprep.mubr.bf16.mxu1 %v1062_v63 }
  0x4f   : > { %740 = vmatmul.mubr.bf16.gmra.mxu0 %v1059_v0 }
  0x50   : > { %789 = vmatmul.mubr.bf16.gmra.mxu1 %v1061_v1 }
 0x107   : > { %v1139_v2 = vpop.f32.mrf.mxu0 }
 0x108   : > { %v1167_v3 = vpop.f32.mrf.mxu1 }
 0x109   : > { %v1140_v4 = vpop.f32.mrf.mxu0 }
 0x10a   : > { %v1141_v5 = vadd.f32 %v1140_v4, %v1139_v2  ;;  %v1168_v6 = vpop.f32.mrf.mxu1 }
 0x10b   : > { %v1169_v7 = vadd.f32 %v1168_v6, %v1167_v3  ;;  %v1142_v8 = vpop.f32.mrf.mxu0 }
 0x10c   : > { %v1170_v10 = vpop.f32.mrf.mxu1 }
 0x10d   : > { %v783_v11 = vadd.f32 %v1169_v7, %v1141_v5  ;;  %v1143_v12 = vpop.f32.mrf.mxu0 }
 0x10e   : > { %v1144_v13 = vadd.f32 %v1143_v12, %v1142_v8  ;;  %v1171_v14 = vpop.f32.mrf.mxu1 }
 0x10f   : > { %v797_v15 = vadd.f32 %v783_v11, %v399_v9  ;;  %v1172_v16 = vadd.f32 %v1171_v14, %v1170_v10  ;;  %v1145_v17 = vpop.f32.mrf.mxu0 }
 0x110   : > { %v1173_v19 = vpop.f32.mrf.mxu1 }
 0x111   : > { %801 = vst [vmem:[#allocation2 + $0x10] sm:$0xff] %v797_v15  ;;  %v786_v20 = vadd.f32 %v1172_v16, %v1144_v13  ;;  %v1146_v21 = vpop.f32.mrf.mxu0 }
 0x112   : > { %v1147_v22 = vadd.f32 %v1146_v21, %v1145_v17  ;;  %v1174_v23 = vpop.f32.mrf.mxu1 }
 0x113   : > { %v798_v24 = vadd.f32 %v786_v20, %v400_v18  ;;  %v1175_v25 = vadd.f32 %v1174_v23, %v1173_v19  ;;  %v1148_v26 = vpop.f32.mrf.mxu0 }
 0x114   : > { %v1176_v28 = vpop.f32.mrf.mxu1 }
 0x115   : > { %802 = vst [vmem:[#allocation2] sm:$0xff] %v798_v24  ;;  %v791_v29 = vadd.f32 %v1175_v25, %v1147_v22  ;;  %v1149_v30 = vpop.f32.mrf.mxu0 }
 0x116   : > { %v1150_v31 = vadd.f32 %v1149_v30, %v1148_v26  ;;  %v1177_v32 = vpop.f32.mrf.mxu1 }
 0x117   : > { %v799_v33 = vadd.f32 %v791_v29, %v401_v27  ;;  %v1178_v34 = vadd.f32 %v1177_v32, %v1176_v28 }
 0x119   : > { %803 = vst [vmem:[#allocation2 + $0x18] sm:$0xff] %v799_v33  ;;  %v794_v36 = vadd.f32 %v1178_v34, %v1150_v31  ;;  %808 = sbr.rel (%p1095_p11) target bundleno = 312 (0x138), region = 63 }
 0x11b   : > { %v800_v37 = vadd.f32 %v794_v36, %v402_v35 }
 0x11d   : > { %804 = vst [vmem:[#allocation2 + $0x8] sm:$0xff] %v800_v37 }
 0x11e   : > { %v809_v38 = vld [vmem:[#allocation2 + $0x10] sm:$0xff]  ;;  %v810_v39 = vld [vmem:[#allocation2] sm:$0xff] }
 0x11f   : > { %v1096_v42 = vld [vmem:[%s1453_s2] ss:$0 sm:$0xff] }
 0x120   : > { %v811_v40 = vld [vmem:[#allocation2 + $0x18] sm:$0xff]  ;;  %v820_v43 = vadd.f32 %v1096_v42, %v809_v38  ;;  %v821_v44 = vadd.f32 %v1096_v42, %v810_v39 }
 0x121   : > { %v822_v45 = vadd.f32 %v1096_v42, %v811_v40 }
 0x122   : > { %v824_v47 = vadd.f32 %v821_v44, %v820_v43  ;;  %v834_v48 = vmul.f32 %v820_v43, %v820_v43  ;;  %v835_v49 = vmul.f32 %v821_v44, %v821_v44  ;;  %v1115_v51 = vpack.c.bf16 %v821_v44, %v820_v43 }
 0x123   : > { %v836_v50 = vmul.f32 %v822_v45, %v822_v45 }
 0x124   : > { %v812_v41 = vld [vmem:[#allocation2 + $0x8] sm:$0xff]  ;;  %v825_v53 = vadd.f32 %v824_v47, %v822_v45  ;;  %v838_v55 = vadd.f32 %v835_v49, %v834_v48  ;;  %1116 = vst [vmem:[%s1454_s3] sm:$0xff] %v1115_v51  }
 0x125   : > { %v823_v46 = vadd.f32 %v1096_v42, %v812_v41 }
 0x126   : > { %v839_v57 = vadd.f32 %v838_v55, %v836_v50 }
 0x127   : > { %v1120_v52 = vpack.c.bf16 %v823_v46, %v822_v45  ;;  %v837_v54 = vmul.f32 %v823_v46, %v823_v46  ;;  %v826_v56 = vadd.f32 %v825_v53, %v823_v46 }
 0x129   : > { %1122 = vst [vmem:[%s1454_s3 + $0x8] sm:$0xff] %v1120_v52   ;;  %v827_v58 = vrot.slane %v826_v56, 4  ;;  %v840_v59 = vadd.f32 %v839_v57, %v837_v54 }
 0x12b   : > { %v828_v60 = vadd.f32 %v827_v58, %v826_v56  ;;  %v841_v61 = vrot.slane %v840_v59, 4 }
 0x12d   : > { %v829_v62 = vrot.slane %v828_v60, 2  ;;  %v842_v63 = vadd.f32 %v841_v61, %v840_v59 }
 0x12f   : > { %v830_v0 = vadd.f32 %v829_v62, %v828_v60  ;;  %v843_v1 = vrot.slane %v842_v63, 2 }
 0x131   : > { %v831_v2 = vrot.slane %v830_v0, 1  ;;  %v844_v3 = vadd.f32 %v843_v1, %v842_v63 }
 0x133   : > { %v832_v4 = vadd.f32 %v831_v2, %v830_v0  ;;  %v845_v5 = vrot.slane %v844_v3, 1 }
 0x135   : > { %833 = vst [vmem:[%s1455_s4] sm:$0x1] %v832_v4  ;;  %v846_v6 = vadd.f32 %v845_v5, %v844_v3 }
 0x137   : > { %847 = vst [vmem:[%s1456_s5] sm:$0x1] %v846_v6 }
 0x138 PF: > { %s16_s22 = sadd.s32 1, %s1291_s22   ;;  %s1457_s18 = smov %s1279_s19 }
 0x139   : > { %p13_p12 = scmp.ge.s32.totalorder %s16_s22, 4   ;;  %s1458_s19 = smov %s1360_s26 }
 0x13a   : > { %s1459_s20 = smov %s1287_s21  ;;  %s1460_s21 = smov %s1462_s23 }
 0x13b   :  { %15 = sbr.rel (!%p13_p12) target bundleno = 3 (0x3), region = 128 }

// kernel: fwd.18
= control target key start
LH: loop header
LB: loop body
LE: loop exit
PB: predicated region body
PF: predicated region fallthrough
CT: control target
= control target key end

     0   :  { %v1123_v25 = vmov 0   ;;  %s1405_s1 = inlined_call_operand.vmem [shape: bf16[384,128], index: 1, kind: input, shape index: {}]   ;;  %s1406_s0 = inlined_call_operand.vmem [shape: bf16[128,384], index: 0, kind: input, shape index: {}]   ;;  %s1407_s2 = inlined_call_operand.vmem [shape: f32[1,128], index: 2, kind: input, shape index: {}]   ;;  %s1408_s3 = inlined_call_operand.vmem [shape: bf16[128,128], index: 3, kind: output, shape index: {0}]   ;;  %s1409_s4 = inlined_call_operand.vmem [shape: f32[1,1,128], index: 4, kind: output, shape index: {1}]   ;;  %s1410_s5 = inlined_call_operand.vmem [shape: f32[1,1,128], index: 5, kind: output, shape index: {2}]  }
   0x1   :  { %v1099_v0 = vld [vmem:[%s1405_s1 + $0x78] sm:$0xff]   ;;  %v1102_v3 = vld [vmem:[%s1405_s1 + $0x70] sm:$0xff]   ;;  %v1105_v6 = vld [vmem:[%s1405_s1 + $0x68] sm:$0xff]  }
   0x2   :  { %v1100_v1 = vld [vmem:[%s1405_s1 + $0x38] sm:$0xff]   ;;  %986 = vmatprep.subr.bf16.mxu0 %v1099_v0  ;;  %v1103_v4 = vld [vmem:[%s1405_s1 + $0x30] sm:$0xff]   ;;  %v1106_v7 = vld [vmem:[%s1405_s1 + $0x28] sm:$0xff]  }
   0x3   :  { %v1101_v2 = vld [vmem:[%s1405_s1 + $0xb8] sm:$0xff]   ;;  %987 = vmatpush3.bf16.msra.mxu0 %v1100_v1  ;;  %v1104_v5 = vld [vmem:[%s1405_s1 + $0xb0] sm:$0xff]   ;;  %v1107_v8 = vld [vmem:[%s1405_s1 + $0xa8] sm:$0xff]  }
   0x4   :  { %1066 = vmatprep.subr.bf16.mxu1 %v1101_v2  ;;  %988 = vmatprep.subr.bf16.mxu0 %v1102_v3  ;;  %v1108_v9 = vld [vmem:[%s1405_s1 + $0x60] sm:$0xff]   ;;  %v1111_v12 = vld [vmem:[%s1405_s1 + $0x58] sm:$0xff]   ;;  %v1114_v15 = vld [vmem:[%s1405_s1 + $0x50] sm:$0xff]  }
   0x5   :  { %1067 = vmatpush3.bf16.msra.mxu1 %v1101_v2  ;;  %v1109_v10 = vld [vmem:[%s1405_s1 + $0x20] sm:$0xff]   ;;  %v1113_v13 = vld [vmem:[%s1405_s1 + $0x98] sm:$0xff]   ;;  %v1116_v16 = vld [vmem:[%s1405_s1 + $0x90] sm:$0xff]  }
   0x6   :  { %1068 = vmatprep.subr.bf16.mxu1 %v1104_v5  ;;  %v1110_v11 = vld [vmem:[%s1405_s1 + $0xa0] sm:$0xff]   ;;  %v1112_v14 = vld [vmem:[%s1405_s1 + $0x18] sm:$0xff]   ;;  %v1115_v17 = vld [vmem:[%s1405_s1 + $0x10] sm:$0xff]  }
   0x7   :  { %989 = vmatpush3.bf16.msra.mxu0 %v1103_v4  ;;  %v1117_v18 = vld [vmem:[%s1405_s1 + $0x48] sm:$0xff]   ;;  %v1120_v21 = vld [vmem:[%s1405_s1 + $0x40] sm:$0xff]   ;;  %v41_v28 = vld [vmem:[%s1406_s0 + $0x14] sm:$0xf] }
   0x8   :  { %990 = vmatprep.subr.bf16.mxu0 %v1105_v6  ;;  %v1118_v19 = vld [vmem:[%s1405_s1 + $0x8] sm:$0xff]   ;;  %v38_v22 = vld [vmem:[%s1406_s0] sm:$0xff]  ;;  %v73_v33 = vmax.bf16 %v1123_v25, %v41_v28  ;;  %v42_v34 = vld [vmem:[%s1406_s0 + $0x18] sm:$0xff] }
   0x9   :  { %1069 = vmatpush3.bf16.msra.mxu1 %v1104_v5  ;;  %v1119_v20 = vld [vmem:[%s1405_s1 + $0x88] sm:$0xff]   ;;  %v70_v26 = vmax.bf16 %v1123_v25, %v38_v22  ;;  %v43_v30 = vld [vmem:[%s1406_s0 + $0x20] sm:$0xf]  ;;  %v74_v38 = vmax.bf16 %v1123_v25, %v42_v34  ;;  %v47_v40 = vld [vmem:[%s1406_s0 + $0x38] sm:$0xf] }
   0xa   :  { %1070 = vmatprep.subr.bf16.mxu1 %v1107_v8  ;;  %v40_v23 = vld [vmem:[%s1406_s0 + $0xc] sm:$0xff]  ;;  %v39_v24 = vld [vmem:[%s1406_s0 + $0x8] sm:$0xf]  ;;  %v1122_v32 = vld [vmem:[%s1405_s1 + $0x80] sm:$0xff]   ;;  %v75_v43 = vmax.bf16 %v1123_v25, %v43_v30  ;;  %v79_v45 = vmax.bf16 %v1123_v25, %v47_v40 }
   0xb   :  { %991 = vmatpush3.bf16.msra.mxu0 %v1106_v7  ;;  %v72_v27 = vmax.bf16 %v1123_v25, %v40_v23  ;;  %v71_v29 = vmax.bf16 %v1123_v25, %v39_v24  ;;  %v45_v31 = vld [vmem:[%s1406_s0 + $0x2c] sm:$0xf]  ;;  %v44_v35 = vld [vmem:[%s1406_s0 + $0x24] sm:$0xff]  ;;  %v46_v50 = vld [vmem:[%s1406_s0 + $0x30] sm:$0xff] }
   0xc   :  { %992 = vmatprep.subr.bf16.mxu0 %v1108_v9  ;;  %v1121_v36 = vld [vmem:[%s1405_s1] sm:$0xff]   ;;  %v76_v39 = vmax.bf16 %v1123_v25, %v44_v35  ;;  %v77_v44 = vmax.bf16 %v1123_v25, %v45_v31  ;;  %v51_v53 = vld [vmem:[%s1406_s0 + $0x50] sm:$0xf]  ;;  %v53_v54 = vld [vmem:[%s1406_s0 + $0x5c] sm:$0xf]  ;;  %v78_v57 = vmax.bf16 %v1123_v25, %v46_v50 }
   0xd   :  { %1071 = vmatpush3.bf16.msra.mxu1 %v1107_v8  ;;  %v859_v37 = vcombine.high %v70_v26, %v72_v27  ;;  %v49_v41 = vld [vmem:[%s1406_s0 + $0x44] sm:$0xf]  ;;  %v860_v42 = vcombine.low %v71_v29, %v73_v33  ;;  %v858_v46 = vcombine.low %v70_v26, %v72_v27  ;;  %v48_v51 = vld [vmem:[%s1406_s0 + $0x3c] sm:$0xff]  ;;  %v55_v55 = vld [vmem:[%s1406_s0 + $0x68] sm:$0xf]  ;;  %v83_v59 = vmax.bf16 %v1123_v25, %v51_v53 }
   0xe   :  { %1072 = vmatprep.subr.bf16.mxu1 %v1110_v11  ;;  %v81_v47 = vmax.bf16 %v1123_v25, %v49_v41  ;;  %v862_v48 = vcombine.high %v74_v38, %v76_v39  ;;  %v863_v49 = vcombine.low %v75_v43, %v77_v44  ;;  %v57_v56 = vld [vmem:[%s1406_s0 + $0x74] sm:$0xf]  ;;  %v80_v58 = vmax.bf16 %v1123_v25, %v48_v51  ;;  %v50_v2 = vld [vmem:[%s1406_s0 + $0x48] sm:$0xff]  ;;  %v59_v5 = vld [vmem:[%s1406_s0 + $0x80] sm:$0xf] }
   0xf   :  { %993 = vmatpush3.bf16.msra.mxu0 %v1109_v10  ;;  %470 = vmatprep.mubr.bf16.mxu0 %v859_v37  ;;  %v85_v60 = vmax.bf16 %v1123_v25, %v53_v54  ;;  %v87_v61 = vmax.bf16 %v1123_v25, %v55_v55  ;;  %v89_v62 = vmax.bf16 %v1123_v25, %v57_v56  ;;  %v52_v3 = vld [vmem:[%s1406_s0 + $0x54] sm:$0xff]  ;;  %v61_v6 = vld [vmem:[%s1406_s0 + $0x8c] sm:$0xf]  ;;  %v65_v8 = vld [vmem:[%s1406_s0 + $0xa4] sm:$0xf] }
  0x10   :  { %994 = vmatprep.subr.bf16.mxu0 %v1111_v12  ;;  %1082 = vmatprep.mubr.bf16.mxu1 %v860_v42  ;;  %v866_v52 = vcombine.low %v79_v45, %v81_v47  ;;  %v861_v63 = vcombine.low %v74_v38, %v76_v39  ;;  %v865_v0 = vcombine.high %v78_v57, %v80_v58  ;;  %v63_v7 = vld [vmem:[%s1406_s0 + $0x98] sm:$0xf]  ;;  %v69_v22 = vld [vmem:[%s1406_s0 + $0xbc] sm:$0xf]  ;;  %v60_v31 = vld [vmem:[%s1406_s0 + $0x84] sm:$0xff] }
  0x11   :  { %1073 = vmatpush3.bf16.msra.mxu1 %v1110_v11  ;;  %v869_v1 = vcombine.low %v83_v59, %v85_v60  ;;  %v872_v4 = vcombine.low %v87_v61, %v89_v62  ;;  %v82_v9 = vmax.bf16 %v1123_v25, %v50_v2  ;;  %v84_v10 = vmax.bf16 %v1123_v25, %v52_v3  ;;  %v58_v30 = vld [vmem:[%s1406_s0 + $0x78] sm:$0xff]  ;;  %v62_v37 = vld [vmem:[%s1406_s0 + $0x90] sm:$0xff]  ;;  %v66_v43 = vld [vmem:[%s1406_s0 + $0xa8] sm:$0xff] }
  0x12   :  { %1074 = vmatprep.subr.bf16.mxu1 %v1113_v13  ;;  %v91_v11 = vmax.bf16 %v1123_v25, %v59_v5  ;;  %v93_v12 = vmax.bf16 %v1123_v25, %v61_v6  ;;  %v101_v27 = vmax.bf16 %v1123_v25, %v69_v22  ;;  %v90_v33 = vmax.bf16 %v1123_v25, %v58_v30  ;;  %v64_v38 = vld [vmem:[%s1406_s0 + $0x9c] sm:$0xff]  ;;  %v68_v44 = vld [vmem:[%s1406_s0 + $0xb4] sm:$0xff] }
  0x13   :  { %995 = vmatpush3.bf16.msra.mxu0 %v1112_v14  ;;  %v97_v14 = vmax.bf16 %v1123_v25, %v65_v8  ;;  %v867_v28 = vcombine.low %v82_v9, %v84_v10  ;;  %v92_v34 = vmax.bf16 %v1123_v25, %v60_v31  ;;  %v94_v39 = vmax.bf16 %v1123_v25, %v62_v37 }
  0x14   :  { %996 = vmatprep.subr.bf16.mxu0 %v1114_v15  ;;  %v864_v15 = vcombine.low %v78_v57, %v80_v58  ;;  %v96_v40 = vmax.bf16 %v1123_v25, %v64_v38  ;;  %v98_v45 = vmax.bf16 %v1123_v25, %v66_v43 }
  0x15   :  { %1075 = vmatpush3.bf16.msra.mxu1 %v1113_v13  ;;  %v95_v13 = vmax.bf16 %v1123_v25, %v63_v7  ;;  %v873_v41 = vcombine.low %v90_v33, %v92_v34 }
  0x16   :  { %1076 = vmatprep.subr.bf16.mxu1 %v1116_v16  ;;  %v877_v42 = vcombine.high %v94_v39, %v96_v40  ;;  %v876_v47 = vcombine.low %v94_v39, %v96_v40 }
  0x17   :  { %997 = vmatpush3.bf16.msra.mxu0 %v1115_v17  ;;  %v54_v17 = vld [vmem:[%s1406_s0 + $0x60] sm:$0xff] }
  0x18   :  { %998 = vmatprep.subr.bf16.mxu0 %v1117_v18  ;;  %v56_v18 = vld [vmem:[%s1406_s0 + $0x6c] sm:$0xff]  ;;  %v86_v23 = vmax.bf16 %v1123_v25, %v54_v17 }
  0x19   :  { %1077 = vmatpush3.bf16.msra.mxu1 %v1116_v16  ;;  %v868_v16 = vcombine.high %v82_v9, %v84_v10  ;;  %v88_v24 = vmax.bf16 %v1123_v25, %v56_v18 }
  0x1a   :  { %1078 = vmatprep.subr.bf16.mxu1 %v1119_v20 }
  0x1b   :  { %999 = vmatpush3.bf16.msra.mxu0 %v1118_v19  ;;  %v875_v19 = vcombine.low %v91_v11, %v93_v12  ;;  %v871_v29 = vcombine.high %v86_v23, %v88_v24  ;;  %v870_v35 = vcombine.low %v86_v23, %v88_v24 }
  0x1c   :  { %1000 = vmatprep.subr.bf16.mxu0 %v1120_v21  ;;  %v67_v21 = vld [vmem:[%s1406_s0 + $0xb0] sm:$0xf] }
  0x1d   :  { %1079 = vmatpush3.bf16.msra.mxu1 %v1119_v20  ;;  %v878_v20 = vcombine.low %v95_v13, %v97_v14  ;;  %v99_v26 = vmax.bf16 %v1123_v25, %v67_v21 }
  0x1e   :  { %1080 = vmatprep.subr.bf16.mxu1 %v1122_v32 }
  0x1f   :  { %1001 = vmatpush3.bf16.msra.mxu0 %v1121_v36  ;;  %v874_v36 = vcombine.high %v90_v33, %v92_v34 }
  0x21   :  { %1081 = vmatpush3.bf16.msra.mxu1 %v1122_v32  ;;  %v881_v32 = vcombine.low %v99_v26, %v101_v27 }
  0x22   :  { %471 = vmatmul.mubr.bf16.vlgmr.msra.gmra.mxu0 %v858_v46  ;;  %v100_v46 = vmax.bf16 %v1123_v25, %v68_v44  ;;  %v1357_v25 = vld [vmem:[%s1407_s2] ss:$0 sm:$0xff] }
  0x23   :  { %478 = vmatprep.mubr.bf16.mxu0 %v862_v48 }
  0x24   :  { %1083 = vmatmul.mubr.bf16.vlgmr.msra.gmra.mxu1 %v863_v49  ;;  %v880_v48 = vcombine.high %v98_v45, %v100_v46  ;;  %v879_v49 = vcombine.low %v98_v45, %v100_v46 }
  0x25   :  { %1086 = vmatprep.mubr.bf16.mxu1 %v866_v52 }
  0x2a   :  { %479 = vmatmul.mubr.bf16.gmra.mxu0 %v861_v63 }
  0x2b   :  { %486 = vmatprep.mubr.bf16.mxu0 %v865_v0 }
  0x2c   :  { %1087 = vmatmul.mubr.bf16.gmra.mxu1 %v869_v1 }
  0x2d   :  { %1090 = vmatprep.mubr.bf16.mxu1 %v872_v4 }
  0x32   :  { %487 = vmatmul.mubr.bf16.gmra.mxu0 %v864_v15 }
  0x33   :  { %494 = vmatprep.mubr.bf16.mxu0 %v868_v16 }
  0x34   :  { %1091 = vmatmul.mubr.bf16.gmra.mxu1 %v875_v19 }
  0x35   :  { %1094 = vmatprep.mubr.bf16.mxu1 %v878_v20 }
  0x3a   :  { %495 = vmatmul.mubr.bf16.gmra.mxu0 %v867_v28 }
  0x3b   :  { %502 = vmatprep.mubr.bf16.mxu0 %v871_v29 }
  0x3c   :  { %1095 = vmatmul.mubr.bf16.gmra.mxu1 %v881_v32 }
  0x42   :  { %503 = vmatmul.mubr.bf16.gmra.mxu0 %v870_v35 }
  0x43   :  { %510 = vmatprep.mubr.bf16.mxu0 %v874_v36 }
  0x4a   :  { %511 = vmatmul.mubr.bf16.gmra.mxu0 %v873_v41 }
  0x4b   :  { %518 = vmatprep.mubr.bf16.mxu0 %v877_v42 }
  0x52   :  { %519 = vmatmul.mubr.bf16.gmra.mxu0 %v876_v47 }
  0x53   :  { %526 = vmatprep.mubr.bf16.mxu0 %v880_v48 }
  0x5a   :  { %527 = vmatmul.mubr.bf16.gmra.mxu0 %v879_v49 }
  0xe2   :  { %v1002_v50 = vpop.f32.mrf.mxu0 }
  0xe4   :  { %v1003_v51 = vpop.f32.mrf.mxu0  ;;  %v1084_v52 = vpop.f32.mrf.mxu1 }
  0xe5   :  { %v1004_v53 = vadd.f32 %v1003_v51, %v1002_v50 }
  0xe6   :  { %v1005_v54 = vpop.f32.mrf.mxu0  ;;  %v569_v55 = vpop.f32.mrf.mxu1 }
  0xe7   :  { %v570_v58 = vadd.f32 %v1004_v53, %v569_v55 }
  0xe8   :  { %v1006_v56 = vpop.f32.mrf.mxu0  ;;  %v1085_v57 = vpop.f32.mrf.mxu1 }
  0xe9   :  { %v1007_v59 = vadd.f32 %v1006_v56, %v1005_v54  ;;  %v690_v1 = vadd.f32 %v1357_v25, %v570_v58 }
  0xea   :  { %v1008_v60 = vpop.f32.mrf.mxu0  ;;  %v572_v61 = vpop.f32.mrf.mxu1 }
  0xeb   :  { %v573_v62 = vadd.f32 %v1007_v59, %v572_v61  ;;  %v728_v51 = vmul.f32 %v690_v1, %v690_v1 }
  0xec   :  { %v1009_v63 = vpop.f32.mrf.mxu0  ;;  %v1088_v0 = vpop.f32.mrf.mxu1 }
  0xed   :  { %v691_v2 = vadd.f32 %v1357_v25, %v573_v62  ;;  %v1010_v3 = vadd.f32 %v1009_v63, %v1008_v60 }
  0xee   :  { %v1011_v4 = vpop.f32.mrf.mxu0  ;;  %v585_v7 = vpop.f32.mrf.mxu1 }
  0xef   :  { %v942_v5 = vpack.c.bf16 %v691_v2, %v690_v1  ;;  %v578_v8 = vadd.f32 %v1084_v52, %v1010_v3  ;;  %v729_v46 = vmul.f32 %v691_v2, %v691_v2  ;;  %v706_v54 = vadd.f32 %v691_v2, %v690_v1 }
  0xf0   :  { %v1012_v6 = vpop.f32.mrf.mxu0  ;;  %v1089_v13 = vpop.f32.mrf.mxu1 }
  0xf1   :  { %943 = vst [vmem:[%s1408_s3] sm:$0xff] %v942_v5   ;;  %v1013_v9 = vadd.f32 %v1012_v6, %v1011_v4  ;;  %v692_v14 = vadd.f32 %v1357_v25, %v578_v8  ;;  %v744_v56 = vadd.f32 %v729_v46, %v728_v51 }
  0xf2   :  { %v1014_v10 = vpop.f32.mrf.mxu0  ;;  %v588_v20 = vpop.f32.mrf.mxu1 }
  0xf3   :  { %v581_v11 = vadd.f32 %v1085_v57, %v1013_v9  ;;  %v730_v52 = vmul.f32 %v692_v14, %v692_v14  ;;  %v707_v59 = vadd.f32 %v706_v54, %v692_v14 }
  0xf4   :  { %v1015_v12 = vpop.f32.mrf.mxu0  ;;  %v1092_v27 = vpop.f32.mrf.mxu1 }
  0xf5   :  { %v693_v15 = vadd.f32 %v1357_v25, %v581_v11  ;;  %v1016_v16 = vadd.f32 %v1015_v12, %v1014_v10  ;;  %v745_v63 = vadd.f32 %v744_v56, %v730_v52 }
  0xf6   :  { %v1017_v17 = vpop.f32.mrf.mxu0  ;;  %v601_v34 = vpop.f32.mrf.mxu1 }
  0xf7   :  { %v947_v18 = vpack.c.bf16 %v693_v15, %v692_v14  ;;  %v586_v21 = vadd.f32 %v1016_v16, %v585_v7  ;;  %v731_v57 = vmul.f32 %v693_v15, %v693_v15  ;;  %v708_v5 = vadd.f32 %v707_v59, %v693_v15 }
  0xf8   :  { %v1018_v19 = vpop.f32.mrf.mxu0  ;;  %v1093_v40 = vpop.f32.mrf.mxu1 }
  0xf9   :  { %979 = vst [vmem:[%s1408_s3 + $0x8] sm:$0xff] %v947_v18   ;;  %v1019_v22 = vadd.f32 %v1018_v19, %v1017_v17  ;;  %v694_v28 = vadd.f32 %v1357_v25, %v586_v21  ;;  %v746_v7 = vadd.f32 %v745_v63, %v731_v57 }
  0xfa   :  { %v1020_v23 = vpop.f32.mrf.mxu0  ;;  %v604_v48 = vpop.f32.mrf.mxu1 }
  0xfb   :  { %v589_v24 = vadd.f32 %v1019_v22, %v588_v20  ;;  %v709_v1 = vadd.f32 %v708_v5, %v694_v28 }
  0xfc   :  { %v1021_v26 = vpop.f32.mrf.mxu0  ;;  %v1096_v4 = vpop.f32.mrf.mxu1 }
  0xfd   :  { %v695_v29 = vadd.f32 %v1357_v25, %v589_v24  ;;  %v1022_v30 = vadd.f32 %v1021_v26, %v1020_v23 }
  0xfe   :  { %v1023_v31 = vpop.f32.mrf.mxu0  ;;  %v617_v14 = vpop.f32.mrf.mxu1 }
  0xff   :  { %v952_v32 = vpack.c.bf16 %v695_v29, %v694_v28  ;;  %v594_v35 = vadd.f32 %v1088_v0, %v1022_v30  ;;  %v732_v0 = vmul.f32 %v694_v28, %v694_v28  ;;  %v733_v8 = vmul.f32 %v695_v29, %v695_v29 }
 0x100   :  { %v1024_v33 = vpop.f32.mrf.mxu0  ;;  %v710_v16 = vadd.f32 %v709_v1, %v695_v29 }
 0x101   :  { %980 = vst [vmem:[%s1408_s3 + $0x10] sm:$0xff] %v952_v32   ;;  %v1025_v36 = vadd.f32 %v1024_v33, %v1023_v31  ;;  %v696_v41 = vadd.f32 %v1357_v25, %v594_v35  ;;  %v747_v11 = vadd.f32 %v746_v7, %v732_v0 }
 0x102   :  { %v1026_v37 = vpop.f32.mrf.mxu0 }
 0x103   :  { %v597_v38 = vadd.f32 %v1089_v13, %v1025_v36  ;;  %v734_v12 = vmul.f32 %v696_v41, %v696_v41  ;;  %v748_v18 = vadd.f32 %v747_v11, %v733_v8  ;;  %v711_v20 = vadd.f32 %v710_v16, %v696_v41 }
 0x104   :  { %v1027_v39 = vpop.f32.mrf.mxu0 }
 0x105   :  { %v697_v42 = vadd.f32 %v1357_v25, %v597_v38  ;;  %v1028_v43 = vadd.f32 %v1027_v39, %v1026_v37  ;;  %v749_v24 = vadd.f32 %v748_v18, %v734_v12 }
 0x106   :  { %v1029_v44 = vpop.f32.mrf.mxu0 }
 0x107   :  { %v957_v45 = vpack.c.bf16 %v697_v42, %v696_v41  ;;  %v602_v49 = vadd.f32 %v1028_v43, %v601_v34  ;;  %v735_v19 = vmul.f32 %v697_v42, %v697_v42  ;;  %v712_v30 = vadd.f32 %v711_v20, %v697_v42 }
 0x108   :  { %v1030_v47 = vpop.f32.mrf.mxu0 }
 0x109   :  { %981 = vst [vmem:[%s1408_s3 + $0x18] sm:$0xff] %v957_v45   ;;  %v1031_v50 = vadd.f32 %v1030_v47, %v1029_v44  ;;  %v698_v60 = vadd.f32 %v1357_v25, %v602_v49  ;;  %v750_v33 = vadd.f32 %v749_v24, %v735_v19 }
 0x10a   :  { %v1032_v53 = vpop.f32.mrf.mxu0 }
 0x10b   :  { %v605_v55 = vadd.f32 %v1031_v50, %v604_v48  ;;  %v736_v26 = vmul.f32 %v698_v60, %v698_v60  ;;  %v713_v35 = vadd.f32 %v712_v30, %v698_v60 }
 0x10c   :  { %v1033_v58 = vpop.f32.mrf.mxu0 }
 0x10d   :  { %v699_v61 = vadd.f32 %v1357_v25, %v605_v55  ;;  %v1034_v62 = vadd.f32 %v1033_v58, %v1032_v53  ;;  %v751_v37 = vadd.f32 %v750_v33, %v736_v26 }
 0x10e   :  { %v1035_v3 = vpop.f32.mrf.mxu0 }
 0x10f   :  { %v962_v6 = vpack.c.bf16 %v699_v61, %v698_v60  ;;  %v610_v2 = vadd.f32 %v1092_v27, %v1034_v62  ;;  %v1097_v27 = vpop.f32.mrf.mxu1  ;;  %v737_v34 = vmul.f32 %v699_v61, %v699_v61  ;;  %v714_v41 = vadd.f32 %v713_v35, %v699_v61 }
 0x110   :  { %v1036_v9 = vpop.f32.mrf.mxu0 }
 0x111   :  { %982 = vst [vmem:[%s1408_s3 + $0x20] sm:$0xff] %v962_v6   ;;  %v1037_v10 = vadd.f32 %v1036_v9, %v1035_v3  ;;  %v700_v21 = vadd.f32 %v1357_v25, %v610_v2  ;;  %v620_v39 = vpop.f32.mrf.mxu1  ;;  %v752_v42 = vadd.f32 %v751_v37, %v737_v34 }
 0x112   :  { %v1038_v13 = vpop.f32.mrf.mxu0 }
 0x113   :  { %v613_v17 = vadd.f32 %v1093_v40, %v1037_v10  ;;  %v738_v38 = vmul.f32 %v700_v21, %v700_v21  ;;  %v715_v47 = vadd.f32 %v714_v41, %v700_v21 }
 0x114   :  { %v1039_v15 = vpop.f32.mrf.mxu0 }
 0x115   :  { %v701_v22 = vadd.f32 %v1357_v25, %v613_v17  ;;  %v1040_v23 = vadd.f32 %v1039_v15, %v1038_v13  ;;  %v753_v50 = vadd.f32 %v752_v42, %v738_v38 }
 0x116   :  { %v1041_v28 = vpop.f32.mrf.mxu0 }
 0x117   :  { %v967_v31 = vpack.c.bf16 %v701_v22, %v700_v21  ;;  %v618_v32 = vadd.f32 %v1040_v23, %v617_v14  ;;  %v739_v45 = vmul.f32 %v701_v22, %v701_v22  ;;  %v716_v52 = vadd.f32 %v715_v47, %v701_v22 }
 0x118   :  { %v1042_v29 = vpop.f32.mrf.mxu0 }
 0x119   :  { %983 = vst [vmem:[%s1408_s3 + $0x28] sm:$0xff] %v967_v31   ;;  %v1043_v36 = vadd.f32 %v1042_v29, %v1041_v28  ;;  %v702_v43 = vadd.f32 %v1357_v25, %v618_v32  ;;  %v754_v56 = vadd.f32 %v753_v50, %v739_v45 }
 0x11a   :  { %v1044_v40 = vpop.f32.mrf.mxu0 }
 0x11b   :  { %v621_v44 = vadd.f32 %v1043_v36, %v620_v39  ;;  %v740_v53 = vmul.f32 %v702_v43, %v702_v43  ;;  %v717_v58 = vadd.f32 %v716_v52, %v702_v43 }
 0x11c   :  { %v1045_v46 = vpop.f32.mrf.mxu0 }
 0x11d   :  { %v703_v48 = vadd.f32 %v1357_v25, %v621_v44  ;;  %v1046_v49 = vadd.f32 %v1045_v46, %v1044_v40  ;;  %v755_v62 = vadd.f32 %v754_v56, %v740_v53 }
 0x11e   :  { %v1047_v51 = vpop.f32.mrf.mxu0 }
 0x11f   :  { %v972_v54 = vpack.c.bf16 %v703_v48, %v702_v43  ;;  %v626_v55 = vadd.f32 %v1096_v4, %v1046_v49  ;;  %v741_v59 = vmul.f32 %v703_v48, %v703_v48  ;;  %v718_v63 = vadd.f32 %v717_v58, %v703_v48 }
 0x120   :  { %v1048_v57 = vpop.f32.mrf.mxu0 }
 0x121   :  { %984 = vst [vmem:[%s1408_s3 + $0x30] sm:$0xff] %v972_v54   ;;  %v704_v60 = vadd.f32 %v1357_v25, %v626_v55  ;;  %v1049_v61 = vadd.f32 %v1048_v57, %v1047_v51  ;;  %v756_v5 = vadd.f32 %v755_v62, %v741_v59 }
 0x123   :  { %v742_v0 = vmul.f32 %v704_v60, %v704_v60  ;;  %v629_v3 = vadd.f32 %v1097_v27, %v1049_v61  ;;  %v719_v6 = vadd.f32 %v718_v63, %v704_v60 }
 0x125   :  { %v705_v7 = vadd.f32 %v1357_v25, %v629_v3  ;;  %v757_v4 = vadd.f32 %v756_v5, %v742_v0 }
 0x127   :  { %v720_v8 = vadd.f32 %v719_v6, %v705_v7  ;;  %v743_v9 = vmul.f32 %v705_v7, %v705_v7  ;;  %v977_v1 = vpack.c.bf16 %v705_v7, %v704_v60 }
 0x129   :  { %v721_v2 = vrot.slane %v720_v8, 4  ;;  %v758_v10 = vadd.f32 %v757_v4, %v743_v9  ;;  %985 = vst [vmem:[%s1408_s3 + $0x38] sm:$0xff] %v977_v1  }
 0x12b   :  { %v722_v11 = vadd.f32 %v721_v2, %v720_v8  ;;  %v759_v12 = vrot.slane %v758_v10, 4 }
 0x12d   :  { %v723_v13 = vrot.slane %v722_v11, 2  ;;  %v760_v14 = vadd.f32 %v759_v12, %v758_v10 }
 0x12f   :  { %v724_v16 = vadd.f32 %v723_v13, %v722_v11  ;;  %v761_v17 = vrot.slane %v760_v14, 2 }
 0x131   :  { %v725_v18 = vrot.slane %v724_v16, 1  ;;  %v762_v19 = vadd.f32 %v761_v17, %v760_v14 }
 0x133   :  { %v726_v15 = vadd.f32 %v725_v18, %v724_v16  ;;  %v763_v25 = vrot.slane %v762_v19, 1 }
 0x135   :  { %727 = vst [vmem:[%s1409_s4] sm:$0x1] %v726_v15  ;;  %v764_v20 = vadd.f32 %v763_v25, %v762_v19 }
 0x137   :  { %765 = vst [vmem:[%s1410_s5] sm:$0x1] %v764_v20 }

// kernel: tile.6
= control target key start
LH: loop header
LB: loop body
LE: loop exit
PB: predicated region body
PF: predicated region fallthrough
CT: control target
= control target key end

     0   :  { %s22_s0 = inlined_call_operand.vmem [shape: f32[3], index: 0, kind: input, shape index: {}]   ;;  %s23_s1 = inlined_call_operand.vmem [shape: f32[4,3], index: 1, kind: output, shape index: {}]  }
   0x1   :  { %v4_v0 = vld [vmem:[%s22_s0] ss:$0 sm:$0xff] }
   0x2   :  { %5 = vst [vmem:[%s23_s1] sm:$0xf] %v4_v0 }

// kernel: tile.7
= control target key start
LH: loop header
LB: loop body
LE: loop exit
PB: predicated region body
PF: predicated region fallthrough
CT: control target
= control target key end

     0   :  { %vm8_vm0 = vcmask 23552   ;;  %s40_s8 = smov 3   ;;  %s41_s9 = smov 6   ;;  %vm14_vm1 = vcmask 97352   ;;  %vm20_vm2 = vcmask 72752   ;;  %vm26_vm3 = vcmask 48152   ;;  %s58_s0 = inlined_call_operand.vmem [shape: f32[4,3], index: 0, kind: input, shape index: {}]   ;;  %s59_s1 = inlined_call_operand.vmem [shape: f32[12], index: 1, kind: output, shape index: {}]  }
   0x1   :  { %v5_v0 = vld [vmem:[%s58_s0] sm:$0xf]  ;;  %s39_s0 = smov 9  }
   0x2   :  { %6 = vst [vmem:[#allocation1] sm:$0xf] %v5_v0 }
   0x9   :  { %v11_v1 = vld [vmem:[#allocation1 + $0x3] sm:$0x1]   ;;  %v23_v2 = vld [vmem:[#allocation1 + $0x1] sm:$0x1]   ;;  %v7_v3 = vld [vmem:[#allocation1] sm:$0x1]  }
   0xa   :  { %12 = vrot.lane.b32.xlu0 %v11_v1, %s39_s0  ;;  %24 = vrot.lane.b32.xlu1 %v23_v2, %s40_s8  ;;  %v17_v4 = vld [vmem:[#allocation1 + $0x2] sm:$0x1]   ;;  %9 = vst.msk [vmem:[#allocation0] sm:$0x1] %vm8_vm0, %v7_v3  }
   0xe   :  { %18 = vrot.lane.b32.xlu0 %v17_v4, %s41_s9 }
  0x7c   :  { %v13_v5 = vpop.permute.xlu0 %12   ;;  %v25_v6 = vpop.permute.xlu1 %24  }
  0x7d   :  { %15 = vst.msk [vmem:[#allocation0] sm:$0x1] %vm14_vm1, %v13_v5  }
  0x80   :  { %v19_v7 = vpop.permute.xlu0 %18  }
  0x81   :  { %21 = vst.msk [vmem:[#allocation0] sm:$0x1] %vm20_vm2, %v19_v7  }
  0x82   :  { %27 = vst.msk [vmem:[#allocation0] sm:$0x1] %vm26_vm3, %v25_v6  }
  0x89   :  { %v32_v8 = vld [vmem:[#allocation0] sm:$0x1] }
  0x8a   :  { %35 = vst [vmem:[%s59_s1] sm:$0x1] %v32_v8 }

// kernel: fwd.19
= control target key start
LH: loop header
LB: loop body
LE: loop exit
PB: predicated region body
PF: predicated region fallthrough
CT: control target
= control target key end

     0   :  { %v1668_v0 = vmov 0   ;;  %s2638_s1 = inlined_call_operand.vmem [shape: bf16[256,128], index: 1, kind: input, shape index: {}]   ;;  %s2639_s0 = inlined_call_operand.vmem [shape: bf16[512,256], index: 0, kind: input, shape index: {}]   ;;  %s2640_s2 = inlined_call_operand.vmem [shape: f32[1,128], index: 2, kind: input, shape index: {}]   ;;  %s2641_s3 = inlined_call_operand.vmem [shape: f32[512,128], index: 3, kind: output, shape index: {}]  }
   0x1   :  { %723 = vmatprep.subr.bf16.mxu0 %v1668_v0  ;;  %1491 = vmatprep.subr.bf16.mxu1 %v1668_v0  ;;  %v1524_v1 = vld [vmem:[%s2638_s1 + $0x38] sm:$0xff]   ;;  %v1525_v2 = vld [vmem:[%s2638_s1 + $0x30] sm:$0xff]   ;;  %v1526_v3 = vld [vmem:[%s2638_s1 + $0x28] sm:$0xff]  }
   0x2   :  { %724 = vmatpush1.bf16.msra.mxu0 %v1524_v1  ;;  %1507 = vmatpush1.bf16.msra.mxu1 %v1524_v1  ;;  %v1527_v4 = vld [vmem:[%s2638_s1 + $0x20] sm:$0xff]   ;;  %v1528_v5 = vld [vmem:[%s2638_s1 + $0x18] sm:$0xff]   ;;  %v84_v7 = vld [vmem:[%s2639_s0 + $0x8] sm:$0xff] }
   0x3   :  { %725 = vmatprep.subr.bf16.mxu0 %v1668_v0  ;;  %1492 = vmatprep.subr.bf16.mxu1 %v1668_v0  ;;  %v83_v6 = vld [vmem:[%s2639_s0] sm:$0xff]  ;;  %v1727_v10 = vmax.bf16 %v1668_v0, %v84_v7  ;;  %v116_v11 = vld [vmem:[%s2639_s0 + $0x108] sm:$0xff]  ;;  %v1529_v13 = vld [vmem:[%s2638_s1 + $0x10] sm:$0xff]  }
   0x4   :  { %v115_v8 = vld [vmem:[%s2639_s0 + $0x100] sm:$0xff]  ;;  %v1724_v9 = vmax.bf16 %v1668_v0, %v83_v6  ;;  %v1739_v14 = vmax.bf16 %v1668_v0, %v116_v11  ;;  %v1530_v17 = vld [vmem:[%s2638_s1 + $0x8] sm:$0xff]   ;;  %v93_v26 = vld [vmem:[%s2639_s0 + $0x50] sm:$0xff] }
   0x5   :  { %v1733_v12 = vmax.bf16 %v1668_v0, %v115_v8  ;;  %v91_v18 = vld [vmem:[%s2639_s0 + $0x40] sm:$0xff]  ;;  %v92_v19 = vld [vmem:[%s2639_s0 + $0x48] sm:$0xff]  ;;  %v94_v27 = vld [vmem:[%s2639_s0 + $0x58] sm:$0xff]  ;;  %v1814_v39 = vmax.bf16 %v1668_v0, %v93_v26 }
   0x6   :  { %726 = vmatpush1.bf16.msra.mxu0 %v1525_v2  ;;  %1508 = vmatpush1.bf16.msra.mxu1 %v1525_v2  ;;  %v1411_v15 = vcombine.high %v1724_v9, %v1727_v10  ;;  %v123_v20 = vld [vmem:[%s2639_s0 + $0x140] sm:$0xff]  ;;  %v124_v21 = vld [vmem:[%s2639_s0 + $0x148] sm:$0xff]  ;;  %v1768_v23 = vmax.bf16 %v1668_v0, %v91_v18  ;;  %v1771_v24 = vmax.bf16 %v1668_v0, %v92_v19  ;;  %v125_v29 = vld [vmem:[%s2639_s0 + $0x150] sm:$0xff] }
   0x7   :  { %727 = vmatprep.subr.bf16.mxu0 %v1668_v0  ;;  %1493 = vmatprep.subr.bf16.mxu1 %v1668_v0  ;;  %v1443_v16 = vcombine.high %v1733_v12, %v1739_v14  ;;  %v1531_v22 = vld [vmem:[%s2638_s1] sm:$0xff]   ;;  %v1774_v25 = vmax.bf16 %v1668_v0, %v123_v20  ;;  %v1783_v28 = vmax.bf16 %v1668_v0, %v124_v21  ;;  %v126_v30 = vld [vmem:[%s2639_s0 + $0x158] sm:$0xff]  ;;  %v96_v33 = vld [vmem:[%s2639_s0 + $0x68] sm:$0xff] }
   0x8   :  { %755 = vmatprep.mubr.bf16.mxu0 %v1411_v15  ;;  %v95_v31 = vld [vmem:[%s2639_s0 + $0x60] sm:$0xff]  ;;  %v128_v35 = vld [vmem:[%s2639_s0 + $0x168] sm:$0xff]  ;;  %v1532_v40 = vld [vmem:[%s2638_s1 + $0x78] sm:$0xff]   ;;  %v1820_v41 = vmax.bf16 %v1668_v0, %v94_v27  ;;  %v1823_v42 = vmax.bf16 %v1668_v0, %v125_v29  ;;  %v1826_v43 = vmax.bf16 %v1668_v0, %v126_v30  ;;  %v1832_v45 = vmax.bf16 %v1668_v0, %v96_v33 }
   0x9   :  { %883 = vmatprep.mubr.bf16.mxu1 %v1443_v16  ;;  %v127_v34 = vld [vmem:[%s2639_s0 + $0x160] sm:$0xff]  ;;  %v1829_v44 = vmax.bf16 %v1668_v0, %v95_v31  ;;  %v1838_v47 = vmax.bf16 %v1668_v0, %v128_v35  ;;  %v97_v48 = vld [vmem:[%s2639_s0 + $0x70] sm:$0xff]  ;;  %v98_v49 = vld [vmem:[%s2639_s0 + $0x78] sm:$0xff]  ;;  %v1410_v51 = vcombine.low %v1724_v9, %v1727_v10 }
   0xa   :  { %728 = vmatpush1.bf16.msra.mxu0 %v1526_v3  ;;  %1509 = vmatpush1.bf16.msra.mxu1 %v1526_v3  ;;  %v1835_v46 = vmax.bf16 %v1668_v0, %v127_v34  ;;  %v129_v50 = vld [vmem:[%s2639_s0 + $0x170] sm:$0xff]  ;;  %v130_v54 = vld [vmem:[%s2639_s0 + $0x178] sm:$0xff]  ;;  %v99_v55 = vld [vmem:[%s2639_s0 + $0x80] sm:$0xff]  ;;  %v1883_v1 = vmax.bf16 %v1668_v0, %v97_v48  ;;  %v1886_v2 = vmax.bf16 %v1668_v0, %v98_v49 }
   0xb   :  { %729 = vmatprep.subr.bf16.mxu0 %v1668_v0  ;;  %1494 = vmatprep.subr.bf16.mxu1 %v1668_v0  ;;  %v100_v56 = vld [vmem:[%s2639_s0 + $0x88] sm:$0xff]  ;;  %v131_v61 = vld [vmem:[%s2639_s0 + $0x180] sm:$0xff]  ;;  %v1533_v62 = vld [vmem:[%s2638_s1 + $0x70] sm:$0xff]   ;;  %v1889_v3 = vmax.bf16 %v1668_v0, %v129_v50  ;;  %v1898_v6 = vmax.bf16 %v1668_v0, %v99_v55 }
   0xc   :  { %v1901_v7 = vmax.bf16 %v1668_v0, %v100_v56  ;;  %v101_v8 = vld [vmem:[%s2639_s0 + $0x90] sm:$0xff]  ;;  %v102_v11 = vld [vmem:[%s2639_s0 + $0x98] sm:$0xff]  ;;  %v1534_v19 = vld [vmem:[%s2638_s1 + $0x68] sm:$0xff]  }
   0xd   :  { %v134_v18 = vld [vmem:[%s2639_s0 + $0x198] sm:$0xff]  ;;  %v103_v27 = vld [vmem:[%s2639_s0 + $0xa0] sm:$0xff]  ;;  %v1942_v30 = vmax.bf16 %v1668_v0, %v101_v8  ;;  %v1945_v31 = vmax.bf16 %v1668_v0, %v102_v11  ;;  %v104_v34 = vld [vmem:[%s2639_s0 + $0xa8] sm:$0xff] }
   0xe   :  { %730 = vmatpush1.bf16.msra.mxu0 %v1527_v4  ;;  %1510 = vmatpush1.bf16.msra.mxu1 %v1527_v4  ;;  %v132_v4 = vld [vmem:[%s2639_s0 + $0x188] sm:$0xff]  ;;  %v135_v35 = vld [vmem:[%s2639_s0 + $0x1a0] sm:$0xff]  ;;  %v1964_v50 = vmax.bf16 %v1668_v0, %v134_v18  ;;  %v106_v55 = vld [vmem:[%s2639_s0 + $0xb8] sm:$0xff]  ;;  %v1992_v18 = vmax.bf16 %v1668_v0, %v104_v34 }
   0xf   :  { %731 = vmatprep.subr.bf16.mxu0 %v1668_v0  ;;  %1495 = vmatprep.subr.bf16.mxu1 %v1668_v0  ;;  %v1934_v26 = vmax.bf16 %v1668_v0, %v132_v4  ;;  %v137_v56 = vld [vmem:[%s2639_s0 + $0x1b0] sm:$0xff]  ;;  %v1982_v4 = vmax.bf16 %v1668_v0, %v103_v27  ;;  %v138_v8 = vld [vmem:[%s2639_s0 + $0x1b8] sm:$0xff]  ;;  %v1535_v27 = vld [vmem:[%s2638_s1 + $0x60] sm:$0xff]   ;;  %v2007_v11 = vmax.bf16 %v1668_v0, %v106_v55 }
  0x10   :  { %v107_v34 = vld [vmem:[%s2639_s0 + $0xc0] sm:$0xff]  ;;  %v2023_v55 = vmax.bf16 %v1668_v0, %v138_v8  ;;  %v140_v29 = vld [vmem:[%s2639_s0 + $0x1c8] sm:$0xff]  ;;  %v110_v48 = vld [vmem:[%s2639_s0 + $0xd8] sm:$0xff] }
  0x11   :  { %v142_v21 = vld [vmem:[%s2639_s0 + $0x1d8] sm:$0xff]  ;;  %v2058_v16 = vmax.bf16 %v1668_v0, %v107_v34  ;;  %v2070_v8 = vmax.bf16 %v1668_v0, %v140_v29  ;;  %v2076_v34 = vmax.bf16 %v1668_v0, %v110_v48  ;;  %v112_v29 = vld [vmem:[%s2639_s0 + $0xe8] sm:$0xff]  ;;  %v113_v59 = vld [vmem:[%s2639_s0 + $0xf0] sm:$0xff] }
  0x12   :  { %732 = vmatpush1.bf16.msra.mxu0 %v1528_v5  ;;  %1511 = vmatpush1.bf16.msra.mxu1 %v1528_v5  ;;  %v1895_v5 = vmax.bf16 %v1668_v0, %v130_v54  ;;  %v105_v54 = vld [vmem:[%s2639_s0 + $0xb0] sm:$0xff]  ;;  %v1536_v20 = vld [vmem:[%s2638_s1 + $0x58] sm:$0xff]   ;;  %v2118_v57 = vmax.bf16 %v1668_v0, %v112_v29  ;;  %v1539_v53 = vld [vmem:[%s2638_s1 + $0x40] sm:$0xff]  }
  0x13   :  { %733 = vmatprep.subr.bf16.mxu0 %v1668_v0  ;;  %1496 = vmatprep.subr.bf16.mxu1 %v1668_v0  ;;  %v2004_v49 = vmax.bf16 %v1668_v0, %v105_v54  ;;  %v145_v58 = vld [vmem:[%s2639_s0 + $0x1f0] sm:$0xff]  ;;  %v120_v9 = vld [vmem:[%s2639_s0 + $0x128] sm:$0xff] }
  0x16   :  { %734 = vmatpush1.bf16.msra.mxu0 %v1529_v13  ;;  %1512 = vmatpush1.bf16.msra.mxu1 %v1529_v13  ;;  %v133_v13 = vld [vmem:[%s2639_s0 + $0x190] sm:$0xff] }
  0x17   :  { %735 = vmatprep.subr.bf16.mxu0 %v1668_v0  ;;  %1497 = vmatprep.subr.bf16.mxu1 %v1668_v0  ;;  %v1948_v33 = vmax.bf16 %v1668_v0, %v133_v13  ;;  %v2010_v13 = vmax.bf16 %v1668_v0, %v137_v56  ;;  %v139_v56 = vld [vmem:[%s2639_s0 + $0x1c0] sm:$0xff] }
  0x18   :  { %v2067_v63 = vmax.bf16 %v1668_v0, %v139_v56  ;;  %v111_v56 = vld [vmem:[%s2639_s0 + $0xe0] sm:$0xff] }
  0x19   :  { %v2115_v48 = vmax.bf16 %v1668_v0, %v111_v56  ;;  %v1537_v56 = vld [vmem:[%s2638_s1 + $0x50] sm:$0xff]  }
  0x1a   :  { %736 = vmatpush1.bf16.msra.mxu0 %v1530_v17  ;;  %1513 = vmatpush1.bf16.msra.mxu1 %v1530_v17  ;;  %v1919_v17 = vmax.bf16 %v1668_v0, %v131_v61  ;;  %v1995_v61 = vmax.bf16 %v1668_v0, %v135_v35  ;;  %v108_v35 = vld [vmem:[%s2639_s0 + $0xc8] sm:$0xff] }
  0x1b   :  { %737 = vmatprep.subr.bf16.mxu0 %v1668_v0  ;;  %1498 = vmatprep.subr.bf16.mxu1 %v1668_v0  ;;  %v2064_v15 = vmax.bf16 %v1668_v0, %v108_v35  ;;  %v2082_v35 = vmax.bf16 %v1668_v0, %v142_v21  ;;  %v114_v21 = vld [vmem:[%s2639_s0 + $0xf8] sm:$0xff] }
  0x1e   :  { %738 = vmatpush1.bf16.msra.mxu0 %v1531_v22  ;;  %1514 = vmatpush1.bf16.msra.mxu1 %v1531_v22  ;;  %v141_v22 = vld [vmem:[%s2639_s0 + $0x1d0] sm:$0xff] }
  0x1f   :  { %739 = vmatprep.subr.bf16.mxu0 %v1668_v0  ;;  %1499 = vmatprep.subr.bf16.mxu1 %v1668_v0 }
  0x22   :  { %740 = vmatpush2.bf16.msra.mxu0 %v1532_v40  ;;  %1515 = vmatpush2.bf16.msra.mxu1 %v1532_v40  ;;  %v136_v40 = vld [vmem:[%s2639_s0 + $0x1a8] sm:$0xff] }
  0x23   :  { %741 = vmatprep.subr.bf16.mxu0 %v1668_v0  ;;  %1500 = vmatprep.subr.bf16.mxu1 %v1668_v0 }
  0x26   :  { %742 = vmatpush2.bf16.msra.mxu0 %v1533_v62  ;;  %1516 = vmatpush2.bf16.msra.mxu1 %v1533_v62  ;;  %v2001_v62 = vmax.bf16 %v1668_v0, %v136_v40  ;;  %v2079_v40 = vmax.bf16 %v1668_v0, %v141_v22  ;;  %v2139_v22 = vmax.bf16 %v1668_v0, %v114_v21 }
  0x27   :  { %743 = vmatprep.subr.bf16.mxu0 %v1668_v0  ;;  %1501 = vmatprep.subr.bf16.mxu1 %v1668_v0  ;;  %v2154_v21 = vmax.bf16 %v1668_v0, %v145_v58  ;;  %v1538_v58 = vld [vmem:[%s2638_s1 + $0x48] sm:$0xff]  }
  0x28   :  { %2657 = vst [vmem:[#allocation6_spill] sm:$0xff] %v2139_v22 }
  0x29   :  { %2658 = vst [vmem:[#allocation7_spill] sm:$0xff] %v2154_v21 }
  0x2a   :  { %744 = vmatpush2.bf16.msra.mxu0 %v1534_v19  ;;  %1517 = vmatpush2.bf16.msra.mxu1 %v1534_v19  ;;  %v109_v19 = vld [vmem:[%s2639_s0 + $0xd0] sm:$0xff] }
  0x2b   :  { %745 = vmatprep.subr.bf16.mxu0 %v1668_v0  ;;  %1502 = vmatprep.subr.bf16.mxu1 %v1668_v0  ;;  %v2073_v54 = vmax.bf16 %v1668_v0, %v109_v19  ;;  %v144_v19 = vld [vmem:[%s2639_s0 + $0x1e8] sm:$0xff] }
  0x2c   :  { %v2133_v29 = vmax.bf16 %v1668_v0, %v144_v19  ;;  %v118_v19 = vld [vmem:[%s2639_s0 + $0x118] sm:$0xff] }
  0x2d   :  { %v182_v32 = vmax.bf16 %v1668_v0, %v118_v19  ;;  %v88_v19 = vld [vmem:[%s2639_s0 + $0x28] sm:$0xff] }
  0x2e   :  { %746 = vmatpush2.bf16.msra.mxu0 %v1535_v27  ;;  %1518 = vmatpush2.bf16.msra.mxu1 %v1535_v27  ;;  %v143_v27 = vld [vmem:[%s2639_s0 + $0x1e0] sm:$0xff]  ;;  %2655 = vst [vmem:[#allocation4_spill] sm:$0xff] %v2133_v29 }
  0x2f   :  { %747 = vmatprep.subr.bf16.mxu0 %v1668_v0  ;;  %1503 = vmatprep.subr.bf16.mxu1 %v1668_v0  ;;  %v2121_v60 = vmax.bf16 %v1668_v0, %v143_v27  ;;  %v2136_v27 = vmax.bf16 %v1668_v0, %v113_v59  ;;  %v85_v59 = vld [vmem:[%s2639_s0 + $0x10] sm:$0xff] }
  0x30   :  { %v149_v52 = vmax.bf16 %v1668_v0, %v85_v59  ;;  %v1442_v59 = vcombine.low %v1733_v12, %v1739_v14  ;;  %v152_v12 = vmax.bf16 %v1668_v0, %v88_v19 }
  0x31   :  { %2654 = vst [vmem:[#allocation3_spill] sm:$0xff] %v2121_v60  ;;  %2656 = vst [vmem:[#allocation5_spill] sm:$0xff] %v2136_v27  ;;  %v89_v60 = vld [vmem:[%s2639_s0 + $0x30] sm:$0xff] }
  0x32   :  { %748 = vmatpush2.bf16.msra.mxu0 %v1536_v20  ;;  %1519 = vmatpush2.bf16.msra.mxu1 %v1536_v20  ;;  %v146_v20 = vld [vmem:[%s2639_s0 + $0x1f8] sm:$0xff] }
  0x33   :  { %749 = vmatprep.subr.bf16.mxu0 %v1668_v0  ;;  %1504 = vmatprep.subr.bf16.mxu1 %v1668_v0  ;;  %v2163_v38 = vmax.bf16 %v1668_v0, %v146_v20  ;;  %v86_v20 = vld [vmem:[%s2639_s0 + $0x18] sm:$0xff] }
  0x34   :  { %v150_v37 = vmax.bf16 %v1668_v0, %v86_v20  ;;  %v87_v20 = vld [vmem:[%s2639_s0 + $0x20] sm:$0xff] }
  0x35   :  { %2659 = vst [vmem:[#allocation8_spill] sm:$0xff] %v2163_v38  ;;  %v151_v10 = vmax.bf16 %v1668_v0, %v87_v20 }
  0x36   :  { %750 = vmatpush2.bf16.msra.mxu0 %v1537_v56  ;;  %1520 = vmatpush2.bf16.msra.mxu1 %v1537_v56  ;;  %v117_v56 = vld [vmem:[%s2639_s0 + $0x110] sm:$0xff]  ;;  %v1412_v21 = vcombine.low %v149_v52, %v150_v37 }
  0x37   :  { %751 = vmatprep.subr.bf16.mxu0 %v1668_v0  ;;  %1505 = vmatprep.subr.bf16.mxu1 %v1668_v0  ;;  %v181_v36 = vmax.bf16 %v1668_v0, %v117_v56  ;;  %v119_v56 = vld [vmem:[%s2639_s0 + $0x120] sm:$0xff]  ;;  %v1415_v27 = vcombine.high %v151_v10, %v152_v12 }
  0x38   :  { %v183_v14 = vmax.bf16 %v1668_v0, %v119_v56 }
  0x39   :  { %v1445_v38 = vcombine.high %v181_v36, %v182_v32  ;;  %v1444_v22 = vcombine.low %v181_v36, %v182_v32  ;;  %v153_v32 = vmax.bf16 %v1668_v0, %v89_v60  ;;  %v2660_v60 = vcombine.high %v1768_v23, %v1771_v24 }
  0x3a   :  { %752 = vmatpush2.bf16.msra.mxu0 %v1538_v58  ;;  %1521 = vmatpush2.bf16.msra.mxu1 %v1538_v58  ;;  %v1413_v58 = vcombine.high %v149_v52, %v150_v37 }
  0x3b   :  { %753 = vmatprep.subr.bf16.mxu0 %v1668_v0  ;;  %1506 = vmatprep.subr.bf16.mxu1 %v1668_v0 }
  0x3e   :  { %754 = vmatpush2.bf16.msra.mxu0 %v1539_v53  ;;  %1522 = vmatpush2.bf16.msra.mxu1 %v1539_v53  ;;  %v184_v53 = vmax.bf16 %v1668_v0, %v120_v9  ;;  %v2664_v9 = vcombine.high %v1814_v39, %v1820_v41 }
  0x40   :  { %v1447_v29 = vcombine.high %v183_v14, %v184_v53  ;;  %v1446_v20 = vcombine.low %v183_v14, %v184_v53  ;;  %v2704_v53 = vcombine.low %v2115_v48, %v2118_v57 }
  0x41   :  { %756 = vmatmul.mubr.bf16.vlgmr.msra.gmra.mxu0 %v1410_v51  ;;  %884 = vmatmul.mubr.bf16.vlgmr.msra.gmra.mxu1 %v1442_v59  ;;  %v90_v51 = vld [vmem:[%s2639_s0 + $0x38] sm:$0xff] }
  0x42   :  { %763 = vmatprep.mubr.bf16.mxu0 %v1413_v58  ;;  %891 = vmatprep.mubr.bf16.mxu1 %v1445_v38  ;;  %v121_v38 = vld [vmem:[%s2639_s0 + $0x130] sm:$0xff]  ;;  %v122_v59 = vld [vmem:[%s2639_s0 + $0x138] sm:$0xff]  ;;  %v154_v36 = vmax.bf16 %v1668_v0, %v90_v51  ;;  %v1414_v58 = vcombine.low %v151_v10, %v152_v12  ;;  %v2665_v10 = vcombine.high %v1823_v42, %v1826_v43 }
  0x43   :  { %v185_v37 = vmax.bf16 %v1668_v0, %v121_v38  ;;  %v186_v52 = vmax.bf16 %v1668_v0, %v122_v59  ;;  %v2662_v0 = vcombine.low %v1768_v23, %v1771_v24  ;;  %v2666_v12 = vcombine.low %v1814_v39, %v1820_v41  ;;  %v2707_v51 = vld [vmem:[#allocation6_spill] sm:$0xff]  ;;  %v2710_v38 = vld [vmem:[#allocation8_spill] sm:$0xff] }
  0x44   :  { %v1417_v19 = vcombine.high %v153_v32, %v154_v36  ;;  %v2667_v23 = vcombine.low %v1823_v42, %v1826_v43  ;;  %v2668_v24 = vcombine.high %v1829_v44, %v1832_v45  ;;  %v2671_v39 = vcombine.low %v1835_v46, %v1838_v47 }
  0x45   :  { %v1449_v56 = vcombine.high %v185_v37, %v186_v52  ;;  %v2672_v41 = vcombine.high %v1883_v1, %v1886_v2  ;;  %v2673_v42 = vcombine.high %v1889_v3, %v1895_v5  ;;  %v2674_v43 = vcombine.low %v1883_v1, %v1886_v2 }
  0x46   :  { %v2679_v1 = vcombine.low %v1919_v17, %v1934_v26  ;;  %v2680_v2 = vcombine.high %v1942_v30, %v1945_v31 }
  0x49   :  { %764 = vmatmul.mubr.bf16.gmra.mxu0 %v1412_v21  ;;  %892 = vmatmul.mubr.bf16.gmra.mxu1 %v1444_v22  ;;  %v1416_v21 = vcombine.low %v153_v32, %v154_v36  ;;  %v1448_v22 = vcombine.low %v185_v37, %v186_v52 }
  0x4a   :  { %771 = vmatprep.mubr.bf16.mxu0 %v1415_v27  ;;  %899 = vmatprep.mubr.bf16.mxu1 %v1447_v29  ;;  %v2661_v29 = vcombine.high %v1774_v25, %v1783_v28  ;;  %v2663_v27 = vcombine.low %v1774_v25, %v1783_v28  ;;  %v2669_v25 = vcombine.high %v1835_v46, %v1838_v47 }
  0x4b   :  { %v2670_v28 = vcombine.low %v1829_v44, %v1832_v45  ;;  %v2675_v44 = vcombine.low %v1889_v3, %v1895_v5  ;;  %v2676_v45 = vcombine.high %v1898_v6, %v1901_v7  ;;  %v2677_v46 = vcombine.high %v1919_v17, %v1934_v26 }
  0x4c   :  { %v2678_v47 = vcombine.low %v1898_v6, %v1901_v7  ;;  %v2681_v3 = vcombine.high %v1948_v33, %v1964_v50  ;;  %v2682_v5 = vcombine.low %v1942_v30, %v1945_v31  ;;  %v2683_v6 = vcombine.low %v1948_v33, %v1964_v50 }
  0x4d   :  { %v2684_v7 = vcombine.high %v1982_v4, %v1992_v18  ;;  %v2685_v17 = vcombine.high %v1995_v61, %v2001_v62  ;;  %v2686_v26 = vcombine.low %v1982_v4, %v1992_v18  ;;  %v2687_v30 = vcombine.low %v1995_v61, %v2001_v62 }
  0x4e   :  { %v2688_v31 = vcombine.high %v2004_v49, %v2007_v11  ;;  %v2689_v33 = vcombine.high %v2010_v13, %v2023_v55  ;;  %v2690_v50 = vcombine.low %v2004_v49, %v2007_v11  ;;  %v2691_v4 = vcombine.low %v2010_v13, %v2023_v55 }
  0x4f   :  { %v2692_v61 = vcombine.high %v2058_v16, %v2064_v15  ;;  %v2693_v62 = vcombine.high %v2067_v63, %v2070_v8  ;;  %v2694_v18 = vcombine.low %v2058_v16, %v2064_v15  ;;  %v2695_v49 = vcombine.low %v2067_v63, %v2070_v8  ;;  %v2701_v16 = vld [vmem:[#allocation3_spill] sm:$0xff]  ;;  %v2702_v8 = vld [vmem:[#allocation4_spill] sm:$0xff] }
  0x50   :  { %v2696_v11 = vcombine.high %v2073_v54, %v2076_v34  ;;  %v2697_v13 = vcombine.high %v2079_v40, %v2082_v35  ;;  %v2698_v55 = vcombine.low %v2073_v54, %v2076_v34  ;;  %v2699_v15 = vcombine.low %v2079_v40, %v2082_v35  ;;  %v2706_v34 = vld [vmem:[#allocation5_spill] sm:$0xff]  ;;  %v2709_v35 = vld [vmem:[#allocation7_spill] sm:$0xff] }
  0x51   :  { %772 = vmatmul.mubr.bf16.gmra.mxu0 %v1414_v58  ;;  %900 = vmatmul.mubr.bf16.gmra.mxu1 %v1446_v20  ;;  %v2700_v63 = vcombine.high %v2115_v48, %v2118_v57  ;;  %v2703_v14 = vcombine.high %v2701_v16, %v2702_v8  ;;  %v2705_v54 = vcombine.low %v2701_v16, %v2702_v8  ;;  %v2380_v48 = vld [vmem:[%s2640_s2] ss:$0 sm:$0xff] }
  0x52   :  { %779 = vmatprep.mubr.bf16.mxu0 %v1417_v19  ;;  %907 = vmatprep.mubr.bf16.mxu1 %v1449_v56  ;;  %v2708_v40 = vcombine.high %v2706_v34, %v2707_v51  ;;  %v2711_v59 = vcombine.high %v2709_v35, %v2710_v38  ;;  %v2712_v32 = vcombine.low %v2706_v34, %v2707_v51 }
  0x53   :  { %v2713_v57 = vcombine.low %v2709_v35, %v2710_v38 }
  0x59   :  { %780 = vmatmul.mubr.bf16.gmra.mxu0 %v1416_v21  ;;  %908 = vmatmul.mubr.bf16.gmra.mxu1 %v1448_v22 }
  0x5a   :  { %787 = vmatprep.mubr.bf16.mxu0 %v2660_v60  ;;  %915 = vmatprep.mubr.bf16.mxu1 %v2661_v29 }
  0x61   :  { %788 = vmatmul.mubr.bf16.gmra.mxu0 %v2662_v0  ;;  %916 = vmatmul.mubr.bf16.gmra.mxu1 %v2663_v27 }
  0x62   :  { %795 = vmatprep.mubr.bf16.mxu0 %v2664_v9  ;;  %923 = vmatprep.mubr.bf16.mxu1 %v2665_v10 }
  0x69   :  { %796 = vmatmul.mubr.bf16.gmra.mxu0 %v2666_v12  ;;  %924 = vmatmul.mubr.bf16.gmra.mxu1 %v2667_v23 }
  0x6a   :  { %803 = vmatprep.mubr.bf16.mxu0 %v2668_v24  ;;  %931 = vmatprep.mubr.bf16.mxu1 %v2669_v25 }
  0x71   :  { %804 = vmatmul.mubr.bf16.gmra.mxu0 %v2670_v28  ;;  %932 = vmatmul.mubr.bf16.gmra.mxu1 %v2671_v39 }
  0x72   :  { %811 = vmatprep.mubr.bf16.mxu0 %v2672_v41  ;;  %939 = vmatprep.mubr.bf16.mxu1 %v2673_v42 }
  0x79   :  { %812 = vmatmul.mubr.bf16.gmra.mxu0 %v2674_v43  ;;  %940 = vmatmul.mubr.bf16.gmra.mxu1 %v2675_v44 }
  0x7a   :  { %819 = vmatprep.mubr.bf16.mxu0 %v2676_v45  ;;  %947 = vmatprep.mubr.bf16.mxu1 %v2677_v46 }
  0x81   :  { %820 = vmatmul.mubr.bf16.gmra.mxu0 %v2678_v47  ;;  %948 = vmatmul.mubr.bf16.gmra.mxu1 %v2679_v1 }
  0x82   :  { %827 = vmatprep.mubr.bf16.mxu0 %v2680_v2  ;;  %955 = vmatprep.mubr.bf16.mxu1 %v2681_v3 }
  0x89   :  { %828 = vmatmul.mubr.bf16.gmra.mxu0 %v2682_v5  ;;  %956 = vmatmul.mubr.bf16.gmra.mxu1 %v2683_v6 }
  0x8a   :  { %835 = vmatprep.mubr.bf16.mxu0 %v2684_v7  ;;  %963 = vmatprep.mubr.bf16.mxu1 %v2685_v17 }
  0x91   :  { %836 = vmatmul.mubr.bf16.gmra.mxu0 %v2686_v26  ;;  %964 = vmatmul.mubr.bf16.gmra.mxu1 %v2687_v30 }
  0x92   :  { %843 = vmatprep.mubr.bf16.mxu0 %v2688_v31  ;;  %971 = vmatprep.mubr.bf16.mxu1 %v2689_v33 }
  0x99   :  { %844 = vmatmul.mubr.bf16.gmra.mxu0 %v2690_v50  ;;  %972 = vmatmul.mubr.bf16.gmra.mxu1 %v2691_v4 }
  0x9a   :  { %851 = vmatprep.mubr.bf16.mxu0 %v2692_v61  ;;  %979 = vmatprep.mubr.bf16.mxu1 %v2693_v62 }
  0xa1   :  { %852 = vmatmul.mubr.bf16.gmra.mxu0 %v2694_v18  ;;  %980 = vmatmul.mubr.bf16.gmra.mxu1 %v2695_v49 }
  0xa2   :  { %859 = vmatprep.mubr.bf16.mxu0 %v2696_v11  ;;  %987 = vmatprep.mubr.bf16.mxu1 %v2697_v13 }
  0xa9   :  { %860 = vmatmul.mubr.bf16.gmra.mxu0 %v2698_v55  ;;  %988 = vmatmul.mubr.bf16.gmra.mxu1 %v2699_v15 }
  0xaa   :  { %867 = vmatprep.mubr.bf16.mxu0 %v2700_v63  ;;  %995 = vmatprep.mubr.bf16.mxu1 %v2703_v14 }
  0xb1   :  { %868 = vmatmul.mubr.bf16.gmra.mxu0 %v2704_v53  ;;  %996 = vmatmul.mubr.bf16.gmra.mxu1 %v2705_v54 }
  0xb2   :  { %875 = vmatprep.mubr.bf16.mxu0 %v2708_v40  ;;  %1003 = vmatprep.mubr.bf16.mxu1 %v2711_v59 }
  0xb9   :  { %876 = vmatmul.mubr.bf16.gmra.mxu0 %v2712_v32  ;;  %1004 = vmatmul.mubr.bf16.gmra.mxu1 %v2713_v57 }
 0x101   :  { %v757_v36 = vpop.f32.mrf.mxu0  ;;  %v885_v37 = vpop.f32.mrf.mxu1 }
 0x102   :  { %v1214_v52 = vadd.f32 %v2380_v48, %v757_v36  ;;  %v1246_v58 = vadd.f32 %v2380_v48, %v885_v37 }
 0x103   :  { %v759_v20 = vpop.f32.mrf.mxu0  ;;  %v887_v19 = vpop.f32.mrf.mxu1 }
 0x104   :  { %1540 = vtanh.f32 %v1214_v52 }
 0x105   :  { %1542 = vtanh.f32 %v1246_v58  ;;  %v760_v56 = vpop.f32.mrf.mxu0  ;;  %v888_v21 = vpop.f32.mrf.mxu1 }
 0x106   :  { %v1215_v22 = vadd.f32 %v2380_v48, %v760_v56  ;;  %v1247_v60 = vadd.f32 %v2380_v48, %v888_v21 }
 0x107   :  { %v762_v29 = vpop.f32.mrf.mxu0  ;;  %v890_v0 = vpop.f32.mrf.mxu1 }
 0x108   :  { %1544 = vtanh.f32 %v1215_v22 }
 0x109   :  { %1546 = vtanh.f32 %v1247_v60  ;;  %v765_v27 = vpop.f32.mrf.mxu0  ;;  %v893_v9 = vpop.f32.mrf.mxu1 }
 0x10a   :  { %v1216_v10 = vadd.f32 %v2380_v48, %v765_v27  ;;  %v1248_v12 = vadd.f32 %v2380_v48, %v893_v9 }
 0x10b   :  { %v767_v23 = vpop.f32.mrf.mxu0  ;;  %v895_v24 = vpop.f32.mrf.mxu1 }
 0x10c   :  { %1548 = vtanh.f32 %v1216_v10 }
 0x10d   :  { %1550 = vtanh.f32 %v1248_v12  ;;  %v768_v25 = vpop.f32.mrf.mxu0  ;;  %v896_v28 = vpop.f32.mrf.mxu1 }
 0x10e   :  { %v1217_v39 = vadd.f32 %v2380_v48, %v768_v25  ;;  %v1249_v41 = vadd.f32 %v2380_v48, %v896_v28 }
 0x10f   :  { %v770_v42 = vpop.f32.mrf.mxu0  ;;  %v898_v43 = vpop.f32.mrf.mxu1 }
 0x110   :  { %1552 = vtanh.f32 %v1217_v39 }
 0x111   :  { %v1541_v44 = vpop.eup %1540  ;;  %1554 = vtanh.f32 %v1249_v41  ;;  %v773_v45 = vpop.f32.mrf.mxu0 }
 0x112   :  { %v901_v46 = vpop.f32.mrf.mxu1  ;;  %v1543_v47 = vpop.eup %1542  ;;  %1342 = vst [vmem:[%s2641_s3] sm:$0xff] %v1541_v44  ;;  %v1218_v1 = vadd.f32 %v2380_v48, %v773_v45 }
 0x113   :  { %v1250_v2 = vadd.f32 %v2380_v48, %v901_v46  ;;  %1374 = vst [vmem:[%s2641_s3 + $0x100] sm:$0xff] %v1543_v47  ;;  %v775_v3 = vpop.f32.mrf.mxu0 }
 0x114   :  { %v903_v5 = vpop.f32.mrf.mxu1  ;;  %1556 = vtanh.f32 %v1218_v1 }
 0x115   :  { %v1545_v6 = vpop.eup %1544  ;;  %1558 = vtanh.f32 %v1250_v2  ;;  %v776_v7 = vpop.f32.mrf.mxu0 }
 0x116   :  { %v904_v17 = vpop.f32.mrf.mxu1  ;;  %v1547_v26 = vpop.eup %1546  ;;  %1343 = vst [vmem:[%s2641_s3 + $0x8] sm:$0xff] %v1545_v6  ;;  %v1219_v30 = vadd.f32 %v2380_v48, %v776_v7 }
 0x117   :  { %v1251_v31 = vadd.f32 %v2380_v48, %v904_v17  ;;  %1375 = vst [vmem:[%s2641_s3 + $0x108] sm:$0xff] %v1547_v26  ;;  %v778_v33 = vpop.f32.mrf.mxu0 }
 0x118   :  { %v906_v50 = vpop.f32.mrf.mxu1  ;;  %1560 = vtanh.f32 %v1219_v30 }
 0x119   :  { %v1549_v4 = vpop.eup %1548  ;;  %1562 = vtanh.f32 %v1251_v31  ;;  %v781_v61 = vpop.f32.mrf.mxu0 }
 0x11a   :  { %v909_v62 = vpop.f32.mrf.mxu1  ;;  %v1551_v18 = vpop.eup %1550  ;;  %1344 = vst [vmem:[%s2641_s3 + $0x10] sm:$0xff] %v1549_v4  ;;  %v1220_v49 = vadd.f32 %v2380_v48, %v781_v61 }
 0x11b   :  { %v1252_v11 = vadd.f32 %v2380_v48, %v909_v62  ;;  %1376 = vst [vmem:[%s2641_s3 + $0x110] sm:$0xff] %v1551_v18  ;;  %v783_v13 = vpop.f32.mrf.mxu0 }
 0x11c   :  { %v911_v55 = vpop.f32.mrf.mxu1  ;;  %1564 = vtanh.f32 %v1220_v49 }
 0x11d   :  { %v1553_v15 = vpop.eup %1552  ;;  %1566 = vtanh.f32 %v1252_v11  ;;  %v784_v63 = vpop.f32.mrf.mxu0 }
 0x11e   :  { %v912_v16 = vpop.f32.mrf.mxu1  ;;  %v1555_v8 = vpop.eup %1554  ;;  %1345 = vst [vmem:[%s2641_s3 + $0x18] sm:$0xff] %v1553_v15  ;;  %v1221_v14 = vadd.f32 %v2380_v48, %v784_v63 }
 0x11f   :  { %v1253_v53 = vadd.f32 %v2380_v48, %v912_v16  ;;  %1377 = vst [vmem:[%s2641_s3 + $0x118] sm:$0xff] %v1555_v8  ;;  %v786_v54 = vpop.f32.mrf.mxu0 }
 0x120   :  { %v914_v34 = vpop.f32.mrf.mxu1  ;;  %1568 = vtanh.f32 %v1221_v14 }
 0x121   :  { %v1557_v51 = vpop.eup %1556  ;;  %1570 = vtanh.f32 %v1253_v53  ;;  %v789_v40 = vpop.f32.mrf.mxu0 }
 0x122   :  { %v917_v35 = vpop.f32.mrf.mxu1  ;;  %v1559_v38 = vpop.eup %1558  ;;  %1346 = vst [vmem:[%s2641_s3 + $0x20] sm:$0xff] %v1557_v51  ;;  %v1222_v59 = vadd.f32 %v2380_v48, %v789_v40 }
 0x123   :  { %v1254_v32 = vadd.f32 %v2380_v48, %v917_v35  ;;  %1378 = vst [vmem:[%s2641_s3 + $0x120] sm:$0xff] %v1559_v38  ;;  %v791_v57 = vpop.f32.mrf.mxu0 }
 0x124   :  { %v919_v36 = vpop.f32.mrf.mxu1  ;;  %1572 = vtanh.f32 %v1222_v59 }
 0x125   :  { %v1561_v37 = vpop.eup %1560  ;;  %1574 = vtanh.f32 %v1254_v32  ;;  %v792_v52 = vpop.f32.mrf.mxu0 }
 0x126   :  { %v920_v58 = vpop.f32.mrf.mxu1  ;;  %v1563_v20 = vpop.eup %1562  ;;  %1347 = vst [vmem:[%s2641_s3 + $0x28] sm:$0xff] %v1561_v37  ;;  %v1223_v19 = vadd.f32 %v2380_v48, %v792_v52 }
 0x127   :  { %v1255_v56 = vadd.f32 %v2380_v48, %v920_v58  ;;  %1379 = vst [vmem:[%s2641_s3 + $0x128] sm:$0xff] %v1563_v20  ;;  %v794_v21 = vpop.f32.mrf.mxu0 }
 0x128   :  { %v922_v22 = vpop.f32.mrf.mxu1  ;;  %1576 = vtanh.f32 %v1223_v19 }
 0x129   :  { %v1565_v60 = vpop.eup %1564  ;;  %1578 = vtanh.f32 %v1255_v56  ;;  %v797_v29 = vpop.f32.mrf.mxu0 }
 0x12a   :  { %v925_v0 = vpop.f32.mrf.mxu1  ;;  %v1567_v27 = vpop.eup %1566  ;;  %1348 = vst [vmem:[%s2641_s3 + $0x30] sm:$0xff] %v1565_v60  ;;  %v1224_v9 = vadd.f32 %v2380_v48, %v797_v29 }
 0x12b   :  { %v1256_v10 = vadd.f32 %v2380_v48, %v925_v0  ;;  %1380 = vst [vmem:[%s2641_s3 + $0x130] sm:$0xff] %v1567_v27  ;;  %v799_v12 = vpop.f32.mrf.mxu0 }
 0x12c   :  { %v927_v23 = vpop.f32.mrf.mxu1  ;;  %1580 = vtanh.f32 %v1224_v9 }
 0x12d   :  { %v1569_v24 = vpop.eup %1568  ;;  %1582 = vtanh.f32 %v1256_v10  ;;  %v800_v25 = vpop.f32.mrf.mxu0 }
 0x12e   :  { %v928_v28 = vpop.f32.mrf.mxu1  ;;  %v1571_v39 = vpop.eup %1570  ;;  %1349 = vst [vmem:[%s2641_s3 + $0x38] sm:$0xff] %v1569_v24  ;;  %v1225_v41 = vadd.f32 %v2380_v48, %v800_v25 }
 0x12f   :  { %v1257_v42 = vadd.f32 %v2380_v48, %v928_v28  ;;  %1381 = vst [vmem:[%s2641_s3 + $0x138] sm:$0xff] %v1571_v39  ;;  %v802_v43 = vpop.f32.mrf.mxu0 }
 0x130   :  { %v930_v44 = vpop.f32.mrf.mxu1  ;;  %1584 = vtanh.f32 %v1225_v41 }
 0x131   :  { %v1573_v45 = vpop.eup %1572  ;;  %1586 = vtanh.f32 %v1257_v42  ;;  %v805_v46 = vpop.f32.mrf.mxu0 }
 0x132   :  { %v933_v47 = vpop.f32.mrf.mxu1  ;;  %v1575_v1 = vpop.eup %1574  ;;  %1350 = vst [vmem:[%s2641_s3 + $0x40] sm:$0xff] %v1573_v45  ;;  %v1226_v2 = vadd.f32 %v2380_v48, %v805_v46 }
 0x133   :  { %v1258_v3 = vadd.f32 %v2380_v48, %v933_v47  ;;  %1382 = vst [vmem:[%s2641_s3 + $0x140] sm:$0xff] %v1575_v1  ;;  %v807_v5 = vpop.f32.mrf.mxu0 }
 0x134   :  { %v935_v6 = vpop.f32.mrf.mxu1  ;;  %1588 = vtanh.f32 %v1226_v2 }
 0x135   :  { %v1577_v7 = vpop.eup %1576  ;;  %1590 = vtanh.f32 %v1258_v3  ;;  %v808_v17 = vpop.f32.mrf.mxu0 }
 0x136   :  { %v936_v26 = vpop.f32.mrf.mxu1  ;;  %v1579_v30 = vpop.eup %1578  ;;  %1351 = vst [vmem:[%s2641_s3 + $0x48] sm:$0xff] %v1577_v7  ;;  %v1227_v31 = vadd.f32 %v2380_v48, %v808_v17 }
 0x137   :  { %v1259_v33 = vadd.f32 %v2380_v48, %v936_v26  ;;  %1383 = vst [vmem:[%s2641_s3 + $0x148] sm:$0xff] %v1579_v30  ;;  %v810_v50 = vpop.f32.mrf.mxu0 }
 0x138   :  { %v938_v4 = vpop.f32.mrf.mxu1  ;;  %1592 = vtanh.f32 %v1227_v31 }
 0x139   :  { %v1581_v61 = vpop.eup %1580  ;;  %1594 = vtanh.f32 %v1259_v33  ;;  %v813_v62 = vpop.f32.mrf.mxu0 }
 0x13a   :  { %v941_v18 = vpop.f32.mrf.mxu1  ;;  %v1583_v49 = vpop.eup %1582  ;;  %1352 = vst [vmem:[%s2641_s3 + $0x50] sm:$0xff] %v1581_v61  ;;  %v1228_v11 = vadd.f32 %v2380_v48, %v813_v62 }
 0x13b   :  { %v1260_v13 = vadd.f32 %v2380_v48, %v941_v18  ;;  %1384 = vst [vmem:[%s2641_s3 + $0x150] sm:$0xff] %v1583_v49  ;;  %v815_v55 = vpop.f32.mrf.mxu0 }
 0x13c   :  { %v943_v15 = vpop.f32.mrf.mxu1  ;;  %1596 = vtanh.f32 %v1228_v11 }
 0x13d   :  { %v1585_v63 = vpop.eup %1584  ;;  %1598 = vtanh.f32 %v1260_v13  ;;  %v816_v16 = vpop.f32.mrf.mxu0 }
 0x13e   :  { %v944_v8 = vpop.f32.mrf.mxu1  ;;  %v1587_v14 = vpop.eup %1586  ;;  %1353 = vst [vmem:[%s2641_s3 + $0x58] sm:$0xff] %v1585_v63  ;;  %v1229_v53 = vadd.f32 %v2380_v48, %v816_v16 }
 0x13f   :  { %v1261_v54 = vadd.f32 %v2380_v48, %v944_v8  ;;  %1385 = vst [vmem:[%s2641_s3 + $0x158] sm:$0xff] %v1587_v14  ;;  %v818_v34 = vpop.f32.mrf.mxu0 }
 0x140   :  { %v946_v51 = vpop.f32.mrf.mxu1  ;;  %1600 = vtanh.f32 %v1229_v53 }
 0x141   :  { %v1589_v40 = vpop.eup %1588  ;;  %1602 = vtanh.f32 %v1261_v54  ;;  %v821_v35 = vpop.f32.mrf.mxu0 }
 0x142   :  { %v949_v38 = vpop.f32.mrf.mxu1  ;;  %v1591_v59 = vpop.eup %1590  ;;  %1354 = vst [vmem:[%s2641_s3 + $0x60] sm:$0xff] %v1589_v40  ;;  %v1230_v32 = vadd.f32 %v2380_v48, %v821_v35 }
 0x143   :  { %v1262_v57 = vadd.f32 %v2380_v48, %v949_v38  ;;  %1386 = vst [vmem:[%s2641_s3 + $0x160] sm:$0xff] %v1591_v59  ;;  %v823_v36 = vpop.f32.mrf.mxu0 }
 0x144   :  { %v951_v37 = vpop.f32.mrf.mxu1  ;;  %1604 = vtanh.f32 %v1230_v32 }
 0x145   :  { %v1593_v52 = vpop.eup %1592  ;;  %1606 = vtanh.f32 %v1262_v57  ;;  %v824_v58 = vpop.f32.mrf.mxu0 }
 0x146   :  { %v952_v20 = vpop.f32.mrf.mxu1  ;;  %v1595_v19 = vpop.eup %1594  ;;  %1355 = vst [vmem:[%s2641_s3 + $0x68] sm:$0xff] %v1593_v52  ;;  %v1231_v56 = vadd.f32 %v2380_v48, %v824_v58 }
 0x147   :  { %v1263_v21 = vadd.f32 %v2380_v48, %v952_v20  ;;  %1387 = vst [vmem:[%s2641_s3 + $0x168] sm:$0xff] %v1595_v19  ;;  %v826_v22 = vpop.f32.mrf.mxu0 }
 0x148   :  { %v954_v60 = vpop.f32.mrf.mxu1  ;;  %1608 = vtanh.f32 %v1231_v56 }
 0x149   :  { %v1597_v29 = vpop.eup %1596  ;;  %1610 = vtanh.f32 %v1263_v21  ;;  %v829_v0 = vpop.f32.mrf.mxu0 }
 0x14a   :  { %v957_v27 = vpop.f32.mrf.mxu1  ;;  %v1599_v9 = vpop.eup %1598  ;;  %1356 = vst [vmem:[%s2641_s3 + $0x70] sm:$0xff] %v1597_v29  ;;  %v1232_v10 = vadd.f32 %v2380_v48, %v829_v0 }
 0x14b   :  { %v1264_v12 = vadd.f32 %v2380_v48, %v957_v27  ;;  %1388 = vst [vmem:[%s2641_s3 + $0x170] sm:$0xff] %v1599_v9  ;;  %v831_v23 = vpop.f32.mrf.mxu0 }
 0x14c   :  { %v959_v24 = vpop.f32.mrf.mxu1  ;;  %1612 = vtanh.f32 %v1232_v10 }
 0x14d   :  { %v1601_v25 = vpop.eup %1600  ;;  %1614 = vtanh.f32 %v1264_v12  ;;  %v832_v28 = vpop.f32.mrf.mxu0 }
 0x14e   :  { %v960_v39 = vpop.f32.mrf.mxu1  ;;  %v1603_v41 = vpop.eup %1602  ;;  %1357 = vst [vmem:[%s2641_s3 + $0x78] sm:$0xff] %v1601_v25  ;;  %v1233_v42 = vadd.f32 %v2380_v48, %v832_v28 }
 0x14f   :  { %v1265_v43 = vadd.f32 %v2380_v48, %v960_v39  ;;  %1389 = vst [vmem:[%s2641_s3 + $0x178] sm:$0xff] %v1603_v41  ;;  %v834_v44 = vpop.f32.mrf.mxu0 }
 0x150   :  { %v962_v45 = vpop.f32.mrf.mxu1  ;;  %1616 = vtanh.f32 %v1233_v42 }
 0x151   :  { %v1605_v46 = vpop.eup %1604  ;;  %1618 = vtanh.f32 %v1265_v43  ;;  %v837_v47 = vpop.f32.mrf.mxu0 }
 0x152   :  { %v965_v1 = vpop.f32.mrf.mxu1  ;;  %v1607_v2 = vpop.eup %1606  ;;  %1358 = vst [vmem:[%s2641_s3 + $0x80] sm:$0xff] %v1605_v46  ;;  %v1234_v3 = vadd.f32 %v2380_v48, %v837_v47 }
 0x153   :  { %v1266_v5 = vadd.f32 %v2380_v48, %v965_v1  ;;  %1390 = vst [vmem:[%s2641_s3 + $0x180] sm:$0xff] %v1607_v2  ;;  %v839_v6 = vpop.f32.mrf.mxu0 }
 0x154   :  { %v967_v7 = vpop.f32.mrf.mxu1  ;;  %1620 = vtanh.f32 %v1234_v3 }
 0x155   :  { %v1609_v17 = vpop.eup %1608  ;;  %1622 = vtanh.f32 %v1266_v5  ;;  %v840_v26 = vpop.f32.mrf.mxu0 }
 0x156   :  { %v968_v30 = vpop.f32.mrf.mxu1  ;;  %v1611_v31 = vpop.eup %1610  ;;  %1359 = vst [vmem:[%s2641_s3 + $0x88] sm:$0xff] %v1609_v17  ;;  %v1235_v33 = vadd.f32 %v2380_v48, %v840_v26 }
 0x157   :  { %v1267_v50 = vadd.f32 %v2380_v48, %v968_v30  ;;  %1391 = vst [vmem:[%s2641_s3 + $0x188] sm:$0xff] %v1611_v31  ;;  %v842_v4 = vpop.f32.mrf.mxu0 }
 0x158   :  { %v970_v61 = vpop.f32.mrf.mxu1  ;;  %1624 = vtanh.f32 %v1235_v33 }
 0x159   :  { %v1613_v62 = vpop.eup %1612  ;;  %1626 = vtanh.f32 %v1267_v50  ;;  %v845_v18 = vpop.f32.mrf.mxu0 }
 0x15a   :  { %v973_v49 = vpop.f32.mrf.mxu1  ;;  %v1615_v11 = vpop.eup %1614  ;;  %1360 = vst [vmem:[%s2641_s3 + $0x90] sm:$0xff] %v1613_v62  ;;  %v1236_v13 = vadd.f32 %v2380_v48, %v845_v18 }
 0x15b   :  { %v1268_v55 = vadd.f32 %v2380_v48, %v973_v49  ;;  %1392 = vst [vmem:[%s2641_s3 + $0x190] sm:$0xff] %v1615_v11  ;;  %v847_v15 = vpop.f32.mrf.mxu0 }
 0x15c   :  { %v975_v63 = vpop.f32.mrf.mxu1  ;;  %1628 = vtanh.f32 %v1236_v13 }
 0x15d   :  { %v1617_v16 = vpop.eup %1616  ;;  %1630 = vtanh.f32 %v1268_v55  ;;  %v848_v8 = vpop.f32.mrf.mxu0 }
 0x15e   :  { %v976_v14 = vpop.f32.mrf.mxu1  ;;  %v1619_v53 = vpop.eup %1618  ;;  %1361 = vst [vmem:[%s2641_s3 + $0x98] sm:$0xff] %v1617_v16  ;;  %v1237_v54 = vadd.f32 %v2380_v48, %v848_v8 }
 0x15f   :  { %v1269_v34 = vadd.f32 %v2380_v48, %v976_v14  ;;  %1393 = vst [vmem:[%s2641_s3 + $0x198] sm:$0xff] %v1619_v53  ;;  %v850_v51 = vpop.f32.mrf.mxu0 }
 0x160   :  { %v978_v40 = vpop.f32.mrf.mxu1  ;;  %1632 = vtanh.f32 %v1237_v54 }
 0x161   :  { %v1621_v35 = vpop.eup %1620  ;;  %1634 = vtanh.f32 %v1269_v34  ;;  %v853_v38 = vpop.f32.mrf.mxu0 }
 0x162   :  { %v981_v59 = vpop.f32.mrf.mxu1  ;;  %v1623_v32 = vpop.eup %1622  ;;  %1362 = vst [vmem:[%s2641_s3 + $0xa0] sm:$0xff] %v1621_v35  ;;  %v1238_v57 = vadd.f32 %v2380_v48, %v853_v38 }
 0x163   :  { %v1270_v36 = vadd.f32 %v2380_v48, %v981_v59  ;;  %1394 = vst [vmem:[%s2641_s3 + $0x1a0] sm:$0xff] %v1623_v32  ;;  %v855_v37 = vpop.f32.mrf.mxu0 }
 0x164   :  { %v983_v52 = vpop.f32.mrf.mxu1  ;;  %1636 = vtanh.f32 %v1238_v57 }
 0x165   :  { %v1625_v58 = vpop.eup %1624  ;;  %1638 = vtanh.f32 %v1270_v36  ;;  %v856_v20 = vpop.f32.mrf.mxu0 }
 0x166   :  { %v984_v19 = vpop.f32.mrf.mxu1  ;;  %v1627_v56 = vpop.eup %1626  ;;  %1363 = vst [vmem:[%s2641_s3 + $0xa8] sm:$0xff] %v1625_v58  ;;  %v1239_v21 = vadd.f32 %v2380_v48, %v856_v20 }
 0x167   :  { %v1271_v22 = vadd.f32 %v2380_v48, %v984_v19  ;;  %1395 = vst [vmem:[%s2641_s3 + $0x1a8] sm:$0xff] %v1627_v56  ;;  %v858_v60 = vpop.f32.mrf.mxu0 }
 0x168   :  { %v986_v29 = vpop.f32.mrf.mxu1  ;;  %1640 = vtanh.f32 %v1239_v21 }
 0x169   :  { %v1629_v0 = vpop.eup %1628  ;;  %1642 = vtanh.f32 %v1271_v22  ;;  %v861_v27 = vpop.f32.mrf.mxu0 }
 0x16a   :  { %v989_v9 = vpop.f32.mrf.mxu1  ;;  %v1631_v10 = vpop.eup %1630  ;;  %1364 = vst [vmem:[%s2641_s3 + $0xb0] sm:$0xff] %v1629_v0  ;;  %v1240_v12 = vadd.f32 %v2380_v48, %v861_v27 }
 0x16b   :  { %v1272_v23 = vadd.f32 %v2380_v48, %v989_v9  ;;  %1396 = vst [vmem:[%s2641_s3 + $0x1b0] sm:$0xff] %v1631_v10  ;;  %v863_v24 = vpop.f32.mrf.mxu0 }
 0x16c   :  { %v991_v25 = vpop.f32.mrf.mxu1  ;;  %1644 = vtanh.f32 %v1240_v12 }
 0x16d   :  { %v1633_v28 = vpop.eup %1632  ;;  %1646 = vtanh.f32 %v1272_v23  ;;  %v864_v39 = vpop.f32.mrf.mxu0 }
 0x16e   :  { %v992_v41 = vpop.f32.mrf.mxu1  ;;  %v1635_v42 = vpop.eup %1634  ;;  %1365 = vst [vmem:[%s2641_s3 + $0xb8] sm:$0xff] %v1633_v28  ;;  %v1241_v43 = vadd.f32 %v2380_v48, %v864_v39 }
 0x16f   :  { %v1273_v44 = vadd.f32 %v2380_v48, %v992_v41  ;;  %1397 = vst [vmem:[%s2641_s3 + $0x1b8] sm:$0xff] %v1635_v42  ;;  %v866_v45 = vpop.f32.mrf.mxu0 }
 0x170   :  { %v994_v46 = vpop.f32.mrf.mxu1  ;;  %1648 = vtanh.f32 %v1241_v43 }
 0x171   :  { %v1637_v47 = vpop.eup %1636  ;;  %1650 = vtanh.f32 %v1273_v44  ;;  %v869_v1 = vpop.f32.mrf.mxu0 }
 0x172   :  { %v997_v2 = vpop.f32.mrf.mxu1  ;;  %v1639_v3 = vpop.eup %1638  ;;  %1366 = vst [vmem:[%s2641_s3 + $0xc0] sm:$0xff] %v1637_v47  ;;  %v1242_v5 = vadd.f32 %v2380_v48, %v869_v1 }
 0x173   :  { %v1274_v6 = vadd.f32 %v2380_v48, %v997_v2  ;;  %1398 = vst [vmem:[%s2641_s3 + $0x1c0] sm:$0xff] %v1639_v3  ;;  %v871_v7 = vpop.f32.mrf.mxu0 }
 0x174   :  { %v999_v17 = vpop.f32.mrf.mxu1  ;;  %1652 = vtanh.f32 %v1242_v5 }
 0x175   :  { %v1641_v26 = vpop.eup %1640  ;;  %1654 = vtanh.f32 %v1274_v6  ;;  %v872_v30 = vpop.f32.mrf.mxu0 }
 0x176   :  { %v1000_v31 = vpop.f32.mrf.mxu1  ;;  %v1643_v33 = vpop.eup %1642  ;;  %1367 = vst [vmem:[%s2641_s3 + $0xc8] sm:$0xff] %v1641_v26  ;;  %v1243_v50 = vadd.f32 %v2380_v48, %v872_v30 }
 0x177   :  { %v1275_v4 = vadd.f32 %v2380_v48, %v1000_v31  ;;  %1399 = vst [vmem:[%s2641_s3 + $0x1c8] sm:$0xff] %v1643_v33  ;;  %v874_v61 = vpop.f32.mrf.mxu0 }
 0x178   :  { %v1002_v62 = vpop.f32.mrf.mxu1  ;;  %1656 = vtanh.f32 %v1243_v50 }
 0x179   :  { %v1645_v18 = vpop.eup %1644  ;;  %1658 = vtanh.f32 %v1275_v4  ;;  %v877_v49 = vpop.f32.mrf.mxu0 }
 0x17a   :  { %v1005_v11 = vpop.f32.mrf.mxu1  ;;  %v1647_v13 = vpop.eup %1646  ;;  %1368 = vst [vmem:[%s2641_s3 + $0xd0] sm:$0xff] %v1645_v18  ;;  %v1244_v55 = vadd.f32 %v2380_v48, %v877_v49 }
 0x17b   :  { %v1276_v15 = vadd.f32 %v2380_v48, %v1005_v11  ;;  %1400 = vst [vmem:[%s2641_s3 + $0x1d0] sm:$0xff] %v1647_v13  ;;  %v879_v63 = vpop.f32.mrf.mxu0 }
 0x17c   :  { %v1007_v16 = vpop.f32.mrf.mxu1  ;;  %1660 = vtanh.f32 %v1244_v55 }
 0x17d   :  { %v1649_v8 = vpop.eup %1648  ;;  %1662 = vtanh.f32 %v1276_v15  ;;  %v880_v14 = vpop.f32.mrf.mxu0 }
 0x17e   :  { %v1008_v53 = vpop.f32.mrf.mxu1  ;;  %v1651_v54 = vpop.eup %1650  ;;  %1369 = vst [vmem:[%s2641_s3 + $0xd8] sm:$0xff] %v1649_v8  ;;  %v1245_v34 = vadd.f32 %v2380_v48, %v880_v14 }
 0x17f   :  { %v1277_v51 = vadd.f32 %v2380_v48, %v1008_v53  ;;  %1401 = vst [vmem:[%s2641_s3 + $0x1d8] sm:$0xff] %v1651_v54  ;;  %v882_v40 = vpop.f32.mrf.mxu0 }
 0x180   :  { %v1010_v35 = vpop.f32.mrf.mxu1  ;;  %1664 = vtanh.f32 %v1245_v34 }
 0x181   :  { %v1653_v38 = vpop.eup %1652  ;;  %1666 = vtanh.f32 %v1277_v51 }
 0x182   :  { %v1655_v59 = vpop.eup %1654  ;;  %1370 = vst [vmem:[%s2641_s3 + $0xe0] sm:$0xff] %v1653_v38 }
 0x183   :  { %1402 = vst [vmem:[%s2641_s3 + $0x1e0] sm:$0xff] %v1655_v59 }
 0x185   :  { %v1657_v32 = vpop.eup %1656 }
 0x186   :  { %v1659_v48 = vpop.eup %1658  ;;  %1371 = vst [vmem:[%s2641_s3 + $0xe8] sm:$0xff] %v1657_v32 }
 0x187   :  { %1403 = vst [vmem:[%s2641_s3 + $0x1e8] sm:$0xff] %v1659_v48 }
 0x189   :  { %v1661_v57 = vpop.eup %1660 }
 0x18a   :  { %v1663_v36 = vpop.eup %1662  ;;  %1372 = vst [vmem:[%s2641_s3 + $0xf0] sm:$0xff] %v1661_v57 }
 0x18b   :  { %1404 = vst [vmem:[%s2641_s3 + $0x1f0] sm:$0xff] %v1663_v36 }
 0x18d   :  { %v1665_v37 = vpop.eup %1664 }
 0x18e   :  { %v1667_v52 = vpop.eup %1666  ;;  %1373 = vst [vmem:[%s2641_s3 + $0xf8] sm:$0xff] %v1665_v37 }
 0x18f   :  { %1405 = vst [vmem:[%s2641_s3 + $0x1f8] sm:$0xff] %v1667_v52 }

</bundles_post_ra>
